<compile_context>
chip_gen: v5e
topology: v5e:2x2
jax: 0.10.0
libtpu: 0.0.40
codegen_flags: <defaults>
</compile_context>

<pallas_src>
import numpy as np
import jax
import jax.numpy as jnp
from jax.experimental import pallas as pl
from jax.experimental.pallas import tpu as pltpu

# ---------------- deterministic parameters ----------------
WINDOW_SIZE = 11
SIGMA = 1.5
REL_WEIGHT = 0.2
C1 = 0.01 ** 2
C2 = 0.03 ** 2

_C_IN = 3
_N_FEAT = 4


def _gaussian_1d(size, sigma):
    xs = np.arange(size, dtype=np.float64)
    g = np.exp(-((xs - size // 2) ** 2) / (2.0 * sigma ** 2))
    return (g / g.sum()).astype(np.float32)


# pytorch_ssim builds its 2D window as outer(g, g); applied separably here.
_G1D = _gaussian_1d(WINDOW_SIZE, SIGMA)

# Synthetic "perceptual" feature extractor (LPIPS-VGG stand-in), deterministic.
_rng = np.random.RandomState(0)
_CONV_W = (_rng.randn(3, 3, _C_IN, _N_FEAT) * 0.1).astype(np.float32)  # (kh,kw,cin,f)
_LIN_W = (np.abs(_rng.randn(_N_FEAT)) * 0.1).astype(np.float32)        # (f,)


# ---------------- host-side constant operator matrices ----------------
def _gauss_band(n):
    """M[i, j] = g[i - j + pad]  ->  zero-padded 'same' 11-tap conv as a matmul."""
    pad = WINDOW_SIZE // 2
    m = np.zeros((n, n), np.float32)
    for j in range(n):
        for k in range(WINDOW_SIZE):
            i = j + k - pad
            if 0 <= i < n:
                m[i, j] = _G1D[k]
    return m


# ---------------- in-kernel helpers (VPU/XLU, no MXU) ----------------
def _shift_rows(x, dr):
    """result[i, :] = x[i + dr, :], zero-filled outside the image."""
    if dr == 0:
        return x
    _, w = x.shape
    z = jnp.zeros((abs(dr), w), x.dtype)
    if dr > 0:
        return jnp.concatenate([x[dr:, :], z], axis=0)
    return jnp.concatenate([z, x[:dr, :]], axis=0)


def _shift_cols(x, dc):
    """result[:, j] = x[:, j + dc], zero-filled outside the image."""
    if dc == 0:
        return x
    h, _ = x.shape
    z = jnp.zeros((h, abs(dc)), x.dtype)
    if dc > 0:
        return jnp.concatenate([x[:, dc:], z], axis=1)
    return jnp.concatenate([z, x[:, :dc]], axis=1)


# ---------------- fused SSIM + perceptual kernel (one batch element / grid step) ----
def _loss_kernel(pred_ref, label_ref, gv_ref, gh_ref, ssim_ref, dist_ref):
    pred = pred_ref[...]          # (C, H, W) raw pixels in [0, 255]
    label = label_ref[...]
    gv = gv_ref[...]              # (H, H) vertical Gaussian band matrix (f32)
    gh = gh_ref[...]              # (W, W) horizontal Gaussian band matrix (f32)

    C, H, W = pred.shape

    inv255 = jnp.float32(1.0 / 255.0)
    x1 = pred * inv255            # SSIM inputs in [0, 1]
    x2 = label * inv255

    # ---- SSIM branch: separable 11x11 Gaussian blur, batched MXU matmuls ----
    def blur_stack(planes, op_dtype):
        """Zero-padded 'same' blur of a list of (H, W) planes.
        Horizontal pass: one (n*H, W)@(W, W) matmul (planes stacked along rows).
        Vertical pass:   one (H, H)@(H, n*W) matmul (planes stacked along lanes).
        f32 accumulation regardless of operand dtype."""
        n = len(planes)
        z = jnp.concatenate([p.astype(op_dtype) for p in planes], axis=0)   # (n*H, W)
        t1 = jnp.dot(z, gh.astype(op_dtype),
                     preferred_element_type=jnp.float32)                    # (n*H, W) f32
        t1 = t1.astype(op_dtype)
        t1c = jnp.concatenate([t1[i * H:(i + 1) * H, :] for i in range(n)],
                              axis=1)                                       # (H, n*W)
        t2 = jnp.dot(gv.astype(op_dtype), t1c,
                     preferred_element_type=jnp.float32)                    # (H, n*W) f32
        return [t2[:, i * W:(i + 1) * W] for i in range(n)]

    # first moments (mu): bf16 operands are safe here (review-sanctioned)
    mu_planes = [x1[c] for c in range(C)] + [x2[c] for c in range(C)]
    mu_blur = blur_stack(mu_planes, jnp.bfloat16)
    # second moments: keep f32 — blur(x^2) - mu^2 is cancellation-prone vs C1/C2
    sq_planes = ([x1[c] * x1[c] for c in range(C)]
                 + [x2[c] * x2[c] for c in range(C)]
                 + [x1[c] * x2[c] for c in range(C)])
    sq_blur = blur_stack(sq_planes, jnp.float32)

    ssim_sum = jnp.float32(0.0)
    for c in range(C):
        mu1 = mu_blur[c]
        mu2 = mu_blur[C + c]
        s11 = sq_blur[c] - mu1 * mu1          # f32 subtractions
        s22 = sq_blur[C + c] - mu2 * mu2
        s12 = sq_blur[2 * C + c] - mu1 * mu2
        num = (2.0 * mu1 * mu2 + C1) * (2.0 * s12 + C2)
        den = (mu1 * mu1 + mu2 * mu2 + C1) * (s11 + s22 + C2)
        # den >= C1*C2 > 0; approx reciprocal goes to the EUP slot (VALU freed)
        ssim_sum = ssim_sum + jnp.sum(num * pl.reciprocal(den, approx=True))
    ssim_mean = ssim_sum / float(C * H * W)

    # ---- perceptual branch: 3x3 conv via +/-1 zero-filled shifts + VPU FMA ----
    y1 = x1 * 2.0 - 1.0           # scale to [-1, 1] in-kernel
    y2 = x2 * 2.0 - 1.0

    def conv_feats(y):
        # stream one shifted plane at a time into F accumulators (bounds live planes)
        accs = [jnp.zeros((H, W), jnp.float32) for _ in range(_N_FEAT)]
        for c in range(C):
            yc = y[c]
            for kh in range(3):
                row = _shift_rows(yc, kh - 1)          # reused across kw
                for kw in range(3):
                    sh = _shift_cols(row, kw - 1)
                    for f in range(_N_FEAT):
                        w = float(_CONV_W[kh, kw, c, f])   # tap folded as immediate
                        accs[f] = accs[f] + w * sh
        return [jnp.maximum(a, 0.0) for a in accs]         # ReLU

    f1 = conv_feats(y1)
    f2 = conv_feats(y2)

    eps = jnp.float32(1e-10)
    n1sq = f1[0] * f1[0]
    n2sq = f2[0] * f2[0]
    for f in range(1, _N_FEAT):
        n1sq = n1sq + f1[f] * f1[f]
        n2sq = n2sq + f2[f] * f2[f]
    inv1 = jax.lax.rsqrt(n1sq + eps)      # EUP rsqrt instead of 1/(sqrt(.)+eps)
    inv2 = jax.lax.rsqrt(n2sq + eps)

    dist = jnp.zeros((H, W), jnp.float32)
    for f in range(_N_FEAT):
        d = f1[f] * inv1 - f2[f] * inv2
        dist = dist + float(_LIN_W[f]) * (d * d)
    dist_mean = jnp.sum(dist) / float(H * W)      # spatial mean per sample

    # lane-aligned (8,128) per-image outputs; batch mean combined outside
    ssim_ref[...] = jnp.broadcast_to(ssim_mean, (8, 128))
    dist_ref[...] = jnp.broadcast_to(dist_mean, (8, 128))


# ---------------- wrapper ----------------
def my_loss(pred, label, relative_weight=REL_WEIGHT):
    pred = pred.astype(jnp.float32)
    label = label.astype(jnp.float32)
    B, C, H, W = pred.shape
    assert C == _C_IN, "feature-extractor stand-in expects 3 input channels"

    # Gaussian band matrices (zero-padded 'same' blur as banded matmuls)
    gv = jnp.asarray(_gauss_band(H).T)   # (H, H) vertical pass (left-multiply)
    gh = jnp.asarray(_gauss_band(W))     # (W, W) horizontal pass (right-multiply)

    # advisory cost estimate (conv counted as FMAs, not dense matmuls; no stray *8)
    blur_flops = 15 * (2 * H * W * W + 2 * H * H * W)         # batched blur matmuls
    conv_flops = 2 * 27 * _N_FEAT * 2 * H * W                 # shift-conv FMAs
    elem_flops = 250 * H * W                                  # SSIM / epilogue VPU
    cost = pl.CostEstimate(
        flops=int(B * (blur_flops + conv_flops + elem_flops)),
        transcendentals=int(B * 5 * H * W),                   # recip + rsqrt planes
        bytes_accessed=int(2 * B * C * H * W * 4
                           + (H * H + W * W) * 4
                           + 2 * B * 8 * 128 * 4))

    # generation-aware VMEM budget (v5e/v6e 128 MiB, v7x 64 MiB)
    try:
        vmem_cap = int(pltpu.get_tpu_info().vmem_capacity_bytes)
    except Exception:  # conservative fallback if the query is unavailable
        vmem_cap = 64 * 1024 * 1024
    plane = H * W * 4
    vmem_est = (4 * C * plane                 # pred+label x 2 pipeline buffers
                + 2 * (H * H + W * W) * 4    # gv/gh (double-buffered)
                + 60 * plane                 # blur stacks + live temporaries
                + (2 << 20))                 # slack
    vmem_limit = int(max(8 << 20, min(vmem_est, int(0.8 * vmem_cap))))

    ssim_parts, dist_parts = pl.pallas_call(
        _loss_kernel,
        out_shape=(jax.ShapeDtypeStruct((B, 8, 128), jnp.float32),
                   jax.ShapeDtypeStruct((B, 8, 128), jnp.float32)),
        grid=(B,),
        in_specs=[
            pl.BlockSpec((None, C, H, W), lambda b: (b, 0, 0, 0)),   # pred
            pl.BlockSpec((None, C, H, W), lambda b: (b, 0, 0, 0)),   # label
            pl.BlockSpec((H, H), lambda b: (0, 0)),                  # gv
            pl.BlockSpec((W, W), lambda b: (0, 0)),                  # gh
        ],
        out_specs=(pl.BlockSpec((None, 8, 128), lambda b: (b, 0, 0)),
                   pl.BlockSpec((None, 8, 128), lambda b: (b, 0, 0))),
        compiler_params=pltpu.CompilerParams(
            dimension_semantics=("parallel",),       # batch split across TCs (v7x)
            vmem_limit_bytes=vmem_limit),
        cost_estimate=cost,
    )(pred, label, gv, gh)

    # tiny cross-batch combine outside the kernel (exact: equal-sized images)
    ssim_val = jnp.mean(ssim_parts[:, 0, 0])
    perceptual = jnp.mean(dist_parts[:, 0, 0]) * relative_weight
    return (1.0 - ssim_val) + perceptual


if __name__ == "__main__":
    key = jax.random.PRNGKey(0)
    k1, k2 = jax.random.split(key)
    B, C, H, W = 2, 3, 16, 16
    pred = jax.random.uniform(k1, (B, C, H, W), jnp.float32, 0.0, 255.0)
    label = jax.random.uniform(k2, (B, C, H, W), jnp.float32, 0.0, 255.0)

    loss = jax.jit(my_loss)(pred, label)
    jax.block_until_ready(loss)
    assert loss.shape == () and bool(jnp.isfinite(loss))
    print("KERNEL_OK")
</pallas_src>

<mosaic_0001>
module attributes {stable_mosaic.version = 11 : i64} {
  func.func @_loss_kernel(%arg0: i32, %arg1: memref<1x3x16x16xf32, #tpu.memory_space<vmem>>, %arg2: memref<1x3x16x16xf32, #tpu.memory_space<vmem>>, %arg3: memref<16x16xf32, #tpu.memory_space<vmem>>, %arg4: memref<16x16xf32, #tpu.memory_space<vmem>>, %arg5: memref<1x8x128xf32, #tpu.memory_space<vmem>>, %arg6: memref<1x8x128xf32, #tpu.memory_space<vmem>>) attributes {dimension_semantics = [#tpu.dimension_semantics<parallel>], iteration_bounds = array<i64: 2>, scalar_prefetch = 0 : i64, scratch_operands = 0 : i64, tpu.core_type = #tpu.core_type<tc>, window_params = [{transform_indices = @transform_0, window_bounds = array<i64: 1, 3, 16, 16>}, {transform_indices = @transform_1, window_bounds = array<i64: 1, 3, 16, 16>}, {pipeline_mode = #tpu.pipeline_mode<synchronous>, transform_indices = @transform_2, window_bounds = array<i64: 16, 16>}, {pipeline_mode = #tpu.pipeline_mode<synchronous>, transform_indices = @transform_3, window_bounds = array<i64: 16, 16>}, {transform_indices = @transform_4, window_bounds = array<i64: 1, 8, 128>}, {transform_indices = @transform_5, window_bounds = array<i64: 1, 8, 128>}]} {
    %c0 = arith.constant 0 : index
    %c0_0 = arith.constant 0 : index
    %c0_1 = arith.constant 0 : index
    %c0_2 = arith.constant 0 : index
    %0 = vector.load %arg1[%c0, %c0_0, %c0_1, %c0_2] : memref<1x3x16x16xf32, #tpu.memory_space<vmem>>, vector<1x3x16x16xf32>
    %1 = vector.shape_cast %0 : vector<1x3x16x16xf32> to vector<3x16x16xf32>
    %c0_3 = arith.constant 0 : index
    %c0_4 = arith.constant 0 : index
    %c0_5 = arith.constant 0 : index
    %c0_6 = arith.constant 0 : index
    %2 = vector.load %arg2[%c0_3, %c0_4, %c0_5, %c0_6] : memref<1x3x16x16xf32, #tpu.memory_space<vmem>>, vector<1x3x16x16xf32>
    %3 = vector.shape_cast %2 : vector<1x3x16x16xf32> to vector<3x16x16xf32>
    %c0_7 = arith.constant 0 : index
    %c0_8 = arith.constant 0 : index
    %4 = vector.load %arg3[%c0_7, %c0_8] : memref<16x16xf32, #tpu.memory_space<vmem>>, vector<16x16xf32>
    %c0_9 = arith.constant 0 : index
    %c0_10 = arith.constant 0 : index
    %5 = vector.load %arg4[%c0_9, %c0_10] : memref<16x16xf32, #tpu.memory_space<vmem>>, vector<16x16xf32>
    %cst = arith.constant 0.00392156886 : f32
    %6 = vector.broadcast %cst : f32 to vector<3x16x16xf32>
    %7 = arith.mulf %1, %6 : vector<3x16x16xf32>
    %cst_11 = arith.constant 0.00392156886 : f32
    %8 = vector.broadcast %cst_11 : f32 to vector<3x16x16xf32>
    %9 = arith.mulf %3, %8 : vector<3x16x16xf32>
    %10 = vector.extract_strided_slice %7 {offsets = [0, 0, 0], sizes = [1, 16, 16], strides = [1, 1, 1]} : vector<3x16x16xf32> to vector<1x16x16xf32>
    %11 = vector.shape_cast %10 : vector<1x16x16xf32> to vector<16x16xf32>
    %12 = vector.extract_strided_slice %7 {offsets = [1, 0, 0], sizes = [1, 16, 16], strides = [1, 1, 1]} : vector<3x16x16xf32> to vector<1x16x16xf32>
    %13 = vector.shape_cast %12 : vector<1x16x16xf32> to vector<16x16xf32>
    %14 = vector.extract_strided_slice %7 {offsets = [2, 0, 0], sizes = [1, 16, 16], strides = [1, 1, 1]} : vector<3x16x16xf32> to vector<1x16x16xf32>
    %15 = vector.shape_cast %14 : vector<1x16x16xf32> to vector<16x16xf32>
    %16 = vector.extract_strided_slice %9 {offsets = [0, 0, 0], sizes = [1, 16, 16], strides = [1, 1, 1]} : vector<3x16x16xf32> to vector<1x16x16xf32>
    %17 = vector.shape_cast %16 : vector<1x16x16xf32> to vector<16x16xf32>
    %18 = vector.extract_strided_slice %9 {offsets = [1, 0, 0], sizes = [1, 16, 16], strides = [1, 1, 1]} : vector<3x16x16xf32> to vector<1x16x16xf32>
    %19 = vector.shape_cast %18 : vector<1x16x16xf32> to vector<16x16xf32>
    %20 = vector.extract_strided_slice %9 {offsets = [2, 0, 0], sizes = [1, 16, 16], strides = [1, 1, 1]} : vector<3x16x16xf32> to vector<1x16x16xf32>
    %21 = vector.shape_cast %20 : vector<1x16x16xf32> to vector<16x16xf32>
    %22 = arith.truncf %11 : vector<16x16xf32> to vector<16x16xbf16>
    %23 = arith.truncf %13 : vector<16x16xf32> to vector<16x16xbf16>
    %24 = arith.truncf %15 : vector<16x16xf32> to vector<16x16xbf16>
    %25 = arith.truncf %17 : vector<16x16xf32> to vector<16x16xbf16>
    %26 = arith.truncf %19 : vector<16x16xf32> to vector<16x16xbf16>
    %27 = arith.truncf %21 : vector<16x16xf32> to vector<16x16xbf16>
    %28 = tpu.concatenate %22, %23, %24, %25, %26, %27 in 0 : vector<16x16xbf16>, vector<16x16xbf16>, vector<16x16xbf16>, vector<16x16xbf16>, vector<16x16xbf16>, vector<16x16xbf16> -> vector<96x16xbf16>
    %29 = arith.truncf %5 : vector<16x16xf32> to vector<16x16xbf16>
    %cst_12 = arith.constant dense<0.000000e+00> : vector<96x16xf32>
    %30 = tpu.matmul %28, %29, %cst_12 {dimension_numbers = #tpu.dot_dimension_numbers<[1], [0], [0], [1], [0, 0, 1, 1], [], []>} : vector<96x16xbf16>, vector<16x16xbf16>, vector<96x16xf32> -> vector<96x16xf32>
    %31 = arith.truncf %30 : vector<96x16xf32> to vector<96x16xbf16>
    %32 = vector.extract_strided_slice %31 {offsets = [0, 0], sizes = [16, 16], strides = [1, 1]} : vector<96x16xbf16> to vector<16x16xbf16>
    %33 = vector.extract_strided_slice %31 {offsets = [16, 0], sizes = [16, 16], strides = [1, 1]} : vector<96x16xbf16> to vector<16x16xbf16>
    %34 = vector.extract_strided_slice %31 {offsets = [32, 0], sizes = [16, 16], strides = [1, 1]} : vector<96x16xbf16> to vector<16x16xbf16>
    %35 = vector.extract_strided_slice %31 {offsets = [48, 0], sizes = [16, 16], strides = [1, 1]} : vector<96x16xbf16> to vector<16x16xbf16>
    %36 = vector.extract_strided_slice %31 {offsets = [64, 0], sizes = [16, 16], strides = [1, 1]} : vector<96x16xbf16> to vector<16x16xbf16>
    %37 = vector.extract_strided_slice %31 {offsets = [80, 0], sizes = [16, 16], strides = [1, 1]} : vector<96x16xbf16> to vector<16x16xbf16>
    %38 = tpu.concatenate %32, %33, %34, %35, %36, %37 in 1 : vector<16x16xbf16>, vector<16x16xbf16>, vector<16x16xbf16>, vector<16x16xbf16>, vector<16x16xbf16>, vector<16x16xbf16> -> vector<16x96xbf16>
    %39 = arith.truncf %4 : vector<16x16xf32> to vector<16x16xbf16>
    %cst_13 = arith.constant dense<0.000000e+00> : vector<16x96xf32>
    %40 = tpu.matmul %39, %38, %cst_13 {dimension_numbers = #tpu.dot_dimension_numbers<[1], [0], [0], [1], [0, 0, 1, 1], [], []>} : vector<16x16xbf16>, vector<16x96xbf16>, vector<16x96xf32> -> vector<16x96xf32>
    %41 = vector.extract_strided_slice %40 {offsets = [0, 0], sizes = [16, 16], strides = [1, 1]} : vector<16x96xf32> to vector<16x16xf32>
    %42 = vector.extract_strided_slice %40 {offsets = [0, 16], sizes = [16, 16], strides = [1, 1]} : vector<16x96xf32> to vector<16x16xf32>
    %43 = vector.extract_strided_slice %40 {offsets = [0, 32], sizes = [16, 16], strides = [1, 1]} : vector<16x96xf32> to vector<16x16xf32>
    %44 = vector.extract_strided_slice %40 {offsets = [0, 48], sizes = [16, 16], strides = [1, 1]} : vector<16x96xf32> to vector<16x16xf32>
    %45 = vector.extract_strided_slice %40 {offsets = [0, 64], sizes = [16, 16], strides = [1, 1]} : vector<16x96xf32> to vector<16x16xf32>
    %46 = vector.extract_strided_slice %40 {offsets = [0, 80], sizes = [16, 16], strides = [1, 1]} : vector<16x96xf32> to vector<16x16xf32>
    %47 = vector.extract_strided_slice %7 {offsets = [0, 0, 0], sizes = [1, 16, 16], strides = [1, 1, 1]} : vector<3x16x16xf32> to vector<1x16x16xf32>
    %48 = vector.shape_cast %47 : vector<1x16x16xf32> to vector<16x16xf32>
    %49 = vector.extract_strided_slice %7 {offsets = [0, 0, 0], sizes = [1, 16, 16], strides = [1, 1, 1]} : vector<3x16x16xf32> to vector<1x16x16xf32>
    %50 = vector.shape_cast %49 : vector<1x16x16xf32> to vector<16x16xf32>
    %51 = arith.mulf %48, %50 : vector<16x16xf32>
    %52 = vector.extract_strided_slice %7 {offsets = [1, 0, 0], sizes = [1, 16, 16], strides = [1, 1, 1]} : vector<3x16x16xf32> to vector<1x16x16xf32>
    %53 = vector.shape_cast %52 : vector<1x16x16xf32> to vector<16x16xf32>
    %54 = vector.extract_strided_slice %7 {offsets = [1, 0, 0], sizes = [1, 16, 16], strides = [1, 1, 1]} : vector<3x16x16xf32> to vector<1x16x16xf32>
    %55 = vector.shape_cast %54 : vector<1x16x16xf32> to vector<16x16xf32>
    %56 = arith.mulf %53, %55 : vector<16x16xf32>
    %57 = vector.extract_strided_slice %7 {offsets = [2, 0, 0], sizes = [1, 16, 16], strides = [1, 1, 1]} : vector<3x16x16xf32> to vector<1x16x16xf32>
    %58 = vector.shape_cast %57 : vector<1x16x16xf32> to vector<16x16xf32>
    %59 = vector.extract_strided_slice %7 {offsets = [2, 0, 0], sizes = [1, 16, 16], strides = [1, 1, 1]} : vector<3x16x16xf32> to vector<1x16x16xf32>
    %60 = vector.shape_cast %59 : vector<1x16x16xf32> to vector<16x16xf32>
    %61 = arith.mulf %58, %60 : vector<16x16xf32>
    %62 = vector.extract_strided_slice %9 {offsets = [0, 0, 0], sizes = [1, 16, 16], strides = [1, 1, 1]} : vector<3x16x16xf32> to vector<1x16x16xf32>
    %63 = vector.shape_cast %62 : vector<1x16x16xf32> to vector<16x16xf32>
    %64 = vector.extract_strided_slice %9 {offsets = [0, 0, 0], sizes = [1, 16, 16], strides = [1, 1, 1]} : vector<3x16x16xf32> to vector<1x16x16xf32>
    %65 = vector.shape_cast %64 : vector<1x16x16xf32> to vector<16x16xf32>
    %66 = arith.mulf %63, %65 : vector<16x16xf32>
    %67 = vector.extract_strided_slice %9 {offsets = [1, 0, 0], sizes = [1, 16, 16], strides = [1, 1, 1]} : vector<3x16x16xf32> to vector<1x16x16xf32>
    %68 = vector.shape_cast %67 : vector<1x16x16xf32> to vector<16x16xf32>
    %69 = vector.extract_strided_slice %9 {offsets = [1, 0, 0], sizes = [1, 16, 16], strides = [1, 1, 1]} : vector<3x16x16xf32> to vector<1x16x16xf32>
    %70 = vector.shape_cast %69 : vector<1x16x16xf32> to vector<16x16xf32>
    %71 = arith.mulf %68, %70 : vector<16x16xf32>
    %72 = vector.extract_strided_slice %9 {offsets = [2, 0, 0], sizes = [1, 16, 16], strides = [1, 1, 1]} : vector<3x16x16xf32> to vector<1x16x16xf32>
    %73 = vector.shape_cast %72 : vector<1x16x16xf32> to vector<16x16xf32>
    %74 = vector.extract_strided_slice %9 {offsets = [2, 0, 0], sizes = [1, 16, 16], strides = [1, 1, 1]} : vector<3x16x16xf32> to vector<1x16x16xf32>
    %75 = vector.shape_cast %74 : vector<1x16x16xf32> to vector<16x16xf32>
    %76 = arith.mulf %73, %75 : vector<16x16xf32>
    %77 = vector.extract_strided_slice %7 {offsets = [0, 0, 0], sizes = [1, 16, 16], strides = [1, 1, 1]} : vector<3x16x16xf32> to vector<1x16x16xf32>
    %78 = vector.shape_cast %77 : vector<1x16x16xf32> to vector<16x16xf32>
    %79 = vector.extract_strided_slice %9 {offsets = [0, 0, 0], sizes = [1, 16, 16], strides = [1, 1, 1]} : vector<3x16x16xf32> to vector<1x16x16xf32>
    %80 = vector.shape_cast %79 : vector<1x16x16xf32> to vector<16x16xf32>
    %81 = arith.mulf %78, %80 : vector<16x16xf32>
    %82 = vector.extract_strided_slice %7 {offsets = [1, 0, 0], sizes = [1, 16, 16], strides = [1, 1, 1]} : vector<3x16x16xf32> to vector<1x16x16xf32>
    %83 = vector.shape_cast %82 : vector<1x16x16xf32> to vector<16x16xf32>
    %84 = vector.extract_strided_slice %9 {offsets = [1, 0, 0], sizes = [1, 16, 16], strides = [1, 1, 1]} : vector<3x16x16xf32> to vector<1x16x16xf32>
    %85 = vector.shape_cast %84 : vector<1x16x16xf32> to vector<16x16xf32>
    %86 = arith.mulf %83, %85 : vector<16x16xf32>
    %87 = vector.extract_strided_slice %7 {offsets = [2, 0, 0], sizes = [1, 16, 16], strides = [1, 1, 1]} : vector<3x16x16xf32> to vector<1x16x16xf32>
    %88 = vector.shape_cast %87 : vector<1x16x16xf32> to vector<16x16xf32>
    %89 = vector.extract_strided_slice %9 {offsets = [2, 0, 0], sizes = [1, 16, 16], strides = [1, 1, 1]} : vector<3x16x16xf32> to vector<1x16x16xf32>
    %90 = vector.shape_cast %89 : vector<1x16x16xf32> to vector<16x16xf32>
    %91 = arith.mulf %88, %90 : vector<16x16xf32>
    %92 = tpu.concatenate %51, %56, %61, %66, %71, %76, %81, %86, %91 in 0 : vector<16x16xf32>, vector<16x16xf32>, vector<16x16xf32>, vector<16x16xf32>, vector<16x16xf32>, vector<16x16xf32>, vector<16x16xf32>, vector<16x16xf32>, vector<16x16xf32> -> vector<144x16xf32>
    %cst_14 = arith.constant dense<0.000000e+00> : vector<144x16xf32>
    %93 = tpu.matmul %92, %5, %cst_14 {dimension_numbers = #tpu.dot_dimension_numbers<[1], [0], [0], [1], [0, 0, 1, 1], [], []>} : vector<144x16xf32>, vector<16x16xf32>, vector<144x16xf32> -> vector<144x16xf32>
    %94 = vector.extract_strided_slice %93 {offsets = [0, 0], sizes = [16, 16], strides = [1, 1]} : vector<144x16xf32> to vector<16x16xf32>
    %95 = vector.extract_strided_slice %93 {offsets = [16, 0], sizes = [16, 16], strides = [1, 1]} : vector<144x16xf32> to vector<16x16xf32>
    %96 = vector.extract_strided_slice %93 {offsets = [32, 0], sizes = [16, 16], strides = [1, 1]} : vector<144x16xf32> to vector<16x16xf32>
    %97 = vector.extract_strided_slice %93 {offsets = [48, 0], sizes = [16, 16], strides = [1, 1]} : vector<144x16xf32> to vector<16x16xf32>
    %98 = vector.extract_strided_slice %93 {offsets = [64, 0], sizes = [16, 16], strides = [1, 1]} : vector<144x16xf32> to vector<16x16xf32>
    %99 = vector.extract_strided_slice %93 {offsets = [80, 0], sizes = [16, 16], strides = [1, 1]} : vector<144x16xf32> to vector<16x16xf32>
    %100 = vector.extract_strided_slice %93 {offsets = [96, 0], sizes = [16, 16], strides = [1, 1]} : vector<144x16xf32> to vector<16x16xf32>
    %101 = vector.extract_strided_slice %93 {offsets = [112, 0], sizes = [16, 16], strides = [1, 1]} : vector<144x16xf32> to vector<16x16xf32>
    %102 = vector.extract_strided_slice %93 {offsets = [128, 0], sizes = [16, 16], strides = [1, 1]} : vector<144x16xf32> to vector<16x16xf32>
    %103 = tpu.concatenate %94, %95, %96, %97, %98, %99, %100, %101, %102 in 1 : vector<16x16xf32>, vector<16x16xf32>, vector<16x16xf32>, vector<16x16xf32>, vector<16x16xf32>, vector<16x16xf32>, vector<16x16xf32>, vector<16x16xf32>, vector<16x16xf32> -> vector<16x144xf32>
    %cst_15 = arith.constant dense<0.000000e+00> : vector<16x144xf32>
    %104 = tpu.matmul %4, %103, %cst_15 {dimension_numbers = #tpu.dot_dimension_numbers<[1], [0], [0], [1], [0, 0, 1, 1], [], []>} : vector<16x16xf32>, vector<16x144xf32>, vector<16x144xf32> -> vector<16x144xf32>
    %105 = vector.extract_strided_slice %104 {offsets = [0, 0], sizes = [16, 16], strides = [1, 1]} : vector<16x144xf32> to vector<16x16xf32>
    %106 = vector.extract_strided_slice %104 {offsets = [0, 16], sizes = [16, 16], strides = [1, 1]} : vector<16x144xf32> to vector<16x16xf32>
    %107 = vector.extract_strided_slice %104 {offsets = [0, 32], sizes = [16, 16], strides = [1, 1]} : vector<16x144xf32> to vector<16x16xf32>
    %108 = vector.extract_strided_slice %104 {offsets = [0, 48], sizes = [16, 16], strides = [1, 1]} : vector<16x144xf32> to vector<16x16xf32>
    %109 = vector.extract_strided_slice %104 {offsets = [0, 64], sizes = [16, 16], strides = [1, 1]} : vector<16x144xf32> to vector<16x16xf32>
    %110 = vector.extract_strided_slice %104 {offsets = [0, 80], sizes = [16, 16], strides = [1, 1]} : vector<16x144xf32> to vector<16x16xf32>
    %111 = vector.extract_strided_slice %104 {offsets = [0, 96], sizes = [16, 16], strides = [1, 1]} : vector<16x144xf32> to vector<16x16xf32>
    %112 = vector.extract_strided_slice %104 {offsets = [0, 112], sizes = [16, 16], strides = [1, 1]} : vector<16x144xf32> to vector<16x16xf32>
    %113 = vector.extract_strided_slice %104 {offsets = [0, 128], sizes = [16, 16], strides = [1, 1]} : vector<16x144xf32> to vector<16x16xf32>
    %114 = arith.mulf %41, %41 : vector<16x16xf32>
    %115 = arith.subf %105, %114 : vector<16x16xf32>
    %116 = arith.mulf %44, %44 : vector<16x16xf32>
    %117 = arith.subf %108, %116 : vector<16x16xf32>
    %118 = arith.mulf %41, %44 : vector<16x16xf32>
    %119 = arith.subf %111, %118 : vector<16x16xf32>
    %cst_16 = arith.constant 2.000000e+00 : f32
    %120 = vector.broadcast %cst_16 : f32 to vector<16x16xf32>
    %121 = arith.mulf %120, %41 : vector<16x16xf32>
    %122 = arith.mulf %121, %44 : vector<16x16xf32>
    %cst_17 = arith.constant 9.99999974E-5 : f32
    %123 = vector.broadcast %cst_17 : f32 to vector<16x16xf32>
    %124 = arith.addf %122, %123 : vector<16x16xf32>
    %cst_18 = arith.constant 2.000000e+00 : f32
    %125 = vector.broadcast %cst_18 : f32 to vector<16x16xf32>
    %126 = arith.mulf %125, %119 : vector<16x16xf32>
    %cst_19 = arith.constant 8.99999984E-4 : f32
    %127 = vector.broadcast %cst_19 : f32 to vector<16x16xf32>
    %128 = arith.addf %126, %127 : vector<16x16xf32>
    %129 = arith.mulf %124, %128 : vector<16x16xf32>
    %130 = arith.mulf %41, %41 : vector<16x16xf32>
    %131 = arith.mulf %44, %44 : vector<16x16xf32>
    %132 = arith.addf %130, %131 : vector<16x16xf32>
    %cst_20 = arith.constant 9.99999974E-5 : f32
    %133 = vector.broadcast %cst_20 : f32 to vector<16x16xf32>
    %134 = arith.addf %132, %133 : vector<16x16xf32>
    %135 = arith.addf %115, %117 : vector<16x16xf32>
    %cst_21 = arith.constant 8.99999984E-4 : f32
    %136 = vector.broadcast %cst_21 : f32 to vector<16x16xf32>
    %137 = arith.addf %135, %136 : vector<16x16xf32>
    %138 = arith.mulf %134, %137 : vector<16x16xf32>
    %139 = tpu.reciprocal %138 {approx = true} : vector<16x16xf32> -> vector<16x16xf32>
    %140 = arith.mulf %129, %139 : vector<16x16xf32>
    %141 = vector.shape_cast %140 : vector<16x16xf32> to vector<1x16x16xf32>
    %cst_22 = arith.constant dense<0.000000e+00> : vector<1xf32>
    %142 = vector.multi_reduction <add>, %141, %cst_22 [1, 2] : vector<1x16x16xf32> to vector<1xf32>
    %143 = vector.shape_cast %142 : vector<1xf32> to vector<1x1x1xf32>
    %144 = vector.extract %143[0, 0, 0] : f32 from vector<1x1x1xf32>
    %cst_23 = arith.constant 0.000000e+00 : f32
    %145 = arith.addf %cst_23, %144 : f32
    %146 = arith.mulf %42, %42 : vector<16x16xf32>
    %147 = arith.subf %106, %146 : vector<16x16xf32>
    %148 = arith.mulf %45, %45 : vector<16x16xf32>
    %149 = arith.subf %109, %148 : vector<16x16xf32>
    %150 = arith.mulf %42, %45 : vector<16x16xf32>
    %151 = arith.subf %112, %150 : vector<16x16xf32>
    %cst_24 = arith.constant 2.000000e+00 : f32
    %152 = vector.broadcast %cst_24 : f32 to vector<16x16xf32>
    %153 = arith.mulf %152, %42 : vector<16x16xf32>
    %154 = arith.mulf %153, %45 : vector<16x16xf32>
    %cst_25 = arith.constant 9.99999974E-5 : f32
    %155 = vector.broadcast %cst_25 : f32 to vector<16x16xf32>
    %156 = arith.addf %154, %155 : vector<16x16xf32>
    %cst_26 = arith.constant 2.000000e+00 : f32
    %157 = vector.broadcast %cst_26 : f32 to vector<16x16xf32>
    %158 = arith.mulf %157, %151 : vector<16x16xf32>
    %cst_27 = arith.constant 8.99999984E-4 : f32
    %159 = vector.broadcast %cst_27 : f32 to vector<16x16xf32>
    %160 = arith.addf %158, %159 : vector<16x16xf32>
    %161 = arith.mulf %156, %160 : vector<16x16xf32>
    %162 = arith.mulf %42, %42 : vector<16x16xf32>
    %163 = arith.mulf %45, %45 : vector<16x16xf32>
    %164 = arith.addf %162, %163 : vector<16x16xf32>
    %cst_28 = arith.constant 9.99999974E-5 : f32
    %165 = vector.broadcast %cst_28 : f32 to vector<16x16xf32>
    %166 = arith.addf %164, %165 : vector<16x16xf32>
    %167 = arith.addf %147, %149 : vector<16x16xf32>
    %cst_29 = arith.constant 8.99999984E-4 : f32
    %168 = vector.broadcast %cst_29 : f32 to vector<16x16xf32>
    %169 = arith.addf %167, %168 : vector<16x16xf32>
    %170 = arith.mulf %166, %169 : vector<16x16xf32>
    %171 = tpu.reciprocal %170 {approx = true} : vector<16x16xf32> -> vector<16x16xf32>
    %172 = arith.mulf %161, %171 : vector<16x16xf32>
    %173 = vector.shape_cast %172 : vector<16x16xf32> to vector<1x16x16xf32>
    %cst_30 = arith.constant dense<0.000000e+00> : vector<1xf32>
    %174 = vector.multi_reduction <add>, %173, %cst_30 [1, 2] : vector<1x16x16xf32> to vector<1xf32>
    %175 = vector.shape_cast %174 : vector<1xf32> to vector<1x1x1xf32>
    %176 = vector.extract %175[0, 0, 0] : f32 from vector<1x1x1xf32>
    %177 = arith.addf %145, %176 : f32
    %178 = arith.mulf %43, %43 : vector<16x16xf32>
    %179 = arith.subf %107, %178 : vector<16x16xf32>
    %180 = arith.mulf %46, %46 : vector<16x16xf32>
    %181 = arith.subf %110, %180 : vector<16x16xf32>
    %182 = arith.mulf %43, %46 : vector<16x16xf32>
    %183 = arith.subf %113, %182 : vector<16x16xf32>
    %cst_31 = arith.constant 2.000000e+00 : f32
    %184 = vector.broadcast %cst_31 : f32 to vector<16x16xf32>
    %185 = arith.mulf %184, %43 : vector<16x16xf32>
    %186 = arith.mulf %185, %46 : vector<16x16xf32>
    %cst_32 = arith.constant 9.99999974E-5 : f32
    %187 = vector.broadcast %cst_32 : f32 to vector<16x16xf32>
    %188 = arith.addf %186, %187 : vector<16x16xf32>
    %cst_33 = arith.constant 2.000000e+00 : f32
    %189 = vector.broadcast %cst_33 : f32 to vector<16x16xf32>
    %190 = arith.mulf %189, %183 : vector<16x16xf32>
    %cst_34 = arith.constant 8.99999984E-4 : f32
    %191 = vector.broadcast %cst_34 : f32 to vector<16x16xf32>
    %192 = arith.addf %190, %191 : vector<16x16xf32>
    %193 = arith.mulf %188, %192 : vector<16x16xf32>
    %194 = arith.mulf %43, %43 : vector<16x16xf32>
    %195 = arith.mulf %46, %46 : vector<16x16xf32>
    %196 = arith.addf %194, %195 : vector<16x16xf32>
    %cst_35 = arith.constant 9.99999974E-5 : f32
    %197 = vector.broadcast %cst_35 : f32 to vector<16x16xf32>
    %198 = arith.addf %196, %197 : vector<16x16xf32>
    %199 = arith.addf %179, %181 : vector<16x16xf32>
    %cst_36 = arith.constant 8.99999984E-4 : f32
    %200 = vector.broadcast %cst_36 : f32 to vector<16x16xf32>
    %201 = arith.addf %199, %200 : vector<16x16xf32>
    %202 = arith.mulf %198, %201 : vector<16x16xf32>
    %203 = tpu.reciprocal %202 {approx = true} : vector<16x16xf32> -> vector<16x16xf32>
    %204 = arith.mulf %193, %203 : vector<16x16xf32>
    %205 = vector.shape_cast %204 : vector<16x16xf32> to vector<1x16x16xf32>
    %cst_37 = arith.constant dense<0.000000e+00> : vector<1xf32>
    %206 = vector.multi_reduction <add>, %205, %cst_37 [1, 2] : vector<1x16x16xf32> to vector<1xf32>
    %207 = vector.shape_cast %206 : vector<1xf32> to vector<1x1x1xf32>
    %208 = vector.extract %207[0, 0, 0] : f32 from vector<1x1x1xf32>
    %209 = arith.addf %177, %208 : f32
    %cst_38 = arith.constant 7.680000e+02 : f32
    %210 = arith.divf %209, %cst_38 : f32
    %cst_39 = arith.constant 2.000000e+00 : f32
    %211 = vector.broadcast %cst_39 : f32 to vector<3x16x16xf32>
    %212 = arith.mulf %7, %211 : vector<3x16x16xf32>
    %cst_40 = arith.constant 1.000000e+00 : f32
    %213 = vector.broadcast %cst_40 : f32 to vector<3x16x16xf32>
    %214 = arith.subf %212, %213 : vector<3x16x16xf32>
    %cst_41 = arith.constant 2.000000e+00 : f32
    %215 = vector.broadcast %cst_41 : f32 to vector<3x16x16xf32>
    %216 = arith.mulf %9, %215 : vector<3x16x16xf32>
    %cst_42 = arith.constant 1.000000e+00 : f32
    %217 = vector.broadcast %cst_42 : f32 to vector<3x16x16xf32>
    %218 = arith.subf %216, %217 : vector<3x16x16xf32>
    %cst_43 = arith.constant 0.000000e+00 : f32
    %219 = vector.broadcast %cst_43 : f32 to vector<16x16xf32>
    %cst_44 = arith.constant 0.000000e+00 : f32
    %220 = vector.broadcast %cst_44 : f32 to vector<16x16xf32>
    %cst_45 = arith.constant 0.000000e+00 : f32
    %221 = vector.broadcast %cst_45 : f32 to vector<16x16xf32>
    %cst_46 = arith.constant 0.000000e+00 : f32
    %222 = vector.broadcast %cst_46 : f32 to vector<16x16xf32>
    %223 = vector.extract_strided_slice %214 {offsets = [0, 0, 0], sizes = [1, 16, 16], strides = [1, 1, 1]} : vector<3x16x16xf32> to vector<1x16x16xf32>
    %224 = vector.shape_cast %223 : vector<1x16x16xf32> to vector<16x16xf32>
    %cst_47 = arith.constant 0.000000e+00 : f32
    %225 = vector.broadcast %cst_47 : f32 to vector<1x16xf32>
    %226 = vector.extract_strided_slice %224 {offsets = [0, 0], sizes = [15, 16], strides = [1, 1]} : vector<16x16xf32> to vector<15x16xf32>
    %227 = tpu.concatenate %225, %226 in 0 : vector<1x16xf32>, vector<15x16xf32> -> vector<16x16xf32>
    %cst_48 = arith.constant 0.000000e+00 : f32
    %228 = vector.broadcast %cst_48 : f32 to vector<16x1xf32>
    %229 = vector.extract_strided_slice %227 {offsets = [0, 0], sizes = [16, 15], strides = [1, 1]} : vector<16x16xf32> to vector<16x15xf32>
    %230 = tpu.concatenate %228, %229 in 1 : vector<16x1xf32>, vector<16x15xf32> -> vector<16x16xf32>
    %cst_49 = arith.constant 0.176405236 : f32
    %231 = vector.broadcast %cst_49 : f32 to vector<16x16xf32>
    %232 = arith.mulf %231, %230 : vector<16x16xf32>
    %233 = arith.addf %219, %232 : vector<16x16xf32>
    %cst_50 = arith.constant 0.0400157198 : f32
    %234 = vector.broadcast %cst_50 : f32 to vector<16x16xf32>
    %235 = arith.mulf %234, %230 : vector<16x16xf32>
    %236 = arith.addf %220, %235 : vector<16x16xf32>
    %cst_51 = arith.constant 0.0978737995 : f32
    %237 = vector.broadcast %cst_51 : f32 to vector<16x16xf32>
    %238 = arith.mulf %237, %230 : vector<16x16xf32>
    %239 = arith.addf %221, %238 : vector<16x16xf32>
    %cst_52 = arith.constant 0.224089324 : f32
    %240 = vector.broadcast %cst_52 : f32 to vector<16x16xf32>
    %241 = arith.mulf %240, %230 : vector<16x16xf32>
    %242 = arith.addf %222, %241 : vector<16x16xf32>
    %cst_53 = arith.constant 0.0761037692 : f32
    %243 = vector.broadcast %cst_53 : f32 to vector<16x16xf32>
    %244 = arith.mulf %243, %227 : vector<16x16xf32>
    %245 = arith.addf %233, %244 : vector<16x16xf32>
    %cst_54 = arith.constant 0.0121675013 : f32
    %246 = vector.broadcast %cst_54 : f32 to vector<16x16xf32>
    %247 = arith.mulf %246, %227 : vector<16x16xf32>
    %248 = arith.addf %236, %247 : vector<16x16xf32>
    %cst_55 = arith.constant 0.0443863235 : f32
    %249 = vector.broadcast %cst_55 : f32 to vector<16x16xf32>
    %250 = arith.mulf %249, %227 : vector<16x16xf32>
    %251 = arith.addf %239, %250 : vector<16x16xf32>
    %cst_56 = arith.constant 0.0333674327 : f32
    %252 = vector.broadcast %cst_56 : f32 to vector<16x16xf32>
    %253 = arith.mulf %252, %227 : vector<16x16xf32>
    %254 = arith.addf %242, %253 : vector<16x16xf32>
    %cst_57 = arith.constant 0.000000e+00 : f32
    %255 = vector.broadcast %cst_57 : f32 to vector<16x1xf32>
    %256 = vector.extract_strided_slice %227 {offsets = [0, 1], sizes = [16, 15], strides = [1, 1]} : vector<16x16xf32> to vector<16x15xf32>
    %257 = tpu.concatenate %256, %255 in 1 : vector<16x15xf32>, vector<16x1xf32> -> vector<16x16xf32>
    %cst_58 = arith.constant 0.226975456 : f32
    %258 = vector.broadcast %cst_58 : f32 to vector<16x16xf32>
    %259 = arith.mulf %258, %257 : vector<16x16xf32>
    %260 = arith.addf %245, %259 : vector<16x16xf32>
    %cst_59 = arith.constant -0.14543657 : f32
    %261 = vector.broadcast %cst_59 : f32 to vector<16x16xf32>
    %262 = arith.mulf %261, %257 : vector<16x16xf32>
    %263 = arith.addf %248, %262 : vector<16x16xf32>
    %cst_60 = arith.constant 0.00457585184 : f32
    %264 = vector.broadcast %cst_60 : f32 to vector<16x16xf32>
    %265 = arith.mulf %264, %257 : vector<16x16xf32>
    %266 = arith.addf %251, %265 : vector<16x16xf32>
    %cst_61 = arith.constant -0.0187183842 : f32
    %267 = vector.broadcast %cst_61 : f32 to vector<16x16xf32>
    %268 = arith.mulf %267, %257 : vector<16x16xf32>
    %269 = arith.addf %254, %268 : vector<16x16xf32>
    %cst_62 = arith.constant 0.000000e+00 : f32
    %270 = vector.broadcast %cst_62 : f32 to vector<16x1xf32>
    %271 = vector.extract_strided_slice %224 {offsets = [0, 0], sizes = [16, 15], strides = [1, 1]} : vector<16x16xf32> to vector<16x15xf32>
    %272 = tpu.concatenate %270, %271 in 1 : vector<16x1xf32>, vector<16x15xf32> -> vector<16x16xf32>
    %cst_63 = arith.constant 0.123029068 : f32
    %273 = vector.broadcast %cst_63 : f32 to vector<16x16xf32>
    %274 = arith.mulf %273, %272 : vector<16x16xf32>
    %275 = arith.addf %260, %274 : vector<16x16xf32>
    %cst_64 = arith.constant 0.120237984 : f32
    %276 = vector.broadcast %cst_64 : f32 to vector<16x16xf32>
    %277 = arith.mulf %276, %272 : vector<16x16xf32>
    %278 = arith.addf %263, %277 : vector<16x16xf32>
    %cst_65 = arith.constant -0.0387326814 : f32
    %279 = vector.broadcast %cst_65 : f32 to vector<16x16xf32>
    %280 = arith.mulf %279, %272 : vector<16x16xf32>
    %281 = arith.addf %266, %280 : vector<16x16xf32>
    %cst_66 = arith.constant -0.0302302744 : f32
    %282 = vector.broadcast %cst_66 : f32 to vector<16x16xf32>
    %283 = arith.mulf %282, %272 : vector<16x16xf32>
    %284 = arith.addf %269, %283 : vector<16x16xf32>
    %cst_67 = arith.constant -0.161389783 : f32
    %285 = vector.broadcast %cst_67 : f32 to vector<16x16xf32>
    %286 = arith.mulf %285, %224 : vector<16x16xf32>
    %287 = arith.addf %275, %286 : vector<16x16xf32>
    %cst_68 = arith.constant -0.0212740283 : f32
    %288 = vector.broadcast %cst_68 : f32 to vector<16x16xf32>
    %289 = arith.mulf %288, %224 : vector<16x16xf32>
    %290 = arith.addf %278, %289 : vector<16x16xf32>
    %cst_69 = arith.constant -0.089546658 : f32
    %291 = vector.broadcast %cst_69 : f32 to vector<16x16xf32>
    %292 = arith.mulf %291, %224 : vector<16x16xf32>
    %293 = arith.addf %281, %292 : vector<16x16xf32>
    %cst_70 = arith.constant 0.0386902504 : f32
    %294 = vector.broadcast %cst_70 : f32 to vector<16x16xf32>
    %295 = arith.mulf %294, %224 : vector<16x16xf32>
    %296 = arith.addf %284, %295 : vector<16x16xf32>
    %cst_71 = arith.constant 0.000000e+00 : f32
    %297 = vector.broadcast %cst_71 : f32 to vector<16x1xf32>
    %298 = vector.extract_strided_slice %224 {offsets = [0, 1], sizes = [16, 15], strides = [1, 1]} : vector<16x16xf32> to vector<16x15xf32>
    %299 = tpu.concatenate %298, %297 in 1 : vector<16x15xf32>, vector<16x1xf32> -> vector<16x16xf32>
    %cst_72 = arith.constant -0.0672460422 : f32
    %300 = vector.broadcast %cst_72 : f32 to vector<16x16xf32>
    %301 = arith.mulf %300, %299 : vector<16x16xf32>
    %302 = arith.addf %287, %301 : vector<16x16xf32>
    %cst_73 = arith.constant -0.0359553173 : f32
    %303 = vector.broadcast %cst_73 : f32 to vector<16x16xf32>
    %304 = arith.mulf %303, %299 : vector<16x16xf32>
    %305 = arith.addf %290, %304 : vector<16x16xf32>
    %cst_74 = arith.constant -0.0813146308 : f32
    %306 = vector.broadcast %cst_74 : f32 to vector<16x16xf32>
    %307 = arith.mulf %306, %299 : vector<16x16xf32>
    %308 = arith.addf %293, %307 : vector<16x16xf32>
    %cst_75 = arith.constant -0.172628254 : f32
    %309 = vector.broadcast %cst_75 : f32 to vector<16x16xf32>
    %310 = arith.mulf %309, %299 : vector<16x16xf32>
    %311 = arith.addf %296, %310 : vector<16x16xf32>
    %cst_76 = arith.constant 0.000000e+00 : f32
    %312 = vector.broadcast %cst_76 : f32 to vector<1x16xf32>
    %313 = vector.extract_strided_slice %224 {offsets = [1, 0], sizes = [15, 16], strides = [1, 1]} : vector<16x16xf32> to vector<15x16xf32>
    %314 = tpu.concatenate %313, %312 in 0 : vector<15x16xf32>, vector<1x16xf32> -> vector<16x16xf32>
    %cst_77 = arith.constant 0.000000e+00 : f32
    %315 = vector.broadcast %cst_77 : f32 to vector<16x1xf32>
    %316 = vector.extract_strided_slice %314 {offsets = [0, 0], sizes = [16, 15], strides = [1, 1]} : vector<16x16xf32> to vector<16x15xf32>
    %317 = tpu.concatenate %315, %316 in 1 : vector<16x1xf32>, vector<16x15xf32> -> vector<16x16xf32>
    %cst_78 = arith.constant 0.113940068 : f32
    %318 = vector.broadcast %cst_78 : f32 to vector<16x16xf32>
    %319 = arith.mulf %318, %317 : vector<16x16xf32>
    %320 = arith.addf %302, %319 : vector<16x16xf32>
    %cst_79 = arith.constant -0.123482585 : f32
    %321 = vector.broadcast %cst_79 : f32 to vector<16x16xf32>
    %322 = arith.mulf %321, %317 : vector<16x16xf32>
    %323 = arith.addf %305, %322 : vector<16x16xf32>
    %cst_80 = arith.constant 0.0402341634 : f32
    %324 = vector.broadcast %cst_80 : f32 to vector<16x16xf32>
    %325 = arith.mulf %324, %317 : vector<16x16xf32>
    %326 = arith.addf %308, %325 : vector<16x16xf32>
    %cst_81 = arith.constant -0.0684810057 : f32
    %327 = vector.broadcast %cst_81 : f32 to vector<16x16xf32>
    %328 = arith.mulf %327, %317 : vector<16x16xf32>
    %329 = arith.addf %311, %328 : vector<16x16xf32>
    %cst_82 = arith.constant 0.148825213 : f32
    %330 = vector.broadcast %cst_82 : f32 to vector<16x16xf32>
    %331 = arith.mulf %330, %314 : vector<16x16xf32>
    %332 = arith.addf %320, %331 : vector<16x16xf32>
    %cst_83 = arith.constant 0.189588919 : f32
    %333 = vector.broadcast %cst_83 : f32 to vector<16x16xf32>
    %334 = arith.mulf %333, %314 : vector<16x16xf32>
    %335 = arith.addf %323, %334 : vector<16x16xf32>
    %cst_84 = arith.constant 0.11787796 : f32
    %336 = vector.broadcast %cst_84 : f32 to vector<16x16xf32>
    %337 = arith.mulf %336, %314 : vector<16x16xf32>
    %338 = arith.addf %326, %337 : vector<16x16xf32>
    %cst_85 = arith.constant -0.0179924835 : f32
    %339 = vector.broadcast %cst_85 : f32 to vector<16x16xf32>
    %340 = arith.mulf %339, %314 : vector<16x16xf32>
    %341 = arith.addf %329, %340 : vector<16x16xf32>
    %cst_86 = arith.constant 0.000000e+00 : f32
    %342 = vector.broadcast %cst_86 : f32 to vector<16x1xf32>
    %343 = vector.extract_strided_slice %314 {offsets = [0, 1], sizes = [16, 15], strides = [1, 1]} : vector<16x16xf32> to vector<16x15xf32>
    %344 = tpu.concatenate %343, %342 in 1 : vector<16x15xf32>, vector<16x1xf32> -> vector<16x16xf32>
    %cst_87 = arith.constant 0.00105000206 : f32
    %345 = vector.broadcast %cst_87 : f32 to vector<16x16xf32>
    %346 = arith.mulf %345, %344 : vector<16x16xf32>
    %347 = arith.addf %332, %346 : vector<16x16xf32>
    %cst_88 = arith.constant 0.178587049 : f32
    %348 = vector.broadcast %cst_88 : f32 to vector<16x16xf32>
    %349 = arith.mulf %348, %344 : vector<16x16xf32>
    %350 = arith.addf %335, %349 : vector<16x16xf32>
    %cst_89 = arith.constant 0.0126912091 : f32
    %351 = vector.broadcast %cst_89 : f32 to vector<16x16xf32>
    %352 = arith.mulf %351, %344 : vector<16x16xf32>
    %353 = arith.addf %338, %352 : vector<16x16xf32>
    %cst_90 = arith.constant 0.0401989371 : f32
    %354 = vector.broadcast %cst_90 : f32 to vector<16x16xf32>
    %355 = arith.mulf %354, %344 : vector<16x16xf32>
    %356 = arith.addf %341, %355 : vector<16x16xf32>
    %357 = vector.extract_strided_slice %214 {offsets = [1, 0, 0], sizes = [1, 16, 16], strides = [1, 1, 1]} : vector<3x16x16xf32> to vector<1x16x16xf32>
    %358 = vector.shape_cast %357 : vector<1x16x16xf32> to vector<16x16xf32>
    %cst_91 = arith.constant 0.000000e+00 : f32
    %359 = vector.broadcast %cst_91 : f32 to vector<1x16xf32>
    %360 = vector.extract_strided_slice %358 {offsets = [0, 0], sizes = [15, 16], strides = [1, 1]} : vector<16x16xf32> to vector<15x16xf32>
    %361 = tpu.concatenate %359, %360 in 0 : vector<1x16xf32>, vector<15x16xf32> -> vector<16x16xf32>
    %cst_92 = arith.constant 0.000000e+00 : f32
    %362 = vector.broadcast %cst_92 : f32 to vector<16x1xf32>
    %363 = vector.extract_strided_slice %361 {offsets = [0, 0], sizes = [16, 15], strides = [1, 1]} : vector<16x16xf32> to vector<16x15xf32>
    %364 = tpu.concatenate %362, %363 in 1 : vector<16x1xf32>, vector<16x15xf32> -> vector<16x16xf32>
    %cst_93 = arith.constant 0.186755806 : f32
    %365 = vector.broadcast %cst_93 : f32 to vector<16x16xf32>
    %366 = arith.mulf %365, %364 : vector<16x16xf32>
    %367 = arith.addf %347, %366 : vector<16x16xf32>
    %cst_94 = arith.constant -0.0977277904 : f32
    %368 = vector.broadcast %cst_94 : f32 to vector<16x16xf32>
    %369 = arith.mulf %368, %364 : vector<16x16xf32>
    %370 = arith.addf %350, %369 : vector<16x16xf32>
    %cst_95 = arith.constant 0.0950088426 : f32
    %371 = vector.broadcast %cst_95 : f32 to vector<16x16xf32>
    %372 = arith.mulf %371, %364 : vector<16x16xf32>
    %373 = arith.addf %353, %372 : vector<16x16xf32>
    %cst_96 = arith.constant -0.0151357204 : f32
    %374 = vector.broadcast %cst_96 : f32 to vector<16x16xf32>
    %375 = arith.mulf %374, %364 : vector<16x16xf32>
    %376 = arith.addf %356, %375 : vector<16x16xf32>
    %cst_97 = arith.constant 0.149407908 : f32
    %377 = vector.broadcast %cst_97 : f32 to vector<16x16xf32>
    %378 = arith.mulf %377, %361 : vector<16x16xf32>
    %379 = arith.addf %367, %378 : vector<16x16xf32>
    %cst_98 = arith.constant -0.0205158256 : f32
    %380 = vector.broadcast %cst_98 : f32 to vector<16x16xf32>
    %381 = arith.mulf %380, %361 : vector<16x16xf32>
    %382 = arith.addf %370, %381 : vector<16x16xf32>
    %cst_99 = arith.constant 0.0313067697 : f32
    %383 = vector.broadcast %cst_99 : f32 to vector<16x16xf32>
    %384 = arith.mulf %383, %361 : vector<16x16xf32>
    %385 = arith.addf %373, %384 : vector<16x16xf32>
    %cst_100 = arith.constant -0.0854095742 : f32
    %386 = vector.broadcast %cst_100 : f32 to vector<16x16xf32>
    %387 = arith.mulf %386, %361 : vector<16x16xf32>
    %388 = arith.addf %376, %387 : vector<16x16xf32>
    %cst_101 = arith.constant 0.000000e+00 : f32
    %389 = vector.broadcast %cst_101 : f32 to vector<16x1xf32>
    %390 = vector.extract_strided_slice %361 {offsets = [0, 1], sizes = [16, 15], strides = [1, 1]} : vector<16x16xf32> to vector<16x15xf32>
    %391 = tpu.concatenate %390, %389 in 1 : vector<16x15xf32>, vector<16x1xf32> -> vector<16x16xf32>
    %cst_102 = arith.constant 0.153277919 : f32
    %392 = vector.broadcast %cst_102 : f32 to vector<16x16xf32>
    %393 = arith.mulf %392, %391 : vector<16x16xf32>
    %394 = arith.addf %379, %393 : vector<16x16xf32>
    %cst_103 = arith.constant 0.14693588 : f32
    %395 = vector.broadcast %cst_103 : f32 to vector<16x16xf32>
    %396 = arith.mulf %395, %391 : vector<16x16xf32>
    %397 = arith.addf %382, %396 : vector<16x16xf32>
    %cst_104 = arith.constant 0.0154947424 : f32
    %398 = vector.broadcast %cst_104 : f32 to vector<16x16xf32>
    %399 = arith.mulf %398, %391 : vector<16x16xf32>
    %400 = arith.addf %385, %399 : vector<16x16xf32>
    %cst_105 = arith.constant 0.0378162526 : f32
    %401 = vector.broadcast %cst_105 : f32 to vector<16x16xf32>
    %402 = arith.mulf %401, %391 : vector<16x16xf32>
    %403 = arith.addf %388, %402 : vector<16x16xf32>
    %cst_106 = arith.constant 0.000000e+00 : f32
    %404 = vector.broadcast %cst_106 : f32 to vector<16x1xf32>
    %405 = vector.extract_strided_slice %358 {offsets = [0, 0], sizes = [16, 15], strides = [1, 1]} : vector<16x16xf32> to vector<16x15xf32>
    %406 = tpu.concatenate %404, %405 in 1 : vector<16x1xf32>, vector<16x15xf32> -> vector<16x16xf32>
    %cst_107 = arith.constant -0.104855299 : f32
    %407 = vector.broadcast %cst_107 : f32 to vector<16x16xf32>
    %408 = arith.mulf %407, %406 : vector<16x16xf32>
    %409 = arith.addf %394, %408 : vector<16x16xf32>
    %cst_108 = arith.constant -0.142001793 : f32
    %410 = vector.broadcast %cst_108 : f32 to vector<16x16xf32>
    %411 = arith.mulf %410, %406 : vector<16x16xf32>
    %412 = arith.addf %397, %411 : vector<16x16xf32>
    %cst_109 = arith.constant -0.170627013 : f32
    %413 = vector.broadcast %cst_109 : f32 to vector<16x16xf32>
    %414 = arith.mulf %413, %406 : vector<16x16xf32>
    %415 = arith.addf %400, %414 : vector<16x16xf32>
    %cst_110 = arith.constant 0.195077538 : f32
    %416 = vector.broadcast %cst_110 : f32 to vector<16x16xf32>
    %417 = arith.mulf %416, %406 : vector<16x16xf32>
    %418 = arith.addf %403, %417 : vector<16x16xf32>
    %cst_111 = arith.constant -0.0510805137 : f32
    %419 = vector.broadcast %cst_111 : f32 to vector<16x16xf32>
    %420 = arith.mulf %419, %358 : vector<16x16xf32>
    %421 = arith.addf %409, %420 : vector<16x16xf32>
    %cst_112 = arith.constant -0.118063219 : f32
    %422 = vector.broadcast %cst_112 : f32 to vector<16x16xf32>
    %423 = arith.mulf %422, %358 : vector<16x16xf32>
    %424 = arith.addf %412, %423 : vector<16x16xf32>
    %cst_113 = arith.constant -0.00281822286 : f32
    %425 = vector.broadcast %cst_113 : f32 to vector<16x16xf32>
    %426 = arith.mulf %425, %358 : vector<16x16xf32>
    %427 = arith.addf %415, %426 : vector<16x16xf32>
    %cst_114 = arith.constant 0.0428331867 : f32
    %428 = vector.broadcast %cst_114 : f32 to vector<16x16xf32>
    %429 = arith.mulf %428, %358 : vector<16x16xf32>
    %430 = arith.addf %418, %429 : vector<16x16xf32>
    %cst_115 = arith.constant 0.000000e+00 : f32
    %431 = vector.broadcast %cst_115 : f32 to vector<16x1xf32>
    %432 = vector.extract_strided_slice %358 {offsets = [0, 1], sizes = [16, 15], strides = [1, 1]} : vector<16x16xf32> to vector<16x15xf32>
    %433 = tpu.concatenate %432, %431 in 1 : vector<16x15xf32>, vector<16x1xf32> -> vector<16x16xf32>
    %cst_116 = arith.constant 0.0177426133 : f32
    %434 = vector.broadcast %cst_116 : f32 to vector<16x16xf32>
    %435 = arith.mulf %434, %433 : vector<16x16xf32>
    %436 = arith.addf %421, %435 : vector<16x16xf32>
    %cst_117 = arith.constant -0.0401780941 : f32
    %437 = vector.broadcast %cst_117 : f32 to vector<16x16xf32>
    %438 = arith.mulf %437, %433 : vector<16x16xf32>
    %439 = arith.addf %424, %438 : vector<16x16xf32>
    %cst_118 = arith.constant -0.163019836 : f32
    %440 = vector.broadcast %cst_118 : f32 to vector<16x16xf32>
    %441 = arith.mulf %440, %433 : vector<16x16xf32>
    %442 = arith.addf %427, %441 : vector<16x16xf32>
    %cst_119 = arith.constant 0.0462782271 : f32
    %443 = vector.broadcast %cst_119 : f32 to vector<16x16xf32>
    %444 = arith.mulf %443, %433 : vector<16x16xf32>
    %445 = arith.addf %430, %444 : vector<16x16xf32>
    %cst_120 = arith.constant 0.000000e+00 : f32
    %446 = vector.broadcast %cst_120 : f32 to vector<1x16xf32>
    %447 = vector.extract_strided_slice %358 {offsets = [1, 0], sizes = [15, 16], strides = [1, 1]} : vector<16x16xf32> to vector<15x16xf32>
    %448 = tpu.concatenate %447, %446 in 0 : vector<15x16xf32>, vector<1x16xf32> -> vector<16x16xf32>
    %cst_121 = arith.constant 0.000000e+00 : f32
    %449 = vector.broadcast %cst_121 : f32 to vector<16x1xf32>
    %450 = vector.extract_strided_slice %448 {offsets = [0, 0], sizes = [16, 15], strides = [1, 1]} : vector<16x16xf32> to vector<16x15xf32>
    %451 = tpu.concatenate %449, %450 in 1 : vector<16x1xf32>, vector<16x15xf32> -> vector<16x16xf32>
    %cst_122 = arith.constant -0.0870797112 : f32
    %452 = vector.broadcast %cst_122 : f32 to vector<16x16xf32>
    %453 = arith.mulf %452, %451 : vector<16x16xf32>
    %454 = arith.addf %436, %453 : vector<16x16xf32>
    %cst_123 = arith.constant -0.0578849651 : f32
    %455 = vector.broadcast %cst_123 : f32 to vector<16x16xf32>
    %456 = arith.mulf %455, %451 : vector<16x16xf32>
    %457 = arith.addf %439, %456 : vector<16x16xf32>
    %cst_124 = arith.constant -0.0311552528 : f32
    %458 = vector.broadcast %cst_124 : f32 to vector<16x16xf32>
    %459 = arith.mulf %458, %451 : vector<16x16xf32>
    %460 = arith.addf %442, %459 : vector<16x16xf32>
    %cst_125 = arith.constant 0.00561653404 : f32
    %461 = vector.broadcast %cst_125 : f32 to vector<16x16xf32>
    %462 = arith.mulf %461, %451 : vector<16x16xf32>
    %463 = arith.addf %445, %462 : vector<16x16xf32>
    %cst_126 = arith.constant -0.107075259 : f32
    %464 = vector.broadcast %cst_126 : f32 to vector<16x16xf32>
    %465 = arith.mulf %464, %448 : vector<16x16xf32>
    %466 = arith.addf %454, %465 : vector<16x16xf32>
    %cst_127 = arith.constant 0.105445176 : f32
    %467 = vector.broadcast %cst_127 : f32 to vector<16x16xf32>
    %468 = arith.mulf %467, %448 : vector<16x16xf32>
    %469 = arith.addf %457, %468 : vector<16x16xf32>
    %cst_128 = arith.constant -0.0403176956 : f32
    %470 = vector.broadcast %cst_128 : f32 to vector<16x16xf32>
    %471 = arith.mulf %470, %448 : vector<16x16xf32>
    %472 = arith.addf %460, %471 : vector<16x16xf32>
    %cst_129 = arith.constant 0.122244507 : f32
    %473 = vector.broadcast %cst_129 : f32 to vector<16x16xf32>
    %474 = arith.mulf %473, %448 : vector<16x16xf32>
    %475 = arith.addf %463, %474 : vector<16x16xf32>
    %cst_130 = arith.constant 0.000000e+00 : f32
    %476 = vector.broadcast %cst_130 : f32 to vector<16x1xf32>
    %477 = vector.extract_strided_slice %448 {offsets = [0, 1], sizes = [16, 15], strides = [1, 1]} : vector<16x16xf32> to vector<16x15xf32>
    %478 = tpu.concatenate %477, %476 in 1 : vector<16x15xf32>, vector<16x1xf32> -> vector<16x16xf32>
    %cst_131 = arith.constant 0.188315064 : f32
    %479 = vector.broadcast %cst_131 : f32 to vector<16x16xf32>
    %480 = arith.mulf %479, %478 : vector<16x16xf32>
    %481 = arith.addf %466, %480 : vector<16x16xf32>
    %cst_132 = arith.constant -0.134775907 : f32
    %482 = vector.broadcast %cst_132 : f32 to vector<16x16xf32>
    %483 = arith.mulf %482, %478 : vector<16x16xf32>
    %484 = arith.addf %469, %483 : vector<16x16xf32>
    %cst_133 = arith.constant -0.127048492 : f32
    %485 = vector.broadcast %cst_133 : f32 to vector<16x16xf32>
    %486 = arith.mulf %485, %478 : vector<16x16xf32>
    %487 = arith.addf %472, %486 : vector<16x16xf32>
    %cst_134 = arith.constant 0.096939668 : f32
    %488 = vector.broadcast %cst_134 : f32 to vector<16x16xf32>
    %489 = arith.mulf %488, %478 : vector<16x16xf32>
    %490 = arith.addf %475, %489 : vector<16x16xf32>
    %491 = vector.extract_strided_slice %214 {offsets = [2, 0, 0], sizes = [1, 16, 16], strides = [1, 1, 1]} : vector<3x16x16xf32> to vector<1x16x16xf32>
    %492 = vector.shape_cast %491 : vector<1x16x16xf32> to vector<16x16xf32>
    %cst_135 = arith.constant 0.000000e+00 : f32
    %493 = vector.broadcast %cst_135 : f32 to vector<1x16xf32>
    %494 = vector.extract_strided_slice %492 {offsets = [0, 0], sizes = [15, 16], strides = [1, 1]} : vector<16x16xf32> to vector<15x16xf32>
    %495 = tpu.concatenate %493, %494 in 0 : vector<1x16xf32>, vector<15x16xf32> -> vector<16x16xf32>
    %cst_136 = arith.constant 0.000000e+00 : f32
    %496 = vector.broadcast %cst_136 : f32 to vector<16x1xf32>
    %497 = vector.extract_strided_slice %495 {offsets = [0, 0], sizes = [16, 15], strides = [1, 1]} : vector<16x16xf32> to vector<16x15xf32>
    %498 = tpu.concatenate %496, %497 in 1 : vector<16x1xf32>, vector<16x15xf32> -> vector<16x16xf32>
    %cst_137 = arith.constant -0.0103218853 : f32
    %499 = vector.broadcast %cst_137 : f32 to vector<16x16xf32>
    %500 = arith.mulf %499, %498 : vector<16x16xf32>
    %501 = arith.addf %481, %500 : vector<16x16xf32>
    %cst_138 = arith.constant 0.0410598516 : f32
    %502 = vector.broadcast %cst_138 : f32 to vector<16x16xf32>
    %503 = arith.mulf %502, %498 : vector<16x16xf32>
    %504 = arith.addf %484, %503 : vector<16x16xf32>
    %cst_139 = arith.constant 0.0144043574 : f32
    %505 = vector.broadcast %cst_139 : f32 to vector<16x16xf32>
    %506 = arith.mulf %505, %498 : vector<16x16xf32>
    %507 = arith.addf %487, %506 : vector<16x16xf32>
    %cst_140 = arith.constant 0.145427346 : f32
    %508 = vector.broadcast %cst_140 : f32 to vector<16x16xf32>
    %509 = arith.mulf %508, %498 : vector<16x16xf32>
    %510 = arith.addf %490, %509 : vector<16x16xf32>
    %cst_141 = arith.constant -0.255298972 : f32
    %511 = vector.broadcast %cst_141 : f32 to vector<16x16xf32>
    %512 = arith.mulf %511, %495 : vector<16x16xf32>
    %513 = arith.addf %501, %512 : vector<16x16xf32>
    %cst_142 = arith.constant 0.0653618574 : f32
    %514 = vector.broadcast %cst_142 : f32 to vector<16x16xf32>
    %515 = arith.mulf %514, %495 : vector<16x16xf32>
    %516 = arith.addf %504, %515 : vector<16x16xf32>
    %cst_143 = arith.constant 0.0864436179 : f32
    %517 = vector.broadcast %cst_143 : f32 to vector<16x16xf32>
    %518 = arith.mulf %517, %495 : vector<16x16xf32>
    %519 = arith.addf %507, %518 : vector<16x16xf32>
    %cst_144 = arith.constant -7.421650e-02 : f32
    %520 = vector.broadcast %cst_144 : f32 to vector<16x16xf32>
    %521 = arith.mulf %520, %495 : vector<16x16xf32>
    %522 = arith.addf %510, %521 : vector<16x16xf32>
    %cst_145 = arith.constant 0.000000e+00 : f32
    %523 = vector.broadcast %cst_145 : f32 to vector<16x1xf32>
    %524 = vector.extract_strided_slice %495 {offsets = [0, 1], sizes = [16, 15], strides = [1, 1]} : vector<16x16xf32> to vector<16x15xf32>
    %525 = tpu.concatenate %524, %523 in 1 : vector<16x15xf32>, vector<16x1xf32> -> vector<16x16xf32>
    %cst_146 = arith.constant -0.0887785777 : f32
    %526 = vector.broadcast %cst_146 : f32 to vector<16x16xf32>
    %527 = arith.mulf %526, %525 : vector<16x16xf32>
    %528 = arith.addf %513, %527 : vector<16x16xf32>
    %cst_147 = arith.constant -0.198079646 : f32
    %529 = vector.broadcast %cst_147 : f32 to vector<16x16xf32>
    %530 = arith.mulf %529, %525 : vector<16x16xf32>
    %531 = arith.addf %516, %530 : vector<16x16xf32>
    %cst_148 = arith.constant -0.0347912163 : f32
    %532 = vector.broadcast %cst_148 : f32 to vector<16x16xf32>
    %533 = arith.mulf %532, %525 : vector<16x16xf32>
    %534 = arith.addf %519, %533 : vector<16x16xf32>
    %cst_149 = arith.constant 0.0156348962 : f32
    %535 = vector.broadcast %cst_149 : f32 to vector<16x16xf32>
    %536 = arith.mulf %535, %525 : vector<16x16xf32>
    %537 = arith.addf %522, %536 : vector<16x16xf32>
    %cst_150 = arith.constant 0.000000e+00 : f32
    %538 = vector.broadcast %cst_150 : f32 to vector<16x1xf32>
    %539 = vector.extract_strided_slice %492 {offsets = [0, 0], sizes = [16, 15], strides = [1, 1]} : vector<16x16xf32> to vector<16x15xf32>
    %540 = tpu.concatenate %538, %539 in 1 : vector<16x1xf32>, vector<16x15xf32> -> vector<16x16xf32>
    %cst_151 = arith.constant -0.0509652197 : f32
    %541 = vector.broadcast %cst_151 : f32 to vector<16x16xf32>
    %542 = arith.mulf %541, %540 : vector<16x16xf32>
    %543 = arith.addf %528, %542 : vector<16x16xf32>
    %cst_152 = arith.constant -0.0438074283 : f32
    %544 = vector.broadcast %cst_152 : f32 to vector<16x16xf32>
    %545 = arith.mulf %544, %540 : vector<16x16xf32>
    %546 = arith.addf %531, %545 : vector<16x16xf32>
    %cst_153 = arith.constant -0.125279531 : f32
    %547 = vector.broadcast %cst_153 : f32 to vector<16x16xf32>
    %548 = arith.mulf %547, %540 : vector<16x16xf32>
    %549 = arith.addf %534, %548 : vector<16x16xf32>
    %cst_154 = arith.constant 0.0777490362 : f32
    %550 = vector.broadcast %cst_154 : f32 to vector<16x16xf32>
    %551 = arith.mulf %550, %540 : vector<16x16xf32>
    %552 = arith.addf %537, %551 : vector<16x16xf32>
    %cst_155 = arith.constant 0.00665172236 : f32
    %553 = vector.broadcast %cst_155 : f32 to vector<16x16xf32>
    %554 = arith.mulf %553, %492 : vector<16x16xf32>
    %555 = arith.addf %543, %554 : vector<16x16xf32>
    %cst_156 = arith.constant 0.0302471891 : f32
    %556 = vector.broadcast %cst_156 : f32 to vector<16x16xf32>
    %557 = arith.mulf %556, %492 : vector<16x16xf32>
    %558 = arith.addf %546, %557 : vector<16x16xf32>
    %cst_157 = arith.constant -0.0634322092 : f32
    %559 = vector.broadcast %cst_157 : f32 to vector<16x16xf32>
    %560 = arith.mulf %559, %492 : vector<16x16xf32>
    %561 = arith.addf %549, %560 : vector<16x16xf32>
    %cst_158 = arith.constant -0.0362741165 : f32
    %562 = vector.broadcast %cst_158 : f32 to vector<16x16xf32>
    %563 = arith.mulf %562, %492 : vector<16x16xf32>
    %564 = arith.addf %552, %563 : vector<16x16xf32>
    %cst_159 = arith.constant 0.000000e+00 : f32
    %565 = vector.broadcast %cst_159 : f32 to vector<16x1xf32>
    %566 = vector.extract_strided_slice %492 {offsets = [0, 1], sizes = [16, 15], strides = [1, 1]} : vector<16x16xf32> to vector<16x15xf32>
    %567 = tpu.concatenate %566, %565 in 1 : vector<16x15xf32>, vector<16x1xf32> -> vector<16x16xf32>
    %cst_160 = arith.constant -0.09072984 : f32
    %568 = vector.broadcast %cst_160 : f32 to vector<16x16xf32>
    %569 = arith.mulf %568, %567 : vector<16x16xf32>
    %570 = arith.addf %555, %569 : vector<16x16xf32>
    %cst_161 = arith.constant 0.00519453967 : f32
    %571 = vector.broadcast %cst_161 : f32 to vector<16x16xf32>
    %572 = arith.mulf %571, %567 : vector<16x16xf32>
    %573 = arith.addf %558, %572 : vector<16x16xf32>
    %cst_162 = arith.constant 0.0729090571 : f32
    %574 = vector.broadcast %cst_162 : f32 to vector<16x16xf32>
    %575 = arith.mulf %574, %567 : vector<16x16xf32>
    %576 = arith.addf %561, %575 : vector<16x16xf32>
    %cst_163 = arith.constant 0.0128982915 : f32
    %577 = vector.broadcast %cst_163 : f32 to vector<16x16xf32>
    %578 = arith.mulf %577, %567 : vector<16x16xf32>
    %579 = arith.addf %564, %578 : vector<16x16xf32>
    %cst_164 = arith.constant 0.000000e+00 : f32
    %580 = vector.broadcast %cst_164 : f32 to vector<1x16xf32>
    %581 = vector.extract_strided_slice %492 {offsets = [1, 0], sizes = [15, 16], strides = [1, 1]} : vector<16x16xf32> to vector<15x16xf32>
    %582 = tpu.concatenate %581, %580 in 0 : vector<15x16xf32>, vector<1x16xf32> -> vector<16x16xf32>
    %cst_165 = arith.constant 0.000000e+00 : f32
    %583 = vector.broadcast %cst_165 : f32 to vector<16x1xf32>
    %584 = vector.extract_strided_slice %582 {offsets = [0, 0], sizes = [16, 15], strides = [1, 1]} : vector<16x16xf32> to vector<16x15xf32>
    %585 = tpu.concatenate %583, %584 in 1 : vector<16x1xf32>, vector<16x15xf32> -> vector<16x16xf32>
    %cst_166 = arith.constant -0.116514981 : f32
    %586 = vector.broadcast %cst_166 : f32 to vector<16x16xf32>
    %587 = arith.mulf %586, %585 : vector<16x16xf32>
    %588 = arith.addf %570, %587 : vector<16x16xf32>
    %cst_167 = arith.constant 0.0900826454 : f32
    %589 = vector.broadcast %cst_167 : f32 to vector<16x16xf32>
    %590 = arith.mulf %589, %585 : vector<16x16xf32>
    %591 = arith.addf %573, %590 : vector<16x16xf32>
    %cst_168 = arith.constant 0.0465662442 : f32
    %592 = vector.broadcast %cst_168 : f32 to vector<16x16xf32>
    %593 = arith.mulf %592, %585 : vector<16x16xf32>
    %594 = arith.addf %576, %593 : vector<16x16xf32>
    %cst_169 = arith.constant -0.153624371 : f32
    %595 = vector.broadcast %cst_169 : f32 to vector<16x16xf32>
    %596 = arith.mulf %595, %585 : vector<16x16xf32>
    %597 = arith.addf %579, %596 : vector<16x16xf32>
    %cst_170 = arith.constant 0.0208274983 : f32
    %598 = vector.broadcast %cst_170 : f32 to vector<16x16xf32>
    %599 = arith.mulf %598, %582 : vector<16x16xf32>
    %600 = arith.addf %588, %599 : vector<16x16xf32>
    %cst_171 = arith.constant 9.766390e-02 : f32
    %601 = vector.broadcast %cst_171 : f32 to vector<16x16xf32>
    %602 = arith.mulf %601, %582 : vector<16x16xf32>
    %603 = arith.addf %591, %602 : vector<16x16xf32>
    %cst_172 = arith.constant 0.0356366411 : f32
    %604 = vector.broadcast %cst_172 : f32 to vector<16x16xf32>
    %605 = arith.mulf %604, %582 : vector<16x16xf32>
    %606 = arith.addf %594, %605 : vector<16x16xf32>
    %cst_173 = arith.constant 0.0706573203 : f32
    %607 = vector.broadcast %cst_173 : f32 to vector<16x16xf32>
    %608 = arith.mulf %607, %582 : vector<16x16xf32>
    %609 = arith.addf %597, %608 : vector<16x16xf32>
    %cst_174 = arith.constant 0.000000e+00 : f32
    %610 = vector.broadcast %cst_174 : f32 to vector<16x1xf32>
    %611 = vector.extract_strided_slice %582 {offsets = [0, 1], sizes = [16, 15], strides = [1, 1]} : vector<16x16xf32> to vector<16x15xf32>
    %612 = tpu.concatenate %611, %610 in 1 : vector<16x15xf32>, vector<16x1xf32> -> vector<16x16xf32>
    %cst_175 = arith.constant -0.117312342 : f32
    %613 = vector.broadcast %cst_175 : f32 to vector<16x16xf32>
    %614 = arith.mulf %613, %612 : vector<16x16xf32>
    %615 = arith.addf %600, %614 : vector<16x16xf32>
    %cst_176 = arith.constant 0.194362119 : f32
    %616 = vector.broadcast %cst_176 : f32 to vector<16x16xf32>
    %617 = arith.mulf %616, %612 : vector<16x16xf32>
    %618 = arith.addf %603, %617 : vector<16x16xf32>
    %cst_177 = arith.constant -4.136190e-02 : f32
    %619 = vector.broadcast %cst_177 : f32 to vector<16x16xf32>
    %620 = arith.mulf %619, %612 : vector<16x16xf32>
    %621 = arith.addf %606, %620 : vector<16x16xf32>
    %cst_178 = arith.constant -0.0747454837 : f32
    %622 = vector.broadcast %cst_178 : f32 to vector<16x16xf32>
    %623 = arith.mulf %622, %612 : vector<16x16xf32>
    %624 = arith.addf %609, %623 : vector<16x16xf32>
    %cst_179 = arith.constant 0.000000e+00 : f32
    %625 = vector.broadcast %cst_179 : f32 to vector<16x16xf32>
    %626 = arith.maximumf %615, %625 : vector<16x16xf32>
    %cst_180 = arith.constant 0.000000e+00 : f32
    %627 = vector.broadcast %cst_180 : f32 to vector<16x16xf32>
    %628 = arith.maximumf %618, %627 : vector<16x16xf32>
    %cst_181 = arith.constant 0.000000e+00 : f32
    %629 = vector.broadcast %cst_181 : f32 to vector<16x16xf32>
    %630 = arith.maximumf %621, %629 : vector<16x16xf32>
    %cst_182 = arith.constant 0.000000e+00 : f32
    %631 = vector.broadcast %cst_182 : f32 to vector<16x16xf32>
    %632 = arith.maximumf %624, %631 : vector<16x16xf32>
    %cst_183 = arith.constant 0.000000e+00 : f32
    %633 = vector.broadcast %cst_183 : f32 to vector<16x16xf32>
    %cst_184 = arith.constant 0.000000e+00 : f32
    %634 = vector.broadcast %cst_184 : f32 to vector<16x16xf32>
    %cst_185 = arith.constant 0.000000e+00 : f32
    %635 = vector.broadcast %cst_185 : f32 to vector<16x16xf32>
    %cst_186 = arith.constant 0.000000e+00 : f32
    %636 = vector.broadcast %cst_186 : f32 to vector<16x16xf32>
    %637 = vector.extract_strided_slice %218 {offsets = [0, 0, 0], sizes = [1, 16, 16], strides = [1, 1, 1]} : vector<3x16x16xf32> to vector<1x16x16xf32>
    %638 = vector.shape_cast %637 : vector<1x16x16xf32> to vector<16x16xf32>
    %cst_187 = arith.constant 0.000000e+00 : f32
    %639 = vector.broadcast %cst_187 : f32 to vector<1x16xf32>
    %640 = vector.extract_strided_slice %638 {offsets = [0, 0], sizes = [15, 16], strides = [1, 1]} : vector<16x16xf32> to vector<15x16xf32>
    %641 = tpu.concatenate %639, %640 in 0 : vector<1x16xf32>, vector<15x16xf32> -> vector<16x16xf32>
    %cst_188 = arith.constant 0.000000e+00 : f32
    %642 = vector.broadcast %cst_188 : f32 to vector<16x1xf32>
    %643 = vector.extract_strided_slice %641 {offsets = [0, 0], sizes = [16, 15], strides = [1, 1]} : vector<16x16xf32> to vector<16x15xf32>
    %644 = tpu.concatenate %642, %643 in 1 : vector<16x1xf32>, vector<16x15xf32> -> vector<16x16xf32>
    %cst_189 = arith.constant 0.176405236 : f32
    %645 = vector.broadcast %cst_189 : f32 to vector<16x16xf32>
    %646 = arith.mulf %645, %644 : vector<16x16xf32>
    %647 = arith.addf %633, %646 : vector<16x16xf32>
    %cst_190 = arith.constant 0.0400157198 : f32
    %648 = vector.broadcast %cst_190 : f32 to vector<16x16xf32>
    %649 = arith.mulf %648, %644 : vector<16x16xf32>
    %650 = arith.addf %634, %649 : vector<16x16xf32>
    %cst_191 = arith.constant 0.0978737995 : f32
    %651 = vector.broadcast %cst_191 : f32 to vector<16x16xf32>
    %652 = arith.mulf %651, %644 : vector<16x16xf32>
    %653 = arith.addf %635, %652 : vector<16x16xf32>
    %cst_192 = arith.constant 0.224089324 : f32
    %654 = vector.broadcast %cst_192 : f32 to vector<16x16xf32>
    %655 = arith.mulf %654, %644 : vector<16x16xf32>
    %656 = arith.addf %636, %655 : vector<16x16xf32>
    %cst_193 = arith.constant 0.0761037692 : f32
    %657 = vector.broadcast %cst_193 : f32 to vector<16x16xf32>
    %658 = arith.mulf %657, %641 : vector<16x16xf32>
    %659 = arith.addf %647, %658 : vector<16x16xf32>
    %cst_194 = arith.constant 0.0121675013 : f32
    %660 = vector.broadcast %cst_194 : f32 to vector<16x16xf32>
    %661 = arith.mulf %660, %641 : vector<16x16xf32>
    %662 = arith.addf %650, %661 : vector<16x16xf32>
    %cst_195 = arith.constant 0.0443863235 : f32
    %663 = vector.broadcast %cst_195 : f32 to vector<16x16xf32>
    %664 = arith.mulf %663, %641 : vector<16x16xf32>
    %665 = arith.addf %653, %664 : vector<16x16xf32>
    %cst_196 = arith.constant 0.0333674327 : f32
    %666 = vector.broadcast %cst_196 : f32 to vector<16x16xf32>
    %667 = arith.mulf %666, %641 : vector<16x16xf32>
    %668 = arith.addf %656, %667 : vector<16x16xf32>
    %cst_197 = arith.constant 0.000000e+00 : f32
    %669 = vector.broadcast %cst_197 : f32 to vector<16x1xf32>
    %670 = vector.extract_strided_slice %641 {offsets = [0, 1], sizes = [16, 15], strides = [1, 1]} : vector<16x16xf32> to vector<16x15xf32>
    %671 = tpu.concatenate %670, %669 in 1 : vector<16x15xf32>, vector<16x1xf32> -> vector<16x16xf32>
    %cst_198 = arith.constant 0.226975456 : f32
    %672 = vector.broadcast %cst_198 : f32 to vector<16x16xf32>
    %673 = arith.mulf %672, %671 : vector<16x16xf32>
    %674 = arith.addf %659, %673 : vector<16x16xf32>
    %cst_199 = arith.constant -0.14543657 : f32
    %675 = vector.broadcast %cst_199 : f32 to vector<16x16xf32>
    %676 = arith.mulf %675, %671 : vector<16x16xf32>
    %677 = arith.addf %662, %676 : vector<16x16xf32>
    %cst_200 = arith.constant 0.00457585184 : f32
    %678 = vector.broadcast %cst_200 : f32 to vector<16x16xf32>
    %679 = arith.mulf %678, %671 : vector<16x16xf32>
    %680 = arith.addf %665, %679 : vector<16x16xf32>
    %cst_201 = arith.constant -0.0187183842 : f32
    %681 = vector.broadcast %cst_201 : f32 to vector<16x16xf32>
    %682 = arith.mulf %681, %671 : vector<16x16xf32>
    %683 = arith.addf %668, %682 : vector<16x16xf32>
    %cst_202 = arith.constant 0.000000e+00 : f32
    %684 = vector.broadcast %cst_202 : f32 to vector<16x1xf32>
    %685 = vector.extract_strided_slice %638 {offsets = [0, 0], sizes = [16, 15], strides = [1, 1]} : vector<16x16xf32> to vector<16x15xf32>
    %686 = tpu.concatenate %684, %685 in 1 : vector<16x1xf32>, vector<16x15xf32> -> vector<16x16xf32>
    %cst_203 = arith.constant 0.123029068 : f32
    %687 = vector.broadcast %cst_203 : f32 to vector<16x16xf32>
    %688 = arith.mulf %687, %686 : vector<16x16xf32>
    %689 = arith.addf %674, %688 : vector<16x16xf32>
    %cst_204 = arith.constant 0.120237984 : f32
    %690 = vector.broadcast %cst_204 : f32 to vector<16x16xf32>
    %691 = arith.mulf %690, %686 : vector<16x16xf32>
    %692 = arith.addf %677, %691 : vector<16x16xf32>
    %cst_205 = arith.constant -0.0387326814 : f32
    %693 = vector.broadcast %cst_205 : f32 to vector<16x16xf32>
    %694 = arith.mulf %693, %686 : vector<16x16xf32>
    %695 = arith.addf %680, %694 : vector<16x16xf32>
    %cst_206 = arith.constant -0.0302302744 : f32
    %696 = vector.broadcast %cst_206 : f32 to vector<16x16xf32>
    %697 = arith.mulf %696, %686 : vector<16x16xf32>
    %698 = arith.addf %683, %697 : vector<16x16xf32>
    %cst_207 = arith.constant -0.161389783 : f32
    %699 = vector.broadcast %cst_207 : f32 to vector<16x16xf32>
    %700 = arith.mulf %699, %638 : vector<16x16xf32>
    %701 = arith.addf %689, %700 : vector<16x16xf32>
    %cst_208 = arith.constant -0.0212740283 : f32
    %702 = vector.broadcast %cst_208 : f32 to vector<16x16xf32>
    %703 = arith.mulf %702, %638 : vector<16x16xf32>
    %704 = arith.addf %692, %703 : vector<16x16xf32>
    %cst_209 = arith.constant -0.089546658 : f32
    %705 = vector.broadcast %cst_209 : f32 to vector<16x16xf32>
    %706 = arith.mulf %705, %638 : vector<16x16xf32>
    %707 = arith.addf %695, %706 : vector<16x16xf32>
    %cst_210 = arith.constant 0.0386902504 : f32
    %708 = vector.broadcast %cst_210 : f32 to vector<16x16xf32>
    %709 = arith.mulf %708, %638 : vector<16x16xf32>
    %710 = arith.addf %698, %709 : vector<16x16xf32>
    %cst_211 = arith.constant 0.000000e+00 : f32
    %711 = vector.broadcast %cst_211 : f32 to vector<16x1xf32>
    %712 = vector.extract_strided_slice %638 {offsets = [0, 1], sizes = [16, 15], strides = [1, 1]} : vector<16x16xf32> to vector<16x15xf32>
    %713 = tpu.concatenate %712, %711 in 1 : vector<16x15xf32>, vector<16x1xf32> -> vector<16x16xf32>
    %cst_212 = arith.constant -0.0672460422 : f32
    %714 = vector.broadcast %cst_212 : f32 to vector<16x16xf32>
    %715 = arith.mulf %714, %713 : vector<16x16xf32>
    %716 = arith.addf %701, %715 : vector<16x16xf32>
    %cst_213 = arith.constant -0.0359553173 : f32
    %717 = vector.broadcast %cst_213 : f32 to vector<16x16xf32>
    %718 = arith.mulf %717, %713 : vector<16x16xf32>
    %719 = arith.addf %704, %718 : vector<16x16xf32>
    %cst_214 = arith.constant -0.0813146308 : f32
    %720 = vector.broadcast %cst_214 : f32 to vector<16x16xf32>
    %721 = arith.mulf %720, %713 : vector<16x16xf32>
    %722 = arith.addf %707, %721 : vector<16x16xf32>
    %cst_215 = arith.constant -0.172628254 : f32
    %723 = vector.broadcast %cst_215 : f32 to vector<16x16xf32>
    %724 = arith.mulf %723, %713 : vector<16x16xf32>
    %725 = arith.addf %710, %724 : vector<16x16xf32>
    %cst_216 = arith.constant 0.000000e+00 : f32
    %726 = vector.broadcast %cst_216 : f32 to vector<1x16xf32>
    %727 = vector.extract_strided_slice %638 {offsets = [1, 0], sizes = [15, 16], strides = [1, 1]} : vector<16x16xf32> to vector<15x16xf32>
    %728 = tpu.concatenate %727, %726 in 0 : vector<15x16xf32>, vector<1x16xf32> -> vector<16x16xf32>
    %cst_217 = arith.constant 0.000000e+00 : f32
    %729 = vector.broadcast %cst_217 : f32 to vector<16x1xf32>
    %730 = vector.extract_strided_slice %728 {offsets = [0, 0], sizes = [16, 15], strides = [1, 1]} : vector<16x16xf32> to vector<16x15xf32>
    %731 = tpu.concatenate %729, %730 in 1 : vector<16x1xf32>, vector<16x15xf32> -> vector<16x16xf32>
    %cst_218 = arith.constant 0.113940068 : f32
    %732 = vector.broadcast %cst_218 : f32 to vector<16x16xf32>
    %733 = arith.mulf %732, %731 : vector<16x16xf32>
    %734 = arith.addf %716, %733 : vector<16x16xf32>
    %cst_219 = arith.constant -0.123482585 : f32
    %735 = vector.broadcast %cst_219 : f32 to vector<16x16xf32>
    %736 = arith.mulf %735, %731 : vector<16x16xf32>
    %737 = arith.addf %719, %736 : vector<16x16xf32>
    %cst_220 = arith.constant 0.0402341634 : f32
    %738 = vector.broadcast %cst_220 : f32 to vector<16x16xf32>
    %739 = arith.mulf %738, %731 : vector<16x16xf32>
    %740 = arith.addf %722, %739 : vector<16x16xf32>
    %cst_221 = arith.constant -0.0684810057 : f32
    %741 = vector.broadcast %cst_221 : f32 to vector<16x16xf32>
    %742 = arith.mulf %741, %731 : vector<16x16xf32>
    %743 = arith.addf %725, %742 : vector<16x16xf32>
    %cst_222 = arith.constant 0.148825213 : f32
    %744 = vector.broadcast %cst_222 : f32 to vector<16x16xf32>
    %745 = arith.mulf %744, %728 : vector<16x16xf32>
    %746 = arith.addf %734, %745 : vector<16x16xf32>
    %cst_223 = arith.constant 0.189588919 : f32
    %747 = vector.broadcast %cst_223 : f32 to vector<16x16xf32>
    %748 = arith.mulf %747, %728 : vector<16x16xf32>
    %749 = arith.addf %737, %748 : vector<16x16xf32>
    %cst_224 = arith.constant 0.11787796 : f32
    %750 = vector.broadcast %cst_224 : f32 to vector<16x16xf32>
    %751 = arith.mulf %750, %728 : vector<16x16xf32>
    %752 = arith.addf %740, %751 : vector<16x16xf32>
    %cst_225 = arith.constant -0.0179924835 : f32
    %753 = vector.broadcast %cst_225 : f32 to vector<16x16xf32>
    %754 = arith.mulf %753, %728 : vector<16x16xf32>
    %755 = arith.addf %743, %754 : vector<16x16xf32>
    %cst_226 = arith.constant 0.000000e+00 : f32
    %756 = vector.broadcast %cst_226 : f32 to vector<16x1xf32>
    %757 = vector.extract_strided_slice %728 {offsets = [0, 1], sizes = [16, 15], strides = [1, 1]} : vector<16x16xf32> to vector<16x15xf32>
    %758 = tpu.concatenate %757, %756 in 1 : vector<16x15xf32>, vector<16x1xf32> -> vector<16x16xf32>
    %cst_227 = arith.constant 0.00105000206 : f32
    %759 = vector.broadcast %cst_227 : f32 to vector<16x16xf32>
    %760 = arith.mulf %759, %758 : vector<16x16xf32>
    %761 = arith.addf %746, %760 : vector<16x16xf32>
    %cst_228 = arith.constant 0.178587049 : f32
    %762 = vector.broadcast %cst_228 : f32 to vector<16x16xf32>
    %763 = arith.mulf %762, %758 : vector<16x16xf32>
    %764 = arith.addf %749, %763 : vector<16x16xf32>
    %cst_229 = arith.constant 0.0126912091 : f32
    %765 = vector.broadcast %cst_229 : f32 to vector<16x16xf32>
    %766 = arith.mulf %765, %758 : vector<16x16xf32>
    %767 = arith.addf %752, %766 : vector<16x16xf32>
    %cst_230 = arith.constant 0.0401989371 : f32
    %768 = vector.broadcast %cst_230 : f32 to vector<16x16xf32>
    %769 = arith.mulf %768, %758 : vector<16x16xf32>
    %770 = arith.addf %755, %769 : vector<16x16xf32>
    %771 = vector.extract_strided_slice %218 {offsets = [1, 0, 0], sizes = [1, 16, 16], strides = [1, 1, 1]} : vector<3x16x16xf32> to vector<1x16x16xf32>
    %772 = vector.shape_cast %771 : vector<1x16x16xf32> to vector<16x16xf32>
    %cst_231 = arith.constant 0.000000e+00 : f32
    %773 = vector.broadcast %cst_231 : f32 to vector<1x16xf32>
    %774 = vector.extract_strided_slice %772 {offsets = [0, 0], sizes = [15, 16], strides = [1, 1]} : vector<16x16xf32> to vector<15x16xf32>
    %775 = tpu.concatenate %773, %774 in 0 : vector<1x16xf32>, vector<15x16xf32> -> vector<16x16xf32>
    %cst_232 = arith.constant 0.000000e+00 : f32
    %776 = vector.broadcast %cst_232 : f32 to vector<16x1xf32>
    %777 = vector.extract_strided_slice %775 {offsets = [0, 0], sizes = [16, 15], strides = [1, 1]} : vector<16x16xf32> to vector<16x15xf32>
    %778 = tpu.concatenate %776, %777 in 1 : vector<16x1xf32>, vector<16x15xf32> -> vector<16x16xf32>
    %cst_233 = arith.constant 0.186755806 : f32
    %779 = vector.broadcast %cst_233 : f32 to vector<16x16xf32>
    %780 = arith.mulf %779, %778 : vector<16x16xf32>
    %781 = arith.addf %761, %780 : vector<16x16xf32>
    %cst_234 = arith.constant -0.0977277904 : f32
    %782 = vector.broadcast %cst_234 : f32 to vector<16x16xf32>
    %783 = arith.mulf %782, %778 : vector<16x16xf32>
    %784 = arith.addf %764, %783 : vector<16x16xf32>
    %cst_235 = arith.constant 0.0950088426 : f32
    %785 = vector.broadcast %cst_235 : f32 to vector<16x16xf32>
    %786 = arith.mulf %785, %778 : vector<16x16xf32>
    %787 = arith.addf %767, %786 : vector<16x16xf32>
    %cst_236 = arith.constant -0.0151357204 : f32
    %788 = vector.broadcast %cst_236 : f32 to vector<16x16xf32>
    %789 = arith.mulf %788, %778 : vector<16x16xf32>
    %790 = arith.addf %770, %789 : vector<16x16xf32>
    %cst_237 = arith.constant 0.149407908 : f32
    %791 = vector.broadcast %cst_237 : f32 to vector<16x16xf32>
    %792 = arith.mulf %791, %775 : vector<16x16xf32>
    %793 = arith.addf %781, %792 : vector<16x16xf32>
    %cst_238 = arith.constant -0.0205158256 : f32
    %794 = vector.broadcast %cst_238 : f32 to vector<16x16xf32>
    %795 = arith.mulf %794, %775 : vector<16x16xf32>
    %796 = arith.addf %784, %795 : vector<16x16xf32>
    %cst_239 = arith.constant 0.0313067697 : f32
    %797 = vector.broadcast %cst_239 : f32 to vector<16x16xf32>
    %798 = arith.mulf %797, %775 : vector<16x16xf32>
    %799 = arith.addf %787, %798 : vector<16x16xf32>
    %cst_240 = arith.constant -0.0854095742 : f32
    %800 = vector.broadcast %cst_240 : f32 to vector<16x16xf32>
    %801 = arith.mulf %800, %775 : vector<16x16xf32>
    %802 = arith.addf %790, %801 : vector<16x16xf32>
    %cst_241 = arith.constant 0.000000e+00 : f32
    %803 = vector.broadcast %cst_241 : f32 to vector<16x1xf32>
    %804 = vector.extract_strided_slice %775 {offsets = [0, 1], sizes = [16, 15], strides = [1, 1]} : vector<16x16xf32> to vector<16x15xf32>
    %805 = tpu.concatenate %804, %803 in 1 : vector<16x15xf32>, vector<16x1xf32> -> vector<16x16xf32>
    %cst_242 = arith.constant 0.153277919 : f32
    %806 = vector.broadcast %cst_242 : f32 to vector<16x16xf32>
    %807 = arith.mulf %806, %805 : vector<16x16xf32>
    %808 = arith.addf %793, %807 : vector<16x16xf32>
    %cst_243 = arith.constant 0.14693588 : f32
    %809 = vector.broadcast %cst_243 : f32 to vector<16x16xf32>
    %810 = arith.mulf %809, %805 : vector<16x16xf32>
    %811 = arith.addf %796, %810 : vector<16x16xf32>
    %cst_244 = arith.constant 0.0154947424 : f32
    %812 = vector.broadcast %cst_244 : f32 to vector<16x16xf32>
    %813 = arith.mulf %812, %805 : vector<16x16xf32>
    %814 = arith.addf %799, %813 : vector<16x16xf32>
    %cst_245 = arith.constant 0.0378162526 : f32
    %815 = vector.broadcast %cst_245 : f32 to vector<16x16xf32>
    %816 = arith.mulf %815, %805 : vector<16x16xf32>
    %817 = arith.addf %802, %816 : vector<16x16xf32>
    %cst_246 = arith.constant 0.000000e+00 : f32
    %818 = vector.broadcast %cst_246 : f32 to vector<16x1xf32>
    %819 = vector.extract_strided_slice %772 {offsets = [0, 0], sizes = [16, 15], strides = [1, 1]} : vector<16x16xf32> to vector<16x15xf32>
    %820 = tpu.concatenate %818, %819 in 1 : vector<16x1xf32>, vector<16x15xf32> -> vector<16x16xf32>
    %cst_247 = arith.constant -0.104855299 : f32
    %821 = vector.broadcast %cst_247 : f32 to vector<16x16xf32>
    %822 = arith.mulf %821, %820 : vector<16x16xf32>
    %823 = arith.addf %808, %822 : vector<16x16xf32>
    %cst_248 = arith.constant -0.142001793 : f32
    %824 = vector.broadcast %cst_248 : f32 to vector<16x16xf32>
    %825 = arith.mulf %824, %820 : vector<16x16xf32>
    %826 = arith.addf %811, %825 : vector<16x16xf32>
    %cst_249 = arith.constant -0.170627013 : f32
    %827 = vector.broadcast %cst_249 : f32 to vector<16x16xf32>
    %828 = arith.mulf %827, %820 : vector<16x16xf32>
    %829 = arith.addf %814, %828 : vector<16x16xf32>
    %cst_250 = arith.constant 0.195077538 : f32
    %830 = vector.broadcast %cst_250 : f32 to vector<16x16xf32>
    %831 = arith.mulf %830, %820 : vector<16x16xf32>
    %832 = arith.addf %817, %831 : vector<16x16xf32>
    %cst_251 = arith.constant -0.0510805137 : f32
    %833 = vector.broadcast %cst_251 : f32 to vector<16x16xf32>
    %834 = arith.mulf %833, %772 : vector<16x16xf32>
    %835 = arith.addf %823, %834 : vector<16x16xf32>
    %cst_252 = arith.constant -0.118063219 : f32
    %836 = vector.broadcast %cst_252 : f32 to vector<16x16xf32>
    %837 = arith.mulf %836, %772 : vector<16x16xf32>
    %838 = arith.addf %826, %837 : vector<16x16xf32>
    %cst_253 = arith.constant -0.00281822286 : f32
    %839 = vector.broadcast %cst_253 : f32 to vector<16x16xf32>
    %840 = arith.mulf %839, %772 : vector<16x16xf32>
    %841 = arith.addf %829, %840 : vector<16x16xf32>
    %cst_254 = arith.constant 0.0428331867 : f32
    %842 = vector.broadcast %cst_254 : f32 to vector<16x16xf32>
    %843 = arith.mulf %842, %772 : vector<16x16xf32>
    %844 = arith.addf %832, %843 : vector<16x16xf32>
    %cst_255 = arith.constant 0.000000e+00 : f32
    %845 = vector.broadcast %cst_255 : f32 to vector<16x1xf32>
    %846 = vector.extract_strided_slice %772 {offsets = [0, 1], sizes = [16, 15], strides = [1, 1]} : vector<16x16xf32> to vector<16x15xf32>
    %847 = tpu.concatenate %846, %845 in 1 : vector<16x15xf32>, vector<16x1xf32> -> vector<16x16xf32>
    %cst_256 = arith.constant 0.0177426133 : f32
    %848 = vector.broadcast %cst_256 : f32 to vector<16x16xf32>
    %849 = arith.mulf %848, %847 : vector<16x16xf32>
    %850 = arith.addf %835, %849 : vector<16x16xf32>
    %cst_257 = arith.constant -0.0401780941 : f32
    %851 = vector.broadcast %cst_257 : f32 to vector<16x16xf32>
    %852 = arith.mulf %851, %847 : vector<16x16xf32>
    %853 = arith.addf %838, %852 : vector<16x16xf32>
    %cst_258 = arith.constant -0.163019836 : f32
    %854 = vector.broadcast %cst_258 : f32 to vector<16x16xf32>
    %855 = arith.mulf %854, %847 : vector<16x16xf32>
    %856 = arith.addf %841, %855 : vector<16x16xf32>
    %cst_259 = arith.constant 0.0462782271 : f32
    %857 = vector.broadcast %cst_259 : f32 to vector<16x16xf32>
    %858 = arith.mulf %857, %847 : vector<16x16xf32>
    %859 = arith.addf %844, %858 : vector<16x16xf32>
    %cst_260 = arith.constant 0.000000e+00 : f32
    %860 = vector.broadcast %cst_260 : f32 to vector<1x16xf32>
    %861 = vector.extract_strided_slice %772 {offsets = [1, 0], sizes = [15, 16], strides = [1, 1]} : vector<16x16xf32> to vector<15x16xf32>
    %862 = tpu.concatenate %861, %860 in 0 : vector<15x16xf32>, vector<1x16xf32> -> vector<16x16xf32>
    %cst_261 = arith.constant 0.000000e+00 : f32
    %863 = vector.broadcast %cst_261 : f32 to vector<16x1xf32>
    %864 = vector.extract_strided_slice %862 {offsets = [0, 0], sizes = [16, 15], strides = [1, 1]} : vector<16x16xf32> to vector<16x15xf32>
    %865 = tpu.concatenate %863, %864 in 1 : vector<16x1xf32>, vector<16x15xf32> -> vector<16x16xf32>
    %cst_262 = arith.constant -0.0870797112 : f32
    %866 = vector.broadcast %cst_262 : f32 to vector<16x16xf32>
    %867 = arith.mulf %866, %865 : vector<16x16xf32>
    %868 = arith.addf %850, %867 : vector<16x16xf32>
    %cst_263 = arith.constant -0.0578849651 : f32
    %869 = vector.broadcast %cst_263 : f32 to vector<16x16xf32>
    %870 = arith.mulf %869, %865 : vector<16x16xf32>
    %871 = arith.addf %853, %870 : vector<16x16xf32>
    %cst_264 = arith.constant -0.0311552528 : f32
    %872 = vector.broadcast %cst_264 : f32 to vector<16x16xf32>
    %873 = arith.mulf %872, %865 : vector<16x16xf32>
    %874 = arith.addf %856, %873 : vector<16x16xf32>
    %cst_265 = arith.constant 0.00561653404 : f32
    %875 = vector.broadcast %cst_265 : f32 to vector<16x16xf32>
    %876 = arith.mulf %875, %865 : vector<16x16xf32>
    %877 = arith.addf %859, %876 : vector<16x16xf32>
    %cst_266 = arith.constant -0.107075259 : f32
    %878 = vector.broadcast %cst_266 : f32 to vector<16x16xf32>
    %879 = arith.mulf %878, %862 : vector<16x16xf32>
    %880 = arith.addf %868, %879 : vector<16x16xf32>
    %cst_267 = arith.constant 0.105445176 : f32
    %881 = vector.broadcast %cst_267 : f32 to vector<16x16xf32>
    %882 = arith.mulf %881, %862 : vector<16x16xf32>
    %883 = arith.addf %871, %882 : vector<16x16xf32>
    %cst_268 = arith.constant -0.0403176956 : f32
    %884 = vector.broadcast %cst_268 : f32 to vector<16x16xf32>
    %885 = arith.mulf %884, %862 : vector<16x16xf32>
    %886 = arith.addf %874, %885 : vector<16x16xf32>
    %cst_269 = arith.constant 0.122244507 : f32
    %887 = vector.broadcast %cst_269 : f32 to vector<16x16xf32>
    %888 = arith.mulf %887, %862 : vector<16x16xf32>
    %889 = arith.addf %877, %888 : vector<16x16xf32>
    %cst_270 = arith.constant 0.000000e+00 : f32
    %890 = vector.broadcast %cst_270 : f32 to vector<16x1xf32>
    %891 = vector.extract_strided_slice %862 {offsets = [0, 1], sizes = [16, 15], strides = [1, 1]} : vector<16x16xf32> to vector<16x15xf32>
    %892 = tpu.concatenate %891, %890 in 1 : vector<16x15xf32>, vector<16x1xf32> -> vector<16x16xf32>
    %cst_271 = arith.constant 0.188315064 : f32
    %893 = vector.broadcast %cst_271 : f32 to vector<16x16xf32>
    %894 = arith.mulf %893, %892 : vector<16x16xf32>
    %895 = arith.addf %880, %894 : vector<16x16xf32>
    %cst_272 = arith.constant -0.134775907 : f32
    %896 = vector.broadcast %cst_272 : f32 to vector<16x16xf32>
    %897 = arith.mulf %896, %892 : vector<16x16xf32>
    %898 = arith.addf %883, %897 : vector<16x16xf32>
    %cst_273 = arith.constant -0.127048492 : f32
    %899 = vector.broadcast %cst_273 : f32 to vector<16x16xf32>
    %900 = arith.mulf %899, %892 : vector<16x16xf32>
    %901 = arith.addf %886, %900 : vector<16x16xf32>
    %cst_274 = arith.constant 0.096939668 : f32
    %902 = vector.broadcast %cst_274 : f32 to vector<16x16xf32>
    %903 = arith.mulf %902, %892 : vector<16x16xf32>
    %904 = arith.addf %889, %903 : vector<16x16xf32>
    %905 = vector.extract_strided_slice %218 {offsets = [2, 0, 0], sizes = [1, 16, 16], strides = [1, 1, 1]} : vector<3x16x16xf32> to vector<1x16x16xf32>
    %906 = vector.shape_cast %905 : vector<1x16x16xf32> to vector<16x16xf32>
    %cst_275 = arith.constant 0.000000e+00 : f32
    %907 = vector.broadcast %cst_275 : f32 to vector<1x16xf32>
    %908 = vector.extract_strided_slice %906 {offsets = [0, 0], sizes = [15, 16], strides = [1, 1]} : vector<16x16xf32> to vector<15x16xf32>
    %909 = tpu.concatenate %907, %908 in 0 : vector<1x16xf32>, vector<15x16xf32> -> vector<16x16xf32>
    %cst_276 = arith.constant 0.000000e+00 : f32
    %910 = vector.broadcast %cst_276 : f32 to vector<16x1xf32>
    %911 = vector.extract_strided_slice %909 {offsets = [0, 0], sizes = [16, 15], strides = [1, 1]} : vector<16x16xf32> to vector<16x15xf32>
    %912 = tpu.concatenate %910, %911 in 1 : vector<16x1xf32>, vector<16x15xf32> -> vector<16x16xf32>
    %cst_277 = arith.constant -0.0103218853 : f32
    %913 = vector.broadcast %cst_277 : f32 to vector<16x16xf32>
    %914 = arith.mulf %913, %912 : vector<16x16xf32>
    %915 = arith.addf %895, %914 : vector<16x16xf32>
    %cst_278 = arith.constant 0.0410598516 : f32
    %916 = vector.broadcast %cst_278 : f32 to vector<16x16xf32>
    %917 = arith.mulf %916, %912 : vector<16x16xf32>
    %918 = arith.addf %898, %917 : vector<16x16xf32>
    %cst_279 = arith.constant 0.0144043574 : f32
    %919 = vector.broadcast %cst_279 : f32 to vector<16x16xf32>
    %920 = arith.mulf %919, %912 : vector<16x16xf32>
    %921 = arith.addf %901, %920 : vector<16x16xf32>
    %cst_280 = arith.constant 0.145427346 : f32
    %922 = vector.broadcast %cst_280 : f32 to vector<16x16xf32>
    %923 = arith.mulf %922, %912 : vector<16x16xf32>
    %924 = arith.addf %904, %923 : vector<16x16xf32>
    %cst_281 = arith.constant -0.255298972 : f32
    %925 = vector.broadcast %cst_281 : f32 to vector<16x16xf32>
    %926 = arith.mulf %925, %909 : vector<16x16xf32>
    %927 = arith.addf %915, %926 : vector<16x16xf32>
    %cst_282 = arith.constant 0.0653618574 : f32
    %928 = vector.broadcast %cst_282 : f32 to vector<16x16xf32>
    %929 = arith.mulf %928, %909 : vector<16x16xf32>
    %930 = arith.addf %918, %929 : vector<16x16xf32>
    %cst_283 = arith.constant 0.0864436179 : f32
    %931 = vector.broadcast %cst_283 : f32 to vector<16x16xf32>
    %932 = arith.mulf %931, %909 : vector<16x16xf32>
    %933 = arith.addf %921, %932 : vector<16x16xf32>
    %cst_284 = arith.constant -7.421650e-02 : f32
    %934 = vector.broadcast %cst_284 : f32 to vector<16x16xf32>
    %935 = arith.mulf %934, %909 : vector<16x16xf32>
    %936 = arith.addf %924, %935 : vector<16x16xf32>
    %cst_285 = arith.constant 0.000000e+00 : f32
    %937 = vector.broadcast %cst_285 : f32 to vector<16x1xf32>
    %938 = vector.extract_strided_slice %909 {offsets = [0, 1], sizes = [16, 15], strides = [1, 1]} : vector<16x16xf32> to vector<16x15xf32>
    %939 = tpu.concatenate %938, %937 in 1 : vector<16x15xf32>, vector<16x1xf32> -> vector<16x16xf32>
    %cst_286 = arith.constant -0.0887785777 : f32
    %940 = vector.broadcast %cst_286 : f32 to vector<16x16xf32>
    %941 = arith.mulf %940, %939 : vector<16x16xf32>
    %942 = arith.addf %927, %941 : vector<16x16xf32>
    %cst_287 = arith.constant -0.198079646 : f32
    %943 = vector.broadcast %cst_287 : f32 to vector<16x16xf32>
    %944 = arith.mulf %943, %939 : vector<16x16xf32>
    %945 = arith.addf %930, %944 : vector<16x16xf32>
    %cst_288 = arith.constant -0.0347912163 : f32
    %946 = vector.broadcast %cst_288 : f32 to vector<16x16xf32>
    %947 = arith.mulf %946, %939 : vector<16x16xf32>
    %948 = arith.addf %933, %947 : vector<16x16xf32>
    %cst_289 = arith.constant 0.0156348962 : f32
    %949 = vector.broadcast %cst_289 : f32 to vector<16x16xf32>
    %950 = arith.mulf %949, %939 : vector<16x16xf32>
    %951 = arith.addf %936, %950 : vector<16x16xf32>
    %cst_290 = arith.constant 0.000000e+00 : f32
    %952 = vector.broadcast %cst_290 : f32 to vector<16x1xf32>
    %953 = vector.extract_strided_slice %906 {offsets = [0, 0], sizes = [16, 15], strides = [1, 1]} : vector<16x16xf32> to vector<16x15xf32>
    %954 = tpu.concatenate %952, %953 in 1 : vector<16x1xf32>, vector<16x15xf32> -> vector<16x16xf32>
    %cst_291 = arith.constant -0.0509652197 : f32
    %955 = vector.broadcast %cst_291 : f32 to vector<16x16xf32>
    %956 = arith.mulf %955, %954 : vector<16x16xf32>
    %957 = arith.addf %942, %956 : vector<16x16xf32>
    %cst_292 = arith.constant -0.0438074283 : f32
    %958 = vector.broadcast %cst_292 : f32 to vector<16x16xf32>
    %959 = arith.mulf %958, %954 : vector<16x16xf32>
    %960 = arith.addf %945, %959 : vector<16x16xf32>
    %cst_293 = arith.constant -0.125279531 : f32
    %961 = vector.broadcast %cst_293 : f32 to vector<16x16xf32>
    %962 = arith.mulf %961, %954 : vector<16x16xf32>
    %963 = arith.addf %948, %962 : vector<16x16xf32>
    %cst_294 = arith.constant 0.0777490362 : f32
    %964 = vector.broadcast %cst_294 : f32 to vector<16x16xf32>
    %965 = arith.mulf %964, %954 : vector<16x16xf32>
    %966 = arith.addf %951, %965 : vector<16x16xf32>
    %cst_295 = arith.constant 0.00665172236 : f32
    %967 = vector.broadcast %cst_295 : f32 to vector<16x16xf32>
    %968 = arith.mulf %967, %906 : vector<16x16xf32>
    %969 = arith.addf %957, %968 : vector<16x16xf32>
    %cst_296 = arith.constant 0.0302471891 : f32
    %970 = vector.broadcast %cst_296 : f32 to vector<16x16xf32>
    %971 = arith.mulf %970, %906 : vector<16x16xf32>
    %972 = arith.addf %960, %971 : vector<16x16xf32>
    %cst_297 = arith.constant -0.0634322092 : f32
    %973 = vector.broadcast %cst_297 : f32 to vector<16x16xf32>
    %974 = arith.mulf %973, %906 : vector<16x16xf32>
    %975 = arith.addf %963, %974 : vector<16x16xf32>
    %cst_298 = arith.constant -0.0362741165 : f32
    %976 = vector.broadcast %cst_298 : f32 to vector<16x16xf32>
    %977 = arith.mulf %976, %906 : vector<16x16xf32>
    %978 = arith.addf %966, %977 : vector<16x16xf32>
    %cst_299 = arith.constant 0.000000e+00 : f32
    %979 = vector.broadcast %cst_299 : f32 to vector<16x1xf32>
    %980 = vector.extract_strided_slice %906 {offsets = [0, 1], sizes = [16, 15], strides = [1, 1]} : vector<16x16xf32> to vector<16x15xf32>
    %981 = tpu.concatenate %980, %979 in 1 : vector<16x15xf32>, vector<16x1xf32> -> vector<16x16xf32>
    %cst_300 = arith.constant -0.09072984 : f32
    %982 = vector.broadcast %cst_300 : f32 to vector<16x16xf32>
    %983 = arith.mulf %982, %981 : vector<16x16xf32>
    %984 = arith.addf %969, %983 : vector<16x16xf32>
    %cst_301 = arith.constant 0.00519453967 : f32
    %985 = vector.broadcast %cst_301 : f32 to vector<16x16xf32>
    %986 = arith.mulf %985, %981 : vector<16x16xf32>
    %987 = arith.addf %972, %986 : vector<16x16xf32>
    %cst_302 = arith.constant 0.0729090571 : f32
    %988 = vector.broadcast %cst_302 : f32 to vector<16x16xf32>
    %989 = arith.mulf %988, %981 : vector<16x16xf32>
    %990 = arith.addf %975, %989 : vector<16x16xf32>
    %cst_303 = arith.constant 0.0128982915 : f32
    %991 = vector.broadcast %cst_303 : f32 to vector<16x16xf32>
    %992 = arith.mulf %991, %981 : vector<16x16xf32>
    %993 = arith.addf %978, %992 : vector<16x16xf32>
    %cst_304 = arith.constant 0.000000e+00 : f32
    %994 = vector.broadcast %cst_304 : f32 to vector<1x16xf32>
    %995 = vector.extract_strided_slice %906 {offsets = [1, 0], sizes = [15, 16], strides = [1, 1]} : vector<16x16xf32> to vector<15x16xf32>
    %996 = tpu.concatenate %995, %994 in 0 : vector<15x16xf32>, vector<1x16xf32> -> vector<16x16xf32>
    %cst_305 = arith.constant 0.000000e+00 : f32
    %997 = vector.broadcast %cst_305 : f32 to vector<16x1xf32>
    %998 = vector.extract_strided_slice %996 {offsets = [0, 0], sizes = [16, 15], strides = [1, 1]} : vector<16x16xf32> to vector<16x15xf32>
    %999 = tpu.concatenate %997, %998 in 1 : vector<16x1xf32>, vector<16x15xf32> -> vector<16x16xf32>
    %cst_306 = arith.constant -0.116514981 : f32
    %1000 = vector.broadcast %cst_306 : f32 to vector<16x16xf32>
    %1001 = arith.mulf %1000, %999 : vector<16x16xf32>
    %1002 = arith.addf %984, %1001 : vector<16x16xf32>
    %cst_307 = arith.constant 0.0900826454 : f32
    %1003 = vector.broadcast %cst_307 : f32 to vector<16x16xf32>
    %1004 = arith.mulf %1003, %999 : vector<16x16xf32>
    %1005 = arith.addf %987, %1004 : vector<16x16xf32>
    %cst_308 = arith.constant 0.0465662442 : f32
    %1006 = vector.broadcast %cst_308 : f32 to vector<16x16xf32>
    %1007 = arith.mulf %1006, %999 : vector<16x16xf32>
    %1008 = arith.addf %990, %1007 : vector<16x16xf32>
    %cst_309 = arith.constant -0.153624371 : f32
    %1009 = vector.broadcast %cst_309 : f32 to vector<16x16xf32>
    %1010 = arith.mulf %1009, %999 : vector<16x16xf32>
    %1011 = arith.addf %993, %1010 : vector<16x16xf32>
    %cst_310 = arith.constant 0.0208274983 : f32
    %1012 = vector.broadcast %cst_310 : f32 to vector<16x16xf32>
    %1013 = arith.mulf %1012, %996 : vector<16x16xf32>
    %1014 = arith.addf %1002, %1013 : vector<16x16xf32>
    %cst_311 = arith.constant 9.766390e-02 : f32
    %1015 = vector.broadcast %cst_311 : f32 to vector<16x16xf32>
    %1016 = arith.mulf %1015, %996 : vector<16x16xf32>
    %1017 = arith.addf %1005, %1016 : vector<16x16xf32>
    %cst_312 = arith.constant 0.0356366411 : f32
    %1018 = vector.broadcast %cst_312 : f32 to vector<16x16xf32>
    %1019 = arith.mulf %1018, %996 : vector<16x16xf32>
    %1020 = arith.addf %1008, %1019 : vector<16x16xf32>
    %cst_313 = arith.constant 0.0706573203 : f32
    %1021 = vector.broadcast %cst_313 : f32 to vector<16x16xf32>
    %1022 = arith.mulf %1021, %996 : vector<16x16xf32>
    %1023 = arith.addf %1011, %1022 : vector<16x16xf32>
    %cst_314 = arith.constant 0.000000e+00 : f32
    %1024 = vector.broadcast %cst_314 : f32 to vector<16x1xf32>
    %1025 = vector.extract_strided_slice %996 {offsets = [0, 1], sizes = [16, 15], strides = [1, 1]} : vector<16x16xf32> to vector<16x15xf32>
    %1026 = tpu.concatenate %1025, %1024 in 1 : vector<16x15xf32>, vector<16x1xf32> -> vector<16x16xf32>
    %cst_315 = arith.constant -0.117312342 : f32
    %1027 = vector.broadcast %cst_315 : f32 to vector<16x16xf32>
    %1028 = arith.mulf %1027, %1026 : vector<16x16xf32>
    %1029 = arith.addf %1014, %1028 : vector<16x16xf32>
    %cst_316 = arith.constant 0.194362119 : f32
    %1030 = vector.broadcast %cst_316 : f32 to vector<16x16xf32>
    %1031 = arith.mulf %1030, %1026 : vector<16x16xf32>
    %1032 = arith.addf %1017, %1031 : vector<16x16xf32>
    %cst_317 = arith.constant -4.136190e-02 : f32
    %1033 = vector.broadcast %cst_317 : f32 to vector<16x16xf32>
    %1034 = arith.mulf %1033, %1026 : vector<16x16xf32>
    %1035 = arith.addf %1020, %1034 : vector<16x16xf32>
    %cst_318 = arith.constant -0.0747454837 : f32
    %1036 = vector.broadcast %cst_318 : f32 to vector<16x16xf32>
    %1037 = arith.mulf %1036, %1026 : vector<16x16xf32>
    %1038 = arith.addf %1023, %1037 : vector<16x16xf32>
    %cst_319 = arith.constant 0.000000e+00 : f32
    %1039 = vector.broadcast %cst_319 : f32 to vector<16x16xf32>
    %1040 = arith.maximumf %1029, %1039 : vector<16x16xf32>
    %cst_320 = arith.constant 0.000000e+00 : f32
    %1041 = vector.broadcast %cst_320 : f32 to vector<16x16xf32>
    %1042 = arith.maximumf %1032, %1041 : vector<16x16xf32>
    %cst_321 = arith.constant 0.000000e+00 : f32
    %1043 = vector.broadcast %cst_321 : f32 to vector<16x16xf32>
    %1044 = arith.maximumf %1035, %1043 : vector<16x16xf32>
    %cst_322 = arith.constant 0.000000e+00 : f32
    %1045 = vector.broadcast %cst_322 : f32 to vector<16x16xf32>
    %1046 = arith.maximumf %1038, %1045 : vector<16x16xf32>
    %1047 = arith.mulf %626, %626 : vector<16x16xf32>
    %1048 = arith.mulf %1040, %1040 : vector<16x16xf32>
    %1049 = arith.mulf %628, %628 : vector<16x16xf32>
    %1050 = arith.addf %1047, %1049 : vector<16x16xf32>
    %1051 = arith.mulf %1042, %1042 : vector<16x16xf32>
    %1052 = arith.addf %1048, %1051 : vector<16x16xf32>
    %1053 = arith.mulf %630, %630 : vector<16x16xf32>
    %1054 = arith.addf %1050, %1053 : vector<16x16xf32>
    %1055 = arith.mulf %1044, %1044 : vector<16x16xf32>
    %1056 = arith.addf %1052, %1055 : vector<16x16xf32>
    %1057 = arith.mulf %632, %632 : vector<16x16xf32>
    %1058 = arith.addf %1054, %1057 : vector<16x16xf32>
    %1059 = arith.mulf %1046, %1046 : vector<16x16xf32>
    %1060 = arith.addf %1056, %1059 : vector<16x16xf32>
    %cst_323 = arith.constant 1.000000e-10 : f32
    %1061 = vector.broadcast %cst_323 : f32 to vector<16x16xf32>
    %1062 = arith.addf %1058, %1061 : vector<16x16xf32>
    %1063 = math.rsqrt %1062 : vector<16x16xf32>
    %cst_324 = arith.constant 1.000000e-10 : f32
    %1064 = vector.broadcast %cst_324 : f32 to vector<16x16xf32>
    %1065 = arith.addf %1060, %1064 : vector<16x16xf32>
    %1066 = math.rsqrt %1065 : vector<16x16xf32>
    %cst_325 = arith.constant 0.000000e+00 : f32
    %1067 = vector.broadcast %cst_325 : f32 to vector<16x16xf32>
    %1068 = arith.mulf %626, %1063 : vector<16x16xf32>
    %1069 = arith.mulf %1040, %1066 : vector<16x16xf32>
    %1070 = arith.subf %1068, %1069 : vector<16x16xf32>
    %1071 = arith.mulf %1070, %1070 : vector<16x16xf32>
    %cst_326 = arith.constant 0.192294195 : f32
    %1072 = vector.broadcast %cst_326 : f32 to vector<16x16xf32>
    %1073 = arith.mulf %1072, %1071 : vector<16x16xf32>
    %1074 = arith.addf %1067, %1073 : vector<16x16xf32>
    %1075 = arith.mulf %628, %1063 : vector<16x16xf32>
    %1076 = arith.mulf %1042, %1066 : vector<16x16xf32>
    %1077 = arith.subf %1075, %1076 : vector<16x16xf32>
    %1078 = arith.mulf %1077, %1077 : vector<16x16xf32>
    %cst_327 = arith.constant 0.148051485 : f32
    %1079 = vector.broadcast %cst_327 : f32 to vector<16x16xf32>
    %1080 = arith.mulf %1079, %1078 : vector<16x16xf32>
    %1081 = arith.addf %1074, %1080 : vector<16x16xf32>
    %1082 = arith.mulf %630, %1063 : vector<16x16xf32>
    %1083 = arith.mulf %1044, %1066 : vector<16x16xf32>
    %1084 = arith.subf %1082, %1083 : vector<16x16xf32>
    %1085 = arith.mulf %1084, %1084 : vector<16x16xf32>
    %cst_328 = arith.constant 0.186755896 : f32
    %1086 = vector.broadcast %cst_328 : f32 to vector<16x16xf32>
    %1087 = arith.mulf %1086, %1085 : vector<16x16xf32>
    %1088 = arith.addf %1081, %1087 : vector<16x16xf32>
    %1089 = arith.mulf %632, %1063 : vector<16x16xf32>
    %1090 = arith.mulf %1046, %1066 : vector<16x16xf32>
    %1091 = arith.subf %1089, %1090 : vector<16x16xf32>
    %1092 = arith.mulf %1091, %1091 : vector<16x16xf32>
    %cst_329 = arith.constant 0.0906044692 : f32
    %1093 = vector.broadcast %cst_329 : f32 to vector<16x16xf32>
    %1094 = arith.mulf %1093, %1092 : vector<16x16xf32>
    %1095 = arith.addf %1088, %1094 : vector<16x16xf32>
    %1096 = vector.shape_cast %1095 : vector<16x16xf32> to vector<1x16x16xf32>
    %cst_330 = arith.constant dense<0.000000e+00> : vector<1xf32>
    %1097 = vector.multi_reduction <add>, %1096, %cst_330 [1, 2] : vector<1x16x16xf32> to vector<1xf32>
    %1098 = vector.shape_cast %1097 : vector<1xf32> to vector<1x1x1xf32>
    %1099 = vector.extract %1098[0, 0, 0] : f32 from vector<1x1x1xf32>
    %cst_331 = arith.constant 2.560000e+02 : f32
    %1100 = arith.divf %1099, %cst_331 : f32
    %1101 = vector.broadcast %210 : f32 to vector<8x128xf32>
    %c0_332 = arith.constant 0 : index
    %c0_333 = arith.constant 0 : index
    %c0_334 = arith.constant 0 : index
    %1102 = vector.load %arg5[%c0_332, %c0_333, %c0_334] : memref<1x8x128xf32, #tpu.memory_space<vmem>>, vector<1x8x128xf32>
    %1103 = vector.shape_cast %1102 : vector<1x8x128xf32> to vector<8x128xf32>
    %1104 = vector.shape_cast %1101 : vector<8x128xf32> to vector<1x8x128xf32>
    tpu.vector_store %arg5[%c0_332, %c0_333, %c0_334], %1104 {strides = array<i32>} : memref<1x8x128xf32, #tpu.memory_space<vmem>>, vector<1x8x128xf32>,
    %1105 = vector.broadcast %1100 : f32 to vector<8x128xf32>
    %c0_335 = arith.constant 0 : index
    %c0_336 = arith.constant 0 : index
    %c0_337 = arith.constant 0 : index
    %1106 = vector.load %arg6[%c0_335, %c0_336, %c0_337] : memref<1x8x128xf32, #tpu.memory_space<vmem>>, vector<1x8x128xf32>
    %1107 = vector.shape_cast %1106 : vector<1x8x128xf32> to vector<8x128xf32>
    %1108 = vector.shape_cast %1105 : vector<8x128xf32> to vector<1x8x128xf32>
    tpu.vector_store %arg6[%c0_335, %c0_336, %c0_337], %1108 {strides = array<i32>} : memref<1x8x128xf32, #tpu.memory_space<vmem>>, vector<1x8x128xf32>,
    return
  }
  func.func @transform_0(%arg0: i32) -> (i32, i32, i32, i32) {
    %c0_i32 = arith.constant 0 : i32
    %c0_i32_0 = arith.constant 0 : i32
    %c0_i32_1 = arith.constant 0 : i32
    %c0_i32_2 = arith.constant 0 : i32
    return %arg0, %c0_i32, %c0_i32_0, %c0_i32_1 : i32, i32, i32, i32
  }
  func.func @transform_1(%arg0: i32) -> (i32, i32, i32, i32) {
    %c0_i32 = arith.constant 0 : i32
    %c0_i32_0 = arith.constant 0 : i32
    %c0_i32_1 = arith.constant 0 : i32
    %c0_i32_2 = arith.constant 0 : i32
    return %arg0, %c0_i32, %c0_i32_0, %c0_i32_1 : i32, i32, i32, i32
  }
  func.func @transform_2(%arg0: i32) -> (i32, i32) {
    %c0_i32 = arith.constant 0 : i32
    %c0_i32_0 = arith.constant 0 : i32
    %c0_i32_1 = arith.constant 0 : i32
    return %c0_i32, %c0_i32_0 : i32, i32
  }
  func.func @transform_3(%arg0: i32) -> (i32, i32) {
    %c0_i32 = arith.constant 0 : i32
    %c0_i32_0 = arith.constant 0 : i32
    %c0_i32_1 = arith.constant 0 : i32
    return %c0_i32, %c0_i32_0 : i32, i32
  }
  func.func @transform_4(%arg0: i32) -> (i32, i32, i32) {
    %c0_i32 = arith.constant 0 : i32
    %c0_i32_0 = arith.constant 0 : i32
    %c0_i32_1 = arith.constant 0 : i32
    return %arg0, %c0_i32, %c0_i32_0 : i32, i32, i32
  }
  func.func @transform_5(%arg0: i32) -> (i32, i32, i32) {
    %c0_i32 = arith.constant 0 : i32
    %c0_i32_0 = arith.constant 0 : i32
    %c0_i32_1 = arith.constant 0 : i32
    return %arg0, %c0_i32, %c0_i32_0 : i32, i32, i32
  }
}

</mosaic_0001>

<bundles_post_ra>
// kernel: my_loss.1
= control target key start
LH: loop header
LB: loop body
LE: loop exit
PB: predicated region body
PF: predicated region fallthrough
CT: control target
= control target key end

     0   :  { %s4453_s0 = inlined_call_operand.hbm [shape: f32[2,3,16,16], index: 0, kind: input, shape index: {}]   ;;  %s4454_s1 = inlined_call_operand.hbm [shape: f32[2,3,16,16], index: 1, kind: input, shape index: {}]   ;;  %s4455_s2 = inlined_call_operand.hbm [shape: f32[16,16], index: 2, kind: input, shape index: {}, may-alias: {2,3}]   ;;  %s4456_s3 = inlined_call_operand.hbm [shape: f32[16,16], index: 3, kind: input, shape index: {}, may-alias: {2,3}]   ;;  %s4457_s4 = inlined_call_operand.vmem [shape: f32[2,8,128], index: 4, kind: output, shape index: {0}]   ;;  %s4458_s5 = inlined_call_operand.vmem [shape: f32[2,8,128], index: 5, kind: output, shape index: {1}]  }
   0x1   :  { %4509 = sst [smem:[#allocation55_spill]] %s4453_s0 }
   0x2   :  { %11 = vsyncpa [#allocation3], 0 }
   0x3   :  { %13 = vsyncpa [#allocation3 + $0x1], 0 }
   0x4   :  { %14 = vsyncpa [#allocation5], 0 }
   0x5   :  { %16 = vsyncpa [#allocation5 + $0x1], 0 }
   0x6   :  { %17 = vsyncpa [#allocation8], 0  ;;  %s2966_s18 = smov 0   ;;  %s2968_s19 = smov 0  }
   0x7   :  { %s2970_s20 = smov 0   ;;  %s2972_s21 = smov 0  }
   0x8 LB: > { %s2985_s22 = sadd.s32 4294967295, %s2919_s21   ;;  %p43_p0 = scmp.ne.s32.totalorder %s2911_s19, %s2907_s18  ;;  %s2919_s21 = sphi %s2972_s21, %s4603_s21   ;;  %s2915_s20 = sphi %s2970_s20, %s4602_s20   ;;  %s2911_s19 = sphi %s2968_s19, %s4601_s19   ;;  %s2907_s18 = sphi %s2966_s18, %s4600_s18  }
   0x9   : > { %p44_p1 = scmp.eq.s32.totalorder %s2985_s22, 0  ;;  %p2546_p2 = scmp.ge.s32.totalorder %s2919_s21, 1 }
   0xa   : > { %p174_p3 = scmp.lt.s32.totalorder %s2919_s21, 3  ;;  %s185_s26 = sshll.u32 %s4455_s2, 4  ;;  %s186_s26 = int_to_ptr.hbm [resolvable:$true] %s185_s26 }
   0xb   : > { %p2993_p4 = por %p44_p1, %p43_p0  ;;  %s2921_s28 = smov [#allocation6]  }
   0xc   : > { %p3000_p5 = pnand %p2546_p2, %p174_p3  ;;  %s187_s29 = sshll.u32 %s2921_s28, 4  ;;  %s188_s29 = int_to_ptr.vmem [resolvable:$true] %s187_s29 }
   0xd   : > { %s199_s7 = sshll.u32 %s4456_s3, 4  ;;  %s2922_s8 = smov 128   ;;  %s200_s7 = int_to_ptr.hbm [resolvable:$true] %s199_s7 }
   0xe   : > { %p2634_p6 = pneg %p3000_p5  ;;  %s2923_s9 = smov 8  }
   0xf   : > { %s2924_s10 = smov [#allocation7]   ;;  %s3018_s12 = sadd.s32 1, %s2919_s21  }
  0x10   : > { %p2635_p7 = pnand %p2634_p6, %p44_p1  ;;  %s201_s11 = sshll.u32 %s2924_s10, 4  ;;  %s202_s11 = int_to_ptr.vmem [resolvable:$true] %s201_s11 }
  0x11   : > { %s30_s13 = sadd.s32 1, %s2915_s20  ;;  %s27_s14 = ssub.s32 %s2919_s21, %s3018_s12 }
  0x12   : > { %2637 = dma.hbm_to_vmem [thread:$0]  (!%p2635_p7), %s186_s26, 256, %s188_s29, [#allocation5], %s2922_s8, %s2922_s8, %s2923_s9  }
  0x13   : > { %2640 = dma.hbm_to_vmem [thread:$0]  (!%p2635_p7), %s200_s7, 256, %s202_s11, [#allocation8], %s2922_s8, %s2922_s8, %s2923_s9  }
  0x14   : > { %p37_p8 = scmp.ne.s32.totalorder %s2915_s20, %s2911_s19  ;;  %p28_p9 = scmp.eq.s32.totalorder %s27_s14, 0 }
  0x15   : > { %p38_p10 = scmp.eq.s32.totalorder %s2919_s21, 0  ;;  %p2650_p11 = scmp.lt.s32.totalorder %s2919_s21, 2 }
  0x16   : > { %s215_s15 = sand.u32 1, %s2915_s20   ;;  %s2606_s24 = smul.u32 48, %s2919_s21 }
  0x17   : > { %s3029_s16 = scalar_select %p28_p9, %s2915_s20, %s30_s13  }
  0x18   : > { %p39_p12 = por %p38_p10, %p37_p8  ;;  %s3031_s17 = smul.u32 48, %s215_s15 }
  0x19   : > { %s4513_s0 = sld [smem:[#allocation55_spill]]  ;;  %s216_s10 = scalar_lea.sflag [#allocation3], %s215_s15 }
  0x1a   : > { %p3035_p13 = pnand %p2650_p11, %p39_p12  ;;  %s219_s30 = scalar_lea.vmem [#allocation2], %s3031_s17 }
  0x1b   : > { %s227_s6 = sshll.u32 %s219_s30, 4  ;;  %s228_s6 = int_to_ptr.vmem [resolvable:$true] %s227_s6 }
  0x1c   : > { %p2817_p2 = pneg %p3035_p13 }
  0x1f   : > { %s224_s29 = scalar_lea.hbm %s4513_s0, %s2606_s24  ;;  %s2820_s28 = scalar_lea.hbm %s4513_s0, 96 }
  0x20   : > { %s225_s7 = sshll.u32 %s224_s29, 4  ;;  %s226_s7 = int_to_ptr.hbm [resolvable:$true] %s225_s7 }
  0x21   : > { %s2813_s11 = sshra.s32 %s226_s7, 4  ;;  %s2814_s11 = int_to_ptr.hbm [resolvable:$true] %s2813_s11 }
  0x22   : > { %s2815_s13 = scalar_lea.hbm %s2814_s11, 48  ;;  %p2821_p7 = scmp.lt.s32.totalorder %s2814_s11, %s4513_s0 }
  0x23   : > { %p2816_p0 = scmp.ne.s32.totalorder %s2814_s11, %s2815_s13  ;;  %p2822_p8 = scmp.lt.s32.totalorder %s2820_s28, %s2815_s13 }
  0x25   : > { %p2818_p3 = pnand %p2817_p2, %p2816_p0  ;;  %p2823_p9 = por %p2822_p8, %p2821_p7 }
  0x27   : > { %p2819_p6 = pneg %p2818_p3 }
  0x29   : > { %p2824_p10 = pnand %p2823_p9, %p2819_p6 }
  0x2b   : > { %2827 = shalt.err (!%p2824_p10)
}
  0x2c   : > { %2644 = dma.hbm_to_vmem [thread:$0]  (!%p3035_p13), %s226_s7, 768, %s228_s6, %s216_s10, %s2922_s8, %s2922_s8, %s2923_s9  }
  0x2d   : > { %s246_s14 = scalar_lea.hbm %s4454_s1, %s2606_s24  ;;  %s241_s18 = scalar_lea.vmem [#allocation4], %s3031_s17 }
  0x2e   : > { %s247_s26 = sshll.u32 %s246_s14, 4  ;;  %s249_s11 = sshll.u32 %s241_s18, 4  ;;  %s248_s26 = int_to_ptr.hbm [resolvable:$true] %s247_s26  ;;  %s250_s11 = int_to_ptr.vmem [resolvable:$true] %s249_s11 }
  0x2f   : > { %s4514_s13 = sand.u32 1, %s2919_s21   ;;  %s2843_s30 = sshra.s32 %s248_s26, 4  ;;  %s2844_s30 = int_to_ptr.hbm [resolvable:$true] %s2843_s30 }
  0x30   : > { %s238_s28 = scalar_lea.sflag [#allocation5], %s4514_s13  ;;  %s2845_s0 = scalar_lea.hbm %s2844_s30, 48 }
  0x31   : > { %p2846_p11 = scmp.ne.s32.totalorder %s2844_s30, %s2845_s0  ;;  %s2850_s10 = scalar_lea.hbm %s4454_s1, 96 }
  0x32   : > { %p2851_p3 = scmp.lt.s32.totalorder %s2844_s30, %s4454_s1  ;;  %p2852_p6 = scmp.lt.s32.totalorder %s2850_s10, %s2845_s0 }
  0x33   : > { %p2848_p12 = pnand %p2846_p11, %p2817_p2 }
  0x34   : > { %p2853_p7 = por %p2852_p6, %p2851_p3 }
  0x35   : > { %p2849_p0 = pneg %p2848_p12 }
  0x37   : > { %p2854_p8 = pnand %p2853_p7, %p2849_p0 }
  0x39   : > { %2857 = shalt.err (!%p2854_p8)
}
  0x3a   : > { %2647 = dma.hbm_to_vmem [thread:$0]  (!%p3035_p13), %s248_s26, 768, %s250_s11, %s238_s28, %s2922_s8, %s2922_s8, %s2923_s9  }
  0x3b   : > { %261 = sbr.rel (%p3000_p5) target bundleno = 1394 (0x572), region = 36 }
  0x40   : > { %s263_s21 = sand.u32 1, %s2911_s19  }
  0x41   : > { %s2609_s17 = smul.u32 48, %s263_s21  ;;  %s264_s29 = scalar_lea.sflag [#allocation3], %s263_s21 }
  0x43   : > { %s3082_s14 = scalar_lea.vmem [#allocation2], %s2609_s17 }
  0x44   : > { %2890 = dma.done.wait (%p2993_p4), %s264_s29, 768  }
  0x45   : > { %2892 = vsyncadd (%p2993_p4), %s264_s29, 4294966528  ;;  %s273_s0 = sand.u32 1, %s2985_s22   ;;  %s3089_s8 = scalar_lea.vmem [#allocation4], %s2609_s17 }
  0x46   : > { %s274_s25 = scalar_lea.sflag [#allocation5], %s273_s0 }
  0x47   : > { %2894 = dma.done.wait (%p2993_p4), %s274_s25, 768  }
  0x48   : > { %2896 = vsyncadd (%p2993_p4), %s274_s25, 4294966528 }
  0x49   : > { %2898 = dma.done.wait (%p44_p1), [#allocation5], 256  }
  0x4a   : > { %2900 = vsyncadd (%p44_p1), [#allocation5], 4294967040 }
  0x4b   : > { %2902 = dma.done.wait (%p44_p1), [#allocation8], 256  }
  0x4c   : > { %2904 = vsyncadd (%p44_p1), [#allocation8], 4294967040  ;;  %v3103_v0 = vld [vmem:[#allocation7 + $0x8] sm:$0xff]  ;;  %v3105_v1 = vld [vmem:[#allocation7] sm:$0xff]  ;;  %vm403_vm0 = vcmask 130048   ;;  %s2925_s23 = smov 16  }
  0x4d   : > { %v334_v2 = vld [vmem:[%s3082_s14 + $0x10] sm:$0xff]  ;;  %2601 = vmatpush.msra.mxu2 %v3103_v0  ;;  %v402_v4 = vpack.c.bf16 %v3103_v0, %v3105_v1  ;;  %v332_v5 = vld [vmem:[%s3082_s14] sm:$0xff]  ;;  %v333_v6 = vld [vmem:[%s3082_s14 + $0x8] sm:$0xff]  ;;  %2602 = vmatpush.msra.mxu3 %v3103_v0  ;;  %s2926_s27 = smov 80   ;;  %s2927_s9 = smov 32   ;;  %vm996_vm1 = vcmask 1040384  }
  0x4e   : > { %v3109_v3 = vmul.f32 0.003921569, %v334_v2  ;;  %v3116_v7 = vmul.f32 0.003921569, %v332_v5  ;;  %v3118_v8 = vmul.f32 0.003921569, %v333_v6 }
  0x4f   : > { %v335_v9 = vld [vmem:[%s3082_s14 + $0x18] sm:$0xff]  ;;  %2603 = vmatpush.msra.mxu2 %v3105_v1  ;;  %429 = vmatpush.bf16.msra.mxu0 %v402_v4  ;;  %v336_v18 = vld [vmem:[%s3082_s14 + $0x20] sm:$0xff]  ;;  %v337_v25 = vld [vmem:[%s3082_s14 + $0x28] sm:$0xff]  ;;  %s2928_s26 = smov 64   ;;  %s2929_s18 = smov 48   ;;  %vm1134_vm2 = vcmask 1046528  }
  0x50   : > { %v549_v10 = vmul.f32 %v3109_v3, %v3109_v3  ;;  %v360_v11 = vpack.c.bf16 %v3116_v7, %v3116_v7  ;;  %v361_v12 = vpack.c.bf16 %v3118_v8, %v3118_v8  ;;  %2604 = vmatpush.msra.mxu3 %v3105_v1  ;;  %2600 = vmatpush.bf16.msra.mxu1 %v402_v4  ;;  %v3130_v13 = vmul.f32 0.003921569, %v335_v9  ;;  %v338_v29 = vld [vmem:[%s3089_s8] sm:$0xff]  ;;  %v343_v35 = vld [vmem:[%s3089_s8 + $0x28] sm:$0xff]  ;;  %v340_v50 = vld [vmem:[%s3089_s8 + $0x10] sm:$0xff]  ;;  %s2930_s11 = smov 112  }
  0x51   : > { %v3137_v19 = vmul.f32 0.003921569, %v336_v18  ;;  %v362_v20 = vpack.c.bf16 %v3109_v3, %v3109_v3  ;;  %v3147_v26 = vmul.f32 0.003921569, %v337_v25  ;;  %v3154_v30 = vmul.f32 0.003921569, %v338_v29 }
  0x52   : > { %2566 = vmatmul.msk.f32.vlgmr.msra.gmra.mxu2 %vm403_vm0, %v549_v10  ;;  %v374_v14 = vunpack.c.l.b16 %v360_v11  ;;  %v375_v15 = vunpack.c.l.b16 %v361_v12  ;;  %v550_v17 = vmul.f32 %v3130_v13, %v3130_v13  ;;  %v363_v21 = vpack.c.bf16 %v3130_v13, %v3130_v13  ;;  %v342_v31 = vld [vmem:[%s3089_s8 + $0x20] sm:$0xff]  ;;  %v339_v40 = vld [vmem:[%s3089_s8 + $0x8] sm:$0xff]  ;;  %v341_v58 = vld [vmem:[%s3089_s8 + $0x18] sm:$0xff]  ;;  %s2931_s13 = smov 1   ;;  %s2932_s28 = smov 127  }
  0x53   : > { %4515 = vst [vmem:[#allocation13_spill] sm:$0xff] %v3137_v19  ;;  %v551_v22 = vmul.f32 %v3137_v19, %v3137_v19  ;;  %v379_v23 = vunpack.c.l.b16 %v362_v20  ;;  %v552_v28 = vmul.f32 %v3147_v26, %v3147_v26  ;;  %v364_v32 = vpack.c.bf16 %v3137_v19, %v3137_v19  ;;  %s2933_s30 = smov 96   ;;  %p323_p1 = scmp.lt.s32.totalorder %s2985_s22, 1 }
  0x54   : > { %v376_v16 = vpack.c.b16 %v375_v15, %v374_v14  ;;  %v380_v24 = vunpack.c.l.b16 %v363_v21  ;;  %4516 = vst [vmem:[#allocation14_spill] sm:$0xff] %v3147_v26  ;;  %v365_v33 = vpack.c.bf16 %v3147_v26, %v3147_v26  ;;  %v3161_v34 = vmul.f32 0.003921569, %v342_v31 }
  0x55   : > { %v3164_v36 = vmul.f32 0.003921569, %v343_v35  ;;  %v553_v37 = vmul.f32 %v3154_v30, %v3154_v30  ;;  %v384_v38 = vunpack.c.l.b16 %v364_v32  ;;  %v3176_v45 = vmul.f32 0.003921569, %v339_v40  ;;  %s4605_s22 = smov (!%p323_p1, %s2985_s22), 1 }
  0x56   : > { %2557 = vmatmul.msk.bf16.vlgmr.msra.gmra.mxu0 %vm403_vm0, %v376_v16  ;;  %v381_v27 = vpack.c.b16 %v380_v24, %v379_v23  ;;  %4517 = vst [vmem:[#allocation15_spill] sm:$0xff] %v3161_v34  ;;  %v385_v39 = vunpack.c.l.b16 %v365_v33  ;;  %v370_v41 = vpack.c.bf16 %v3161_v34, %v3161_v34  ;;  %v559_v51 = vmul.f32 %v3154_v30, %v3116_v7  ;;  %s2555_s15 = sshll.u32 %s4605_s22, 3 }
  0x57   : > { %4518 = vst [vmem:[#allocation16_spill] sm:$0xff] %v3164_v36  ;;  %v371_v42 = vpack.c.bf16 %v3164_v36, %v3164_v36  ;;  %v558_v43 = vmul.f32 %v3164_v36, %v3164_v36  ;;  %v554_v49 = vmul.f32 %v3176_v45, %v3176_v45  ;;  %v3187_v52 = vmul.f32 0.003921569, %v340_v50  ;;  %s326_s0 = scalar_lea.vmem %s4457_s4, %s2555_s15 }
  0x58   : > { %v399_v44 = vunpack.c.l.b16 %v370_v41  ;;  %v386_v47 = vpack.c.b16 %v385_v39, %v384_v38  ;;  %v366_v53 = vpack.c.bf16 %v3154_v30, %v3154_v30  ;;  %v367_v54 = vpack.c.bf16 %v3176_v45, %v3176_v45 }
  0x59   : > { %v400_v46 = vunpack.c.l.b16 %v371_v42  ;;  %2575 = vmatmul.msk.f32.vlgmr.msra.gmra.mxu3 %vm403_vm0, %v558_v43  ;;  %v555_v55 = vmul.f32 %v3187_v52, %v3187_v52  ;;  %v560_v59 = vmul.f32 %v3176_v45, %v3118_v8  ;;  %v3200_v60 = vmul.f32 0.003921569, %v341_v58 }
  0x5a   : > { %2567 = vmatmul.msk.f32.gmra.mxu2 %vm403_vm0, %v550_v17  ;;  %v389_v56 = vunpack.c.l.b16 %v366_v53  ;;  %v390_v57 = vunpack.c.l.b16 %v367_v54  ;;  %v561_v63 = vmul.f32 %v3187_v52, %v3109_v3  ;;  %v368_v2 = vpack.c.bf16 %v3187_v52, %v3187_v52 }
  0x5b   : > { %v401_v48 = vpack.c.b16 %v400_v46, %v399_v44  ;;  %v556_v62 = vmul.f32 %v3200_v60, %v3200_v60  ;;  %v369_v4 = vpack.c.bf16 %v3200_v60, %v3200_v60  ;;  %v557_v5 = vmul.f32 %v3161_v34, %v3161_v34 }
  0x5c   : > { %v391_v61 = vpack.c.b16 %v390_v57, %v389_v56  ;;  %v394_v6 = vunpack.c.l.b16 %v368_v2  ;;  %v562_v10 = vmul.f32 %v3200_v60, %v3130_v13  ;;  %vm516_vm3 = vcmask 261120  }
  0x5d   : > { %2562 = vmatmul.msk.bf16.vlgmr.msra.gmra.mxu1 %vm403_vm0, %v401_v48  ;;  %v395_v9 = vunpack.c.l.b16 %v369_v4  ;;  %vm519_vm4 = vcmask 392192   ;;  %vm1010_vm5 = vcmask 7168   ;;  %vm522_vm6 = vcmask 523264  }
  0x5e   : > { %vm525_vm7 = vcmask 654336   ;;  %vm1051_vm8 = vcmask 121856   ;;  %vm756_vm9 = vcmask 785408   ;;  %vm759_vm10 = vcmask 916480  }
  0x5f   : > { %v396_v11 = vpack.c.b16 %v395_v9, %v394_v6 }
  0x61   : > { %2576 = vmatmul.msk.f32.gmra.mxu3 %vm403_vm0, %v559_v51 }
  0x62   : > { %2568 = vmatmul.msk.f32.gmra.mxu2 %vm403_vm0, %v551_v22 }
  0x66   : > { %2558 = vmatmul.msk.bf16.gmra.mxu0 %vm403_vm0, %v381_v27 }
  0x69   : > { %2577 = vmatmul.msk.f32.gmra.mxu3 %vm403_vm0, %v560_v59 }
  0x6a   : > { %2569 = vmatmul.msk.f32.gmra.mxu2 %vm403_vm0, %v552_v28 }
  0x71   : > { %2578 = vmatmul.msk.f32.gmra.mxu3 %vm403_vm0, %v561_v63 }
  0x72   : > { %2570 = vmatmul.msk.f32.gmra.mxu2 %vm403_vm0, %v553_v37 }
  0x76   : > { %2559 = vmatmul.msk.bf16.gmra.mxu0 %vm403_vm0, %v386_v47 }
  0x79   : > { %2579 = vmatmul.msk.f32.gmra.mxu3 %vm403_vm0, %v562_v10 }
  0x7a   : > { %2571 = vmatmul.msk.f32.gmra.mxu2 %vm403_vm0, %v554_v49 }
  0x82   : > { %2572 = vmatmul.msk.f32.gmra.mxu2 %vm403_vm0, %v555_v55 }
  0x86   : > { %2560 = vmatmul.msk.bf16.gmra.mxu0 %vm403_vm0, %v391_v61 }
  0x8a   : > { %2573 = vmatmul.msk.f32.gmra.mxu2 %vm403_vm0, %v556_v62 }
  0x92   : > { %2574 = vmatmul.msk.f32.gmra.mxu2 %vm403_vm0, %v557_v5 }
  0x96   : > { %2561 = vmatmul.msk.bf16.gmra.mxu0 %vm403_vm0, %v396_v11  ;;  %v970_v11 = vmul.f32 2.0, %v3116_v7 }
  0xd3   : > { %v431_v12 = vpop.f32.mrf.mxu0 }
  0xd4   : > { %v461_v15 = vpack.c.bf16 %v431_v12, %v431_v12 }
  0xd5   : > { %v642_v14 = vpop.f32.mrf.mxu2 }
  0xd6   : > { %v3221_v20 = vunpack.c.l.b16 %v461_v15  ;;  %v3239_v15 = vadd.f32 -1.0, %v970_v11 }
  0xda   : > { %v456_v35 = vpop.f32.mrf.mxu1 }
  0xdb   : > { %v433_v16 = vpop.f32.mrf.mxu0  ;;  %v471_v39 = vpack.c.bf16 %v456_v35, %v456_v35 }
  0xdc   : > { %v462_v17 = vpack.c.bf16 %v433_v16, %v433_v16  ;;  %v669_v40 = vpop.f32.mrf.mxu3 }
  0xdd   : > { %v645_v18 = vpop.f32.mrf.mxu2  ;;  %v508_v44 = vunpack.c.l.b16 %v471_v39 }
  0xde   : > { %v3223_v21 = vunpack.c.l.b16 %v462_v17  ;;  %v2700_v58 = vpack.i.bf16 %v642_v14, %v645_v18  ;;  %v971_v17 = vmul.f32 2.0, %v3118_v8 }
  0xe0   : > { %v477_v22 = vpack.c.b16 %v3223_v21, %v3221_v20  ;;  %v344_v21 = vld [vmem:[#allocation6] sm:$0xff] }
  0xe2   : > { %v458_v42 = vpop.f32.mrf.mxu1 }
  0xe3   : > { %v436_v23 = vpop.f32.mrf.mxu0  ;;  %v472_v46 = vpack.c.bf16 %v458_v42, %v458_v42 }
  0xe4   : > { %v463_v25 = vpack.c.bf16 %v436_v23, %v436_v23  ;;  %v3231_v53 = vpop.f32.mrf.mxu3 }
  0xe5   : > { %v648_v24 = vpop.f32.mrf.mxu2  ;;  %v509_v49 = vunpack.c.l.b16 %v472_v46 }
  0xe6   : > { %v480_v31 = vunpack.c.l.b16 %v463_v25  ;;  %v983_v25 = vmul.f32 2.0, %v3176_v45 }
  0xe7   : > { %v510_v54 = vpack.c.b16 %v509_v49, %v508_v44 }
  0xe8   : > { %v3251_v35 = vadd.f32 -1.0, %v983_v25 }
  0xe9   : > { %511 = vrot.lane.b32.xlu2 %v510_v54, %s2926_s27 }
  0xeb   : > { %v438_v27 = vpop.f32.mrf.mxu0 }
  0xec   : > { %v464_v28 = vpack.c.bf16 %v438_v27, %v438_v27  ;;  %v675_v61 = vpop.f32.mrf.mxu3  ;;  %v997_v27 = vrot.slane %v3239_v15, 7 }
  0xed   : > { %v651_v29 = vpop.f32.mrf.mxu2 }
  0xee   : > { %v481_v32 = vunpack.c.l.b16 %v464_v28  ;;  %v2705_v59 = vpack.i.bf16 %v648_v24, %v651_v29  ;;  %v982_v24 = vmul.f32 2.0, %v3154_v30  ;;  %v3246_v29 = vadd.f32 -1.0, %v971_v17 }
  0xef   : > { %v3254_v30 = vsel %vm996_vm1, 0.0, %v997_v27 }
  0xf0   : > { %v482_v33 = vpack.c.b16 %v481_v32, %v480_v31  ;;  %v998_v45 = vrot.slane %v3246_v29, 7  ;;  %v1136_v54 = vrot.slane %v3246_v29, 1 }
  0xf1   : > { %2701 = vrot.lane.b32.xlu2 %v2700_v58, %s2925_s23  ;;  %v984_v58 = vmul.f32 2.0, %v3187_v52 }
  0xf2   : > { %483 = vrot.lane.b32.xlu0 %v482_v33, %s2925_s23  ;;  %v3249_v33 = vadd.f32 -1.0, %v982_v24  ;;  %v3262_v44 = vsel %vm996_vm1, %v997_v27, %v998_v45  ;;  %v986_v45 = vmul.f32 2.0, %v3161_v34 }
  0xf3   : > { %v441_v37 = vpop.f32.mrf.mxu0 }
  0xf4   : > { %v465_v41 = vpack.c.bf16 %v441_v37, %v441_v37  ;;  %v678_v10 = vpop.f32.mrf.mxu3  ;;  %v1632_v42 = vrot.slane %v3249_v33, 7 }
  0xf5   : > { %v3227_v38 = vpop.f32.mrf.mxu2 }
  0xf6   : > { %v487_v50 = vunpack.c.l.b16 %v465_v41  ;;  %v3275_v49 = vsel %vm996_vm1, 0.0, %v1632_v42 }
  0xfb   : > { %v443_v43 = vpop.f32.mrf.mxu0 }
  0xfc   : > { %v466_v47 = vpack.c.bf16 %v443_v43, %v443_v43  ;;  %v681_v23 = vpop.f32.mrf.mxu3  ;;  %v1633_v43 = vrot.slane %v3251_v35, 7 }
  0xfd   : > { %v3229_v48 = vpop.f32.mrf.mxu2  ;;  %v2730_v28 = vpack.i.bf16 %v678_v10, %v681_v23 }
  0xfe   : > { %v488_v51 = vunpack.c.l.b16 %v466_v47  ;;  %v3268_v46 = vsel %vm996_vm1, %v1632_v42, %v1633_v43  ;;  %v2710_v47 = vpack.i.bf16 %v3227_v38, %v3229_v48  ;;  %v1768_v38 = vrot.slane %v3251_v35, 1 }
  0xff   : > { %v1767_v48 = vrot.slane %v3249_v33, 1  ;;  %v3446_v20 = vmul.f32 0.07610377, %v3268_v46 }
 0x100   : > { %v489_v55 = vpack.c.b16 %v488_v51, %v487_v50  ;;  %v2725_v50 = vpack.i.bf16 %v3231_v53, %v675_v61  ;;  %v972_v53 = vmul.f32 2.0, %v3109_v3 }
 0x101   : > { %v3303_v51 = vsel %vm1134_vm2, %v1767_v48, %v1768_v38 }
 0x102   : > { %490 = vrot.lane.b32.xlu0 %v489_v55, %s2927_s9  ;;  %4519 = vst [vmem:[#allocation17_spill] sm:$0xff] %v3303_v51  ;;  %v3313_v55 = vadd.f32 -1.0, %v972_v53 }
 0x103   : > { %v446_v56 = vpop.f32.mrf.mxu0 }
 0x104   : > { %v467_v62 = vpack.c.bf16 %v446_v56, %v446_v56  ;;  %4520 = vst [vmem:[#allocation18_spill] sm:$0xff] %v3313_v55  ;;  %v3316_v56 = vsel %vm1134_vm2, %v1136_v54, 0.0  ;;  %v1208_v3 = vrot.slane %v3313_v55, 7 }
 0x105   : > { %v660_v57 = vpop.f32.mrf.mxu2 }
 0x106   : > { %v494_v6 = vunpack.c.l.b16 %v467_v62  ;;  %v3332_v62 = vsel %vm996_vm1, 0.0, %v1208_v3 }
 0x107   : > { %4522 = vst [vmem:[#allocation20_spill] sm:$0xff] %v3332_v62 }
 0x10a   : > { %2706 = vrot.lane.b32.xlu0 %v2705_v59, %s2927_s9  ;;  %v985_v59 = vmul.f32 2.0, %v3200_v60 }
 0x10b   : > { %v448_v63 = vpop.f32.mrf.mxu0 }
 0x10c   : > { %v468_v2 = vpack.c.bf16 %v448_v63, %v448_v63  ;;  %v3338_v63 = vadd.f32 -1.0, %v984_v58  ;;  %v3340_v52 = vadd.f32 -1.0, %v985_v59  ;;  %v3439_v58 = vmul.f32 0.044386324, %v3254_v30 }
 0x10d   : > { %v663_v4 = vpop.f32.mrf.mxu2  ;;  %v3442_v59 = vmul.f32 0.033367433, %v3254_v30 }
 0x10e   : > { %v2715_v5 = vpack.i.bf16 %v660_v57, %v663_v4  ;;  %v495_v9 = vunpack.c.l.b16 %v468_v2  ;;  %v1135_v57 = vrot.slane %v3239_v15, 1  ;;  %4523 = vst [vmem:[#allocation21_spill] sm:$0xff] %v3338_v63  ;;  %v3347_v2 = vsel %vm1134_vm2, %v1768_v38, 0.0 }
 0x10f   : > { %4524 = vst [vmem:[#allocation22_spill] sm:$0xff] %v3340_v52  ;;  %v1840_v4 = vrot.slane %v3338_v63, 7  ;;  %v3421_v38 = vadd.f32 -1.0, %v986_v45  ;;  %v1034_v45 = vmul.f32 0.012167501, %v3262_v44 }
 0x110   : > { %v496_v12 = vpack.c.b16 %v495_v9, %v494_v6  ;;  %2716 = vrot.lane.b32.xlu2 %v2715_v5, %s2928_s26  ;;  %v3329_v61 = vsel %vm1134_vm2, %v1135_v57, %v1136_v54  ;;  %4525 = vst [vmem:[#allocation23_spill] sm:$0xff] %v3347_v2  ;;  %v1841_v5 = vrot.slane %v3340_v52, 7  ;;  %v973_v9 = vmul.f32 2.0, %v3130_v13 }
 0x111   : > { %4521 = vst [vmem:[#allocation19_spill] sm:$0xff] %v3329_v61  ;;  %v3427_v54 = vmul.f32 0.07610377, %v3254_v30 }
 0x112   : > { %497 = vrot.lane.b32.xlu1 %v496_v12, %s2929_s18  ;;  %v3352_v6 = vsel %vm996_vm1, %v1840_v4, %v1841_v5  ;;  %v3361_v11 = vadd.f32 -1.0, %v973_v9  ;;  %v3366_v12 = vsel %vm996_vm1, 0.0, %v1840_v4  ;;  %4536 = vst [vmem:[#allocation34_spill] sm:$0xff] %v3421_v38 }
 0x113   : > { %v451_v14 = vpop.f32.mrf.mxu0  ;;  %4526 = vst [vmem:[#allocation24_spill] sm:$0xff] %v3352_v6 }
 0x114   : > { %v469_v31 = vpack.c.bf16 %v451_v14, %v451_v14  ;;  %4528 = vst [vmem:[#allocation26_spill] sm:$0xff] %v3361_v11  ;;  %v1209_v14 = vrot.slane %v3361_v11, 7  ;;  %v1344_v48 = vrot.slane %v3361_v11, 1 }
 0x115   : > { %v666_v16 = vpop.f32.mrf.mxu2  ;;  %4529 = vst [vmem:[#allocation27_spill] sm:$0xff] %v3366_v12 }
 0x116   : > { %v2720_v18 = vpack.i.bf16 %v666_v16, %v669_v40  ;;  %v501_v39 = vunpack.c.l.b16 %v469_v31  ;;  %v3378_v17 = vsel %vm996_vm1, %v1208_v3, %v1209_v14  ;;  %v1976_v31 = vrot.slane %v3340_v52, 1 }
 0x117   : > { %4531 = vst [vmem:[#allocation29_spill] sm:$0xff] %v3378_v17  ;;  %v3436_v3 = vmul.f32 0.012167501, %v3254_v30  ;;  %v3449_v9 = vsel %vm1134_vm2, %v1344_v48, 0.0  ;;  %v3452_v14 = vmul.f32 0.012167501, %v3268_v46 }
 0x118   : > { %2721 = vrot.lane.b32.xlu0 %v2720_v18, %s2926_s27  ;;  %2731 = vrot.lane.b32.xlu2 %v2730_v28, %s2930_s11  ;;  %v974_v28 = vmul.f32 2.0, %v3137_v19  ;;  %4538 = vst [vmem:[#allocation36_spill] sm:$0xff] %v3449_v9 }
 0x11a   : > { %v3417_v42 = vadd.f32 -1.0, %v974_v28  ;;  %v1343_v28 = vrot.slane %v3313_v55, 1 }
 0x11b   : > { %v453_v32 = vpop.f32.mrf.mxu0 }
 0x11c   : > { %v470_v37 = vpack.c.bf16 %v453_v32, %v453_v32  ;;  %v1975_v32 = vrot.slane %v3338_v63, 1 }
 0x11e   : > { %v502_v40 = vunpack.c.l.b16 %v470_v37  ;;  %v975_v37 = vmul.f32 2.0, %v3147_v26 }
 0x120   : > { %1004 = vrot.lane.b32.xlu0 %v3254_v30, %s2931_s13  ;;  %v503_v41 = vpack.c.b16 %v502_v40, %v501_v39  ;;  %1006 = vrot.lane.b32.xlu2 %v3262_v44, %s2931_s13  ;;  %v987_v40 = vmul.f32 2.0, %v3164_v36 }
 0x122   : > { %504 = vrot.lane.b32.xlu1 %v503_v41, %s2928_s26  ;;  %v3413_v41 = vsel %vm1134_vm2, %v1975_v32, %v1976_v31  ;;  %v3424_v53 = vadd.f32 -1.0, %v987_v40  ;;  %v1030_v32 = vmul.f32 0.07610377, %v3262_v44  ;;  %v1038_v40 = vmul.f32 0.044386324, %v3262_v44  ;;  %s330_s26 = scalar_lea.vmem %s4458_s5, %s2555_s15 }
 0x123   : > { %4535 = vst [vmem:[#allocation33_spill] sm:$0xff] %v3413_v41 }
 0x124   : > { %4537 = vst [vmem:[#allocation35_spill] sm:$0xff] %v3424_v53 }
 0x128   : > { %1641 = vrot.lane.b32.xlu0 %v3268_v46, %s2931_s13  ;;  %1679 = vrot.lane.b32.xlu2 %v3275_v49, %s2932_s28 }
 0x12a   : > { %2711 = vrot.lane.b32.xlu1 %v2710_v47, %s2929_s18 }
 0x130   : > { %1045 = vrot.lane.b32.xlu0 %v3254_v30, %s2932_s28  ;;  %1072 = vrot.lane.b32.xlu2 %v3246_v29, %s2931_s13 }
 0x132   : > { %2726 = vrot.lane.b32.xlu1 %v2725_v50, %s2933_s30  ;;  %v3419_v50 = vadd.f32 -1.0, %v975_v37 }
 0x138   : > { %1047 = vrot.lane.b32.xlu0 %v3262_v44, %s2932_s28  ;;  %1110 = vrot.lane.b32.xlu2 %v3239_v15, %s2932_s28 }
 0x13a   : > { %1639 = vrot.lane.b32.xlu1 %v3275_v49, %s2931_s13 }
 0x140   : > { %1070 = vrot.lane.b32.xlu0 %v3239_v15, %s2931_s13  ;;  %1745 = vrot.lane.b32.xlu2 %v3251_v35, %s2932_s28 }
 0x142   : > { %1681 = vrot.lane.b32.xlu1 %v3268_v46, %s2932_s28 }
 0x143   : > { %v3342_v60 = vpop.permute.xlu2 %511 }
 0x148   : > { %1705 = vrot.lane.b32.xlu0 %v3251_v35, %s2931_s13  ;;  %1774 = vrot.lane.b32.xlu2 %v3303_v51, %s2931_s13 }
 0x14a   : > { %1703 = vrot.lane.b32.xlu1 %v3249_v33, %s2931_s13 }
 0x14b   : > { %v3359_v10 = vpop.permute.xlu2 %2701 }
 0x14c   : > { %4527 = vst [vmem:[#allocation25_spill] sm:$0xff] %v3359_v10 }
 0x150   : > { %1743 = vrot.lane.b32.xlu0 %v3249_v33, %s2932_s28  ;;  %1184 = vrot.lane.b32.xlu2 %v3316_v56, %s2932_s28 }
 0x152   : > { %1112 = vrot.lane.b32.xlu1 %v3246_v29, %s2932_s28 }
 0x158   : > { %1144 = vrot.lane.b32.xlu0 %v3316_v56, %s2931_s13  ;;  %1215 = vrot.lane.b32.xlu2 %v3332_v62, %s2931_s13 }
 0x15a   : > { %1142 = vrot.lane.b32.xlu1 %v3329_v61, %s2931_s13 }
 0x160   : > { %1182 = vrot.lane.b32.xlu0 %v3329_v61, %s2932_s28  ;;  %1849 = vrot.lane.b32.xlu2 %v3352_v6, %s2931_s13 }
 0x162   : > { %1776 = vrot.lane.b32.xlu1 %v3347_v2, %s2931_s13 }
 0x164   : > { %v484_v13 = vpop.permute.xlu0 %483 }
 0x165   : > { %v515_v57 = vsel %vm403_vm0, %v477_v22, %v484_v13  ;;  %v345_v22 = vld [vmem:[#allocation6 + $0x8] sm:$0xff]  ;;  %v3455_v13 = vmul.f32 0.044386324, %v3268_v46 }
 0x166   : > { %v529_v37 = vpack.c.bf16 %v345_v22, %v344_v21 }
 0x168   : > { %1816 = vrot.lane.b32.xlu0 %v3347_v2, %s2932_s28  ;;  %1887 = vrot.lane.b32.xlu2 %v3366_v12, %s2932_s28 }
 0x16a   : > { %1814 = vrot.lane.b32.xlu1 %v3303_v51, %s2932_s28  ;;  %v3373_v16 = vpop.permute.xlu2 %2716 }
 0x16b   : > { %4530 = vst [vmem:[#allocation28_spill] sm:$0xff] %v3373_v16 }
 0x170   : > { %1847 = vrot.lane.b32.xlu0 %v3366_v12, %s2931_s13  ;;  %1281 = vrot.lane.b32.xlu2 %v3361_v11, %s2931_s13 }
 0x172   : > { %1217 = vrot.lane.b32.xlu1 %v3378_v17, %s2931_s13  ;;  %v3384_v18 = vpop.permute.xlu2 %2731 }
 0x173   : > { %4532 = vst [vmem:[#allocation30_spill] sm:$0xff] %v3384_v18 }
 0x174   : > { %v491_v23 = vpop.permute.xlu0 %490 }
 0x175   : > { %v518_v4 = vsel %vm516_vm3, %v515_v57, %v491_v23  ;;  %v3461_v23 = vmul.f32 0.033367433, %v3268_v46  ;;  %v1042_v46 = vmul.f32 0.033367433, %v3262_v44  ;;  %v3485_v44 = vsel %vm1134_vm2, %v1343_v28, %v1344_v48 }
 0x176   : > { %4540 = vst [vmem:[#allocation38_spill] sm:$0xff] %v3485_v44 }
 0x178   : > { %1257 = vrot.lane.b32.xlu0 %v3378_v17, %s2932_s28  ;;  %1319 = vrot.lane.b32.xlu2 %v3313_v55, %s2932_s28  ;;  %v3542_v17 = vmul.f32 -0.16138978, %v3239_v15 }
 0x17a   : > { %1255 = vrot.lane.b32.xlu1 %v3332_v62, %s2932_s28  ;;  %v1007_v24 = vpop.permute.xlu2 %1006 }
 0x17b   : > { %v1012_v30 = vsel %vm1010_vm5, 0.0, %v1007_v24 }
 0x17c   : > { %v3394_v25 = vpop.permute.xlu0 %2706  ;;  %v1018_v16 = vmul.f32 0.04001572, %v1012_v30  ;;  %v1022_v21 = vmul.f32 0.0978738, %v1012_v30  ;;  %v1026_v22 = vmul.f32 0.22408932, %v1012_v30 }
 0x17d   : > { %4533 = vst [vmem:[#allocation31_spill] sm:$0xff] %v3394_v25  ;;  %v1417_v25 = vrot.slane %v3419_v50, 7 }
 0x17e   : > { %v3501_v48 = vadd.f32 %v1034_v45, %v1018_v16  ;;  %v3520_v45 = vadd.f32 %v1042_v46, %v1026_v22  ;;  %v2048_v46 = vrot.slane %v3421_v38, 7 }
 0x180   : > { %1279 = vrot.lane.b32.xlu0 %v3313_v55, %s2931_s13  ;;  %1953 = vrot.lane.b32.xlu2 %v3340_v52, %s2932_s28  ;;  %v3478_v55 = vsel %vm1134_vm2, %v1976_v31, 0.0  ;;  %v4472_v31 = vrot.slane %v3417_v42, 7 }
 0x181   : > { %4539 = vst [vmem:[#allocation37_spill] sm:$0xff] %v3478_v55 }
 0x182   : > { %1889 = vrot.lane.b32.xlu1 %v3352_v6, %s2932_s28  ;;  %v1680_v27 = vpop.permute.xlu2 %1679  ;;  %v3518_v16 = vsel %vm996_vm1, 0.0, %v4472_v31  ;;  %v3534_v31 = vmul.f32 0.033367433, %v3275_v49 }
 0x183   : > { %v1685_v57 = vsel %vm1051_vm8, %v1680_v27, 0.0  ;;  %4541 = vst [vmem:[#allocation39_spill] sm:$0xff] %v3518_v16 }
 0x184   : > { %v498_v43 = vpop.permute.xlu1 %497 }
 0x185   : > { %v521_v24 = vsel %vm519_vm4, %v518_v4, %v498_v43  ;;  %v3480_v43 = vmul.f32 0.22697546, %v1685_v57  ;;  %v3491_v4 = vmul.f32 -0.018718384, %v1685_v57 }
 0x188   : > { %1913 = vrot.lane.b32.xlu0 %v3340_v52, %s2931_s13  ;;  %1982 = vrot.lane.b32.xlu2 %v3413_v41, %s2931_s13 }
 0x18a   : > { %v3407_v39 = vpop.permute.xlu0 %2721  ;;  %1911 = vrot.lane.b32.xlu1 %v3338_v63, %s2931_s13  ;;  %v1073_v47 = vpop.permute.xlu2 %1072 }
 0x18b   : > { %4534 = vst [vmem:[#allocation32_spill] sm:$0xff] %v3407_v39  ;;  %v1014_v39 = vmul.f32 0.17640524, %v1012_v30  ;;  %v1077_v52 = vsel %vm1010_vm5, 0.0, %v1073_v47  ;;  %v3489_v47 = vmul.f32 0.004575852, %v1685_v57 }
 0x18c   : > { %v3503_v28 = vmul.f32 -0.03873268, %v1077_v52 }
 0x190   : > { %1951 = vrot.lane.b32.xlu0 %v3338_v63, %s2932_s28  ;;  %1392 = vrot.lane.b32.xlu2 %v3449_v9, %s2932_s28 }
 0x192   : > { %v1005_v5 = vpop.permute.xlu0 %1004  ;;  %1321 = vrot.lane.b32.xlu1 %v3361_v11, %s2932_s28  ;;  %v1111_v11 = vpop.permute.xlu2 %1110 }
 0x193   : > { %v1011_v6 = vsel %vm1010_vm5, 0.0, %v1005_v5  ;;  %v3493_v5 = vadd.f32 %v1030_v32, %v1014_v39  ;;  %v3513_v39 = vmul.f32 0.07610377, %v3275_v49  ;;  %v1116_v22 = vsel %vm1051_vm8, %v1111_v11, 0.0 }
 0x194   : > { %v505_v18 = vpop.permute.xlu1 %504  ;;  %v1013_v30 = vmul.f32 0.17640524, %v1011_v6  ;;  %v1021_v32 = vmul.f32 0.0978738, %v1011_v6  ;;  %v3552_v11 = vmul.f32 0.03869025, %v3239_v15 }
 0x195   : > { %v524_v63 = vsel %vm522_vm6, %v521_v24, %v505_v18  ;;  %v3487_v18 = vmul.f32 -0.14543657, %v1685_v57  ;;  %v1017_v57 = vmul.f32 0.04001572, %v1011_v6  ;;  %v3563_v51 = vmul.f32 -0.08131463, %v1116_v22 }
 0x196   : > { %v527_v27 = vsel %vm525_vm7, %v524_v63, %v3342_v60  ;;  %v3496_v63 = vmul.f32 0.12302907, %v1077_v52  ;;  %v3498_v60 = vmul.f32 0.120237984, %v1077_v52  ;;  %v3565_v2 = vmul.f32 -0.17262825, %v1116_v22 }
 0x197   : > { %540 = vmatpush.bf16.msrb.mxu1 %v527_v27  ;;  %v3505_v27 = vmul.f32 -0.030230274, %v1077_v52  ;;  %v3524_v52 = vmul.f32 0.012167501, %v3275_v49 }
 0x198   : > { %1352 = vrot.lane.b32.xlu0 %v3449_v9, %s2931_s13  ;;  %1423 = vrot.lane.b32.xlu2 %v3518_v16, %s2931_s13  ;;  %v1031_v9 = vadd.f32 %v3427_v54, %v1013_v30  ;;  %v1039_v54 = vadd.f32 %v3439_v58, %v1021_v32  ;;  %v3557_v30 = vmul.f32 -0.06724604, %v1116_v22 }
 0x19a   : > { %v1642_v24 = vpop.permute.xlu0 %1641  ;;  %1350 = vrot.lane.b32.xlu1 %v3485_v44, %s2931_s13  ;;  %2563 = vmatmul.msk.bf16.vlgmr.msrb.gmra.mxu1 %vm403_vm0, %v529_v37  ;;  %v3527_v37 = vmul.f32 0.044386324, %v3275_v49  ;;  %v3549_v49 = vmul.f32 -0.08954666, %v3239_v15 }
 0x19b   : > { %633 = vmatpush.msra.mxu1 %v3103_v0  ;;  %v3510_v0 = vadd.f32 %v1038_v40, %v1022_v21  ;;  %v1025_v40 = vmul.f32 0.22408932, %v1011_v6  ;;  %v1646_v62 = vsel %vm1010_vm5, 0.0, %v1642_v24  ;;  %v1035_v6 = vadd.f32 %v3436_v3, %v1017_v57 }
 0x19c   : > { %v3531_v21 = vpop.permute.xlu1 %2711  ;;  %v3559_v24 = vmul.f32 -0.035955317, %v1116_v22  ;;  %v2049_v3 = vrot.slane %v3424_v53, 7  ;;  %v1648_v12 = vmul.f32 0.17640524, %v1646_v62 }
 0x19d   : > { %634 = vmatpush.msra.mxu1 %v3105_v1  ;;  %4542 = vst [vmem:[#allocation40_spill] sm:$0xff] %v3531_v21  ;;  %v1746_v1 = vpop.permute.xlu2 %1745  ;;  %v3546_v21 = vmul.f32 -0.021274028, %v3239_v15  ;;  %v1043_v57 = vadd.f32 %v3442_v59, %v1025_v40  ;;  %v1652_v15 = vmul.f32 0.04001572, %v1646_v62 }
 0x19e   : > { %v1656_v10 = vmul.f32 0.0978738, %v1646_v62  ;;  %v1660_v38 = vmul.f32 0.22408932, %v1646_v62  ;;  %v3568_v32 = vsel %vm996_vm1, %v2048_v46, %v2049_v3  ;;  %v3574_v53 = vmul.f32 -0.16138978, %v3251_v35 }
 0x19f   : > { %4543 = vst [vmem:[#allocation41_spill] sm:$0xff] %v3568_v32  ;;  %v3577_v59 = vmul.f32 -0.021274028, %v3251_v35  ;;  %v1750_v40 = vsel %vm1051_vm8, %v1746_v1, 0.0  ;;  %v547_v3 = vmul.f32 %v3116_v7, %v3116_v7  ;;  %v3594_v1 = vmul.f32 0.03869025, %v3251_v35 }
 0x1a0   : > { %1390 = vrot.lane.b32.xlu0 %v3485_v44, %s2932_s28  ;;  %4544 = vst [vmem:[#allocation42_spill] sm:$0xff] %v3574_v53  ;;  %2057 = vrot.lane.b32.xlu2 %v3568_v32, %s2931_s13  ;;  %v3588_v53 = vmul.f32 %v3118_v8, %v3118_v8  ;;  %v3606_v32 = vmul.f32 -0.035955317, %v1750_v40  ;;  %v3608_v8 = vmul.f32 -0.08131463, %v1750_v40 }
 0x1a1   : > { %4545 = vst [vmem:[#allocation43_spill] sm:$0xff] %v3577_v59  ;;  %v3591_v59 = vmul.f32 -0.08954666, %v3251_v35  ;;  %v3610_v16 = vmul.f32 -0.17262825, %v1750_v40  ;;  %v3615_v35 = vsel %vm996_vm1, 0.0, %v2048_v46 }
 0x1a2   : > { %v1046_v58 = vpop.permute.xlu0 %1045  ;;  %1984 = vrot.lane.b32.xlu1 %v3478_v55, %s2931_s13  ;;  %4547 = vst [vmem:[#allocation45_spill] sm:$0xff] %v3608_v8 }
 0x1a3   : > { %v1052_v44 = vsel %vm1051_vm8, %v1046_v58, 0.0  ;;  %4548 = vst [vmem:[#allocation46_spill] sm:$0xff] %v3610_v16 }
 0x1a4   : > { %v1054_v22 = vmul.f32 0.22697546, %v1052_v44  ;;  %v1058_v36 = vmul.f32 -0.14543657, %v1052_v44  ;;  %v1062_v62 = vmul.f32 0.004575852, %v1052_v44  ;;  %v3584_v26 = vpop.permute.xlu1 %2726 }
 0x1a5   : > { %v1066_v58 = vmul.f32 -0.018718384, %v1052_v44  ;;  %4546 = vst [vmem:[#allocation44_spill] sm:$0xff] %v3584_v26  ;;  %v1775_v61 = vpop.permute.xlu2 %1774  ;;  %v3602_v44 = vmul.f32 -0.06724604, %v1750_v40 }
 0x1a6   : > { %v3596_v34 = vadd.f32 %v1054_v22, %v1031_v9  ;;  %v3598_v7 = vadd.f32 %v1058_v36, %v1035_v6  ;;  %v3600_v19 = vadd.f32 %v1062_v62, %v1039_v54  ;;  %v3618_v36 = vmul.f32 -0.16138978, %v3249_v33 }
 0x1a7   : > { %v3604_v26 = vadd.f32 %v1066_v58, %v1043_v57  ;;  %v3621_v9 = vmul.f32 -0.021274028, %v3249_v33  ;;  %v1780_v6 = vsel %vm1010_vm5, 0.0, %v1775_v61  ;;  %v4551_v54 = vrot.slane %v3417_v42, 7 }
 0x1a8   : > { %2024 = vrot.lane.b32.xlu0 %v3478_v55, %s2932_s28  ;;  %4549 = vst [vmem:[#allocation47_spill] sm:$0xff] %v3618_v36  ;;  %v3630_v40 = vmul.f32 -0.08954666, %v3249_v33  ;;  %v3633_v22 = vmul.f32 0.03869025, %v3249_v33  ;;  %v3638_v62 = vadd.f32 %v3446_v20, %v1648_v12  ;;  %v3656_v20 = vadd.f32 %v3455_v13, %v1656_v10  ;;  %2095 = vrot.lane.b32.xlu2 %v3615_v35, %s2932_s28 }
 0x1a9   : > { %4550 = vst [vmem:[#allocation48_spill] sm:$0xff] %v3621_v9  ;;  %v3627_v57 = vsel %vm996_vm1, %v4551_v54, %v1417_v25  ;;  %v3635_v46 = vmul.f32 0.11394007, %v1780_v6  ;;  %v3640_v55 = vmul.f32 -0.123482585, %v1780_v6  ;;  %v3647_v25 = vadd.f32 %v3452_v14, %v1652_v15 }
 0x1aa   : > { %4552 = vst [vmem:[#allocation49_spill] sm:$0xff] %v3630_v40  ;;  %v1048_v58 = vpop.permute.xlu0 %1047  ;;  %v3642_v61 = vmul.f32 0.040234163, %v1780_v6  ;;  %v3644_v9 = vmul.f32 -0.068481006, %v1780_v6  ;;  %2022 = vrot.lane.b32.xlu1 %v3413_v41, %s2932_s28  ;;  %2564 = vmatmul.msk.f32.vlgmr.msra.gmra.mxu1 %vm403_vm0, %v547_v3  ;;  %v3661_v14 = vadd.f32 %v3461_v23, %v1660_v38 }
 0x1ab   : > { %4553 = vst [vmem:[#allocation50_spill] sm:$0xff] %v3633_v22  ;;  %v1053_v54 = vsel %vm1051_vm8, %v1048_v58, 0.0  ;;  %v1095_v33 = vmul.f32 -0.16138978, %v3246_v29  ;;  %v1099_v12 = vmul.f32 -0.021274028, %v3246_v29 }
 0x1ac   : > { %4554 = vst [vmem:[#allocation51_spill] sm:$0xff] %v3635_v46  ;;  %v1059_v6 = vmul.f32 -0.14543657, %v1053_v54  ;;  %v1067_v15 = vmul.f32 -0.018718384, %v1053_v54  ;;  %v1640_v58 = vpop.permute.xlu1 %1639 }
 0x1ad   : > { %4555 = vst [vmem:[#allocation52_spill] sm:$0xff] %v3640_v55  ;;  %v1103_v3 = vmul.f32 -0.08954666, %v3246_v29  ;;  %v1107_v41 = vmul.f32 0.03869025, %v3246_v29  ;;  %v3665_v55 = vpop.permute.xlu2 %1184  ;;  %v1645_v22 = vsel %vm1010_vm5, 0.0, %v1640_v58 }
 0x1ae   : > { %4556 = vst [vmem:[#allocation53_spill] sm:$0xff] %v3642_v61  ;;  %v1055_v61 = vmul.f32 0.22697546, %v1053_v54  ;;  %v1061_v13 = vadd.f32 %v1059_v6, %v3501_v48  ;;  %v1069_v40 = vadd.f32 %v1067_v15, %v3520_v45  ;;  %v1647_v38 = vmul.f32 0.17640524, %v1645_v22 }
 0x1af   : > { %4557 = vst [vmem:[#allocation54_spill] sm:$0xff] %v3644_v9  ;;  %v1063_v9 = vmul.f32 0.004575852, %v1053_v54  ;;  %v1651_v23 = vmul.f32 0.04001572, %v1645_v22 }
 0x1b0   : > { %v1057_v10 = vadd.f32 %v1055_v61, %v3493_v5  ;;  %v1655_v54 = vmul.f32 0.0978738, %v1645_v22  ;;  %v1085_v16 = vadd.f32 %v3498_v60, %v1061_v13  ;;  %v1659_v8 = vmul.f32 0.22408932, %v1645_v22  ;;  %2055 = vrot.lane.b32.xlu0 %v3615_v35, %s2931_s13  ;;  %1489 = vrot.lane.b32.xlu2 %v3419_v50, %s2931_s13 }
 0x1b1   : > { %v1065_v46 = vadd.f32 %v1063_v9, %v3510_v0  ;;  %v1093_v5 = vadd.f32 %v3505_v27, %v1069_v40  ;;  %v1665_v48 = vadd.f32 %v3513_v39, %v1647_v38  ;;  %v1669_v0 = vadd.f32 %v3524_v52, %v1651_v23 }
 0x1b2   : > { %v1081_v36 = vadd.f32 %v3496_v63, %v1057_v10  ;;  %v1673_v45 = vadd.f32 %v3527_v37, %v1655_v54  ;;  %v1677_v9 = vadd.f32 %v3534_v31, %v1659_v8  ;;  %v1071_v61 = vpop.permute.xlu0 %1070  ;;  %v3684_v60 = vadd.f32 %v1099_v12, %v1085_v16  ;;  %1425 = vrot.lane.b32.xlu1 %v3627_v57, %s2931_s13 }
 0x1b3   : > { %v1089_v29 = vadd.f32 %v3503_v28, %v1065_v46  ;;  %v1076_v22 = vsel %vm1010_vm5, 0.0, %v1071_v61  ;;  %2565 = vmatmul.msk.f32.gmra.mxu1 %vm403_vm0, %v3588_v53  ;;  %v3694_v27 = vadd.f32 %v3480_v43, %v1665_v48  ;;  %v3697_v31 = vadd.f32 %v3487_v18, %v1669_v0 }
 0x1b4   : > { %v3682_v63 = vadd.f32 %v1095_v33, %v1081_v36  ;;  %v3700_v39 = vadd.f32 %v3489_v47, %v1673_v45  ;;  %v1078_v16 = vmul.f32 0.12302907, %v1076_v22  ;;  %v1082_v52 = vmul.f32 0.120237984, %v1076_v22  ;;  %v1682_v53 = vpop.permute.xlu1 %1681 }
 0x1b5   : > { %v3686_v28 = vadd.f32 %v1103_v3, %v1089_v29  ;;  %v1086_v37 = vmul.f32 -0.03873268, %v1076_v22  ;;  %v3703_v8 = vadd.f32 %v3491_v4, %v1677_v9  ;;  %v1090_v36 = vmul.f32 -0.030230274, %v1076_v22  ;;  %v1216_v12 = vpop.permute.xlu2 %1215  ;;  %v4561_v9 = vld [vmem:[#allocation19_spill] sm:$0xff] }
 0x1b6   : > { %v3707_v40 = vadd.f32 %v1107_v41, %v1093_v5  ;;  %v3710_v43 = vmul.f32 0.14882521, %v3316_v56  ;;  %v3713_v18 = vmul.f32 0.18958892, %v3316_v56  ;;  %v1080_v47 = vadd.f32 %v1078_v16, %v3596_v34  ;;  %v4559_v5 = vld [vmem:[#allocation13_spill] sm:$0xff] }
 0x1b7   : > { %v1084_v46 = vadd.f32 %v1082_v52, %v3598_v7  ;;  %v1088_v4 = vadd.f32 %v1086_v37, %v3600_v19  ;;  %v1686_v33 = vsel %vm1051_vm8, %v1682_v53, 0.0  ;;  %v1092_v6 = vadd.f32 %v1090_v36, %v3604_v26 }
 0x1b8   : > { %v1688_v15 = vmul.f32 0.22697546, %v1686_v33  ;;  %v1692_v41 = vmul.f32 -0.14543657, %v1686_v33  ;;  %v1696_v58 = vmul.f32 0.004575852, %v1686_v33  ;;  %v1096_v3 = vadd.f32 %v3542_v17, %v1080_v47  ;;  %1465 = vrot.lane.b32.xlu0 %v3627_v57, %s2932_s28  ;;  %1527 = vrot.lane.b32.xlu2 %v3417_v42, %s2932_s28 }
 0x1b9   : > { %v1100_v10 = vadd.f32 %v3546_v21, %v1084_v46  ;;  %v1104_v13 = vadd.f32 %v3549_v49, %v1088_v4  ;;  %v1700_v38 = vmul.f32 -0.018718384, %v1686_v33  ;;  %v1108_v19 = vadd.f32 %v3552_v11, %v1092_v6  ;;  %v4562_v4 = vld [vmem:[#allocation42_spill] sm:$0xff]  ;;  %v4563_v33 = vld [vmem:[#allocation43_spill] sm:$0xff] }
 0x1ba   : > { %v1690_v34 = vadd.f32 %v1688_v15, %v3638_v62  ;;  %v1694_v7 = vadd.f32 %v1692_v41, %v3647_v25  ;;  %v1698_v26 = vadd.f32 %v1696_v58, %v3656_v20  ;;  %v3730_v23 = vadd.f32 %v3557_v30, %v1096_v3  ;;  %v1706_v54 = vpop.permute.xlu0 %1705  ;;  %v4558_v25 = vld [vmem:[#allocation39_spill] sm:$0xff] }
 0x1bb   : > { %v3733_v17 = vadd.f32 %v3559_v24, %v1100_v10  ;;  %v3736_v21 = vadd.f32 %v3563_v51, %v1104_v13  ;;  %v1702_v49 = vadd.f32 %v1700_v38, %v3661_v14  ;;  %v3740_v11 = vadd.f32 %v3565_v2, %v1108_v19  ;;  %1463 = vrot.lane.b32.xlu1 %v4558_v25, %s2932_s28  ;;  %v4560_v14 = vld [vmem:[#allocation15_spill] sm:$0xff] }
 0x1bc   : > { %v1710_v62 = vsel %vm1010_vm5, 0.0, %v1706_v54  ;;  %v3746_v30 = vmul.f32 0.11787796, %v3316_v56  ;;  %v3749_v24 = vmul.f32 -0.017992483, %v3316_v56  ;;  %v563_v48 = vmul.f32 %v4560_v14, %v4559_v5  ;;  %v1704_v0 = vpop.permute.xlu1 %1703 }
 0x1bd   : > { %v1712_v20 = vmul.f32 0.12302907, %v1710_v62  ;;  %v1716_v51 = vmul.f32 0.120237984, %v1710_v62  ;;  %v1720_v29 = vmul.f32 -0.03873268, %v1710_v62 }
 0x1be   : > { %v1724_v2 = vmul.f32 -0.030230274, %v1710_v62  ;;  %v3757_v45 = vsel %vm1051_vm8, %v3665_v55, 0.0  ;;  %v3760_v61 = vmul.f32 0.14882521, %v4561_v9  ;;  %v3763_v56 = vsel %vm1010_vm5, 0.0, %v1216_v12  ;;  %2580 = vmatmul.msk.f32.gmra.mxu3 %vm403_vm0, %v563_v48  ;;  %v1850_v12 = vpop.permute.xlu2 %1849 }
 0x1bf   : > { %v1714_v22 = vadd.f32 %v1712_v20, %v1690_v34  ;;  %v1718_v16 = vadd.f32 %v1716_v51, %v1694_v7  ;;  %v1722_v52 = vadd.f32 %v1720_v29, %v1698_v26  ;;  %v1709_v37 = vsel %vm1010_vm5, 0.0, %v1704_v0 }
 0x1c0   : > { %v1726_v36 = vadd.f32 %v1724_v2, %v1702_v49  ;;  %v1711_v53 = vmul.f32 0.12302907, %v1709_v37  ;;  %v1715_v47 = vmul.f32 0.120237984, %v1709_v37  ;;  %v1719_v46 = vmul.f32 -0.03873268, %v1709_v37  ;;  %1487 = vrot.lane.b32.xlu0 %v3417_v42, %s2931_s13 }
 0x1c1   : > { %v1730_v55 = vadd.f32 %v4562_v4, %v1714_v22  ;;  %v1734_v6 = vadd.f32 %v4563_v33, %v1718_v16  ;;  %v1738_v15 = vadd.f32 %v3591_v59, %v1722_v52  ;;  %v1723_v41 = vmul.f32 -0.030230274, %v1709_v37  ;;  %v4564_v59 = vld [vmem:[#allocation45_spill] sm:$0xff]  ;;  %v4565_v49 = vld [vmem:[#allocation46_spill] sm:$0xff]  ;;  %v4572_v16 = vld [vmem:[#allocation16_spill] sm:$0xff] }
 0x1c2   : > { %v1742_v58 = vadd.f32 %v3594_v1, %v1726_v36  ;;  %v1713_v3 = vadd.f32 %v1711_v53, %v3694_v27  ;;  %v1717_v10 = vadd.f32 %v1715_v47, %v3697_v31  ;;  %v1721_v13 = vadd.f32 %v1719_v46, %v3700_v39  ;;  %v1744_v26 = vpop.permute.xlu0 %1743  ;;  %v4566_v27 = vld [vmem:[#allocation47_spill] sm:$0xff]  ;;  %v4567_v31 = vld [vmem:[#allocation48_spill] sm:$0xff]  ;;  %v4568_v39 = vld [vmem:[#allocation49_spill] sm:$0xff] }
 0x1c3   : > { %v3777_v38 = vadd.f32 %v3602_v44, %v1730_v55  ;;  %v3780_v19 = vadd.f32 %v3606_v32, %v1734_v6  ;;  %v3783_v34 = vadd.f32 %v4564_v59, %v1738_v15  ;;  %v1725_v7 = vadd.f32 %v1723_v41, %v3703_v8  ;;  %v4569_v44 = vld [vmem:[#allocation41_spill] sm:$0xff]  ;;  %v4570_v32 = vld [vmem:[#allocation50_spill] sm:$0xff]  ;;  %v4575_v59 = vld [vmem:[#allocation52_spill] sm:$0xff] }
 0x1c4   : > { %v3787_v1 = vadd.f32 %v4565_v49, %v1742_v58  ;;  %v1729_v54 = vadd.f32 %v4566_v27, %v1713_v3  ;;  %v1733_v62 = vadd.f32 %v4567_v31, %v1717_v10  ;;  %v1737_v20 = vadd.f32 %v4568_v39, %v1721_v13  ;;  %2097 = vrot.lane.b32.xlu1 %v4569_v44, %s2932_s28  ;;  %v1113_v0 = vpop.permute.xlu1 %1112  ;;  %v4571_v22 = vld [vmem:[#allocation14_spill] sm:$0xff]  ;;  %v4573_v3 = vld [vmem:[#allocation35_spill] sm:$0xff] }
 0x1c5   : > { %v1741_v51 = vadd.f32 %v4570_v32, %v1725_v7  ;;  %v1749_v29 = vsel %vm1051_vm8, %v1744_v26, 0.0  ;;  %v1191_v5 = vmul.f32 0.001050002, %v3757_v45  ;;  %v1195_v8 = vmul.f32 0.17858705, %v3757_v45  ;;  %v4574_v10 = vld [vmem:[#allocation51_spill] sm:$0xff] }
 0x1c6   : > { %v1751_v14 = vmul.f32 -0.06724604, %v1749_v29  ;;  %v1755_v48 = vmul.f32 -0.035955317, %v1749_v29  ;;  %v1759_v2 = vmul.f32 -0.08131463, %v1749_v29  ;;  %v564_v52 = vmul.f32 %v4572_v16, %v4571_v22  ;;  %v1888_v32 = vpop.permute.xlu2 %1887 }
 0x1c7   : > { %v1763_v37 = vmul.f32 -0.17262825, %v1749_v29  ;;  %v1117_v36 = vsel %vm1051_vm8, %v1113_v0, 0.0  ;;  %v1199_v53 = vmul.f32 0.012691209, %v3757_v45  ;;  %v3803_v47 = vsel %vm1010_vm5, 0.0, %v1850_v12 }
 0x1c8   : > { %v1753_v46 = vadd.f32 %v1751_v14, %v1729_v54  ;;  %v1757_v4 = vadd.f32 %v1755_v48, %v1733_v62  ;;  %v1761_v55 = vadd.f32 %v1759_v2, %v1737_v20  ;;  %v1119_v33 = vmul.f32 -0.06724604, %v1117_v36  ;;  %2581 = vmatmul.msk.f32.gmra.mxu3 %vm403_vm0, %v564_v52  ;;  %2121 = vrot.lane.b32.xlu0 %v4573_v3, %s2931_s13  ;;  %v4576_v12 = vld [vmem:[#allocation53_spill] sm:$0xff]  ;;  %v4577_v27 = vld [vmem:[#allocation54_spill] sm:$0xff] }
 0x1c9   : > { %v1765_v6 = vadd.f32 %v1763_v37, %v1741_v51  ;;  %v1123_v15 = vmul.f32 -0.035955317, %v1117_v36  ;;  %v1127_v41 = vmul.f32 -0.08131463, %v1117_v36  ;;  %v1131_v58 = vmul.f32 -0.17262825, %v1117_v36 }
 0x1ca   : > { %v3809_v13 = vadd.f32 %v4574_v10, %v1753_v46  ;;  %v3812_v7 = vadd.f32 %v4575_v59, %v1757_v4  ;;  %v3815_v26 = vadd.f32 %v4576_v12, %v1761_v55  ;;  %v1121_v49 = vadd.f32 %v1119_v33, %v3682_v63  ;;  %v1145_v20 = vpop.permute.xlu0 %1144  ;;  %v4578_v29 = vld [vmem:[#allocation34_spill] sm:$0xff] }
 0x1cb   : > { %v3819_v54 = vadd.f32 %v4577_v27, %v1765_v6  ;;  %v1125_v31 = vadd.f32 %v1123_v15, %v3684_v60  ;;  %v1129_v62 = vadd.f32 %v1127_v41, %v3686_v28  ;;  %v1133_v39 = vadd.f32 %v1131_v58, %v3707_v40 }
 0x1cc   : > { %v1149_v51 = vsel %vm1010_vm5, 0.0, %v1145_v20  ;;  %2119 = vrot.lane.b32.xlu1 %v4578_v29, %s2931_s13  ;;  %v1203_v14 = vmul.f32 0.040198937, %v3757_v45  ;;  %v1170_v63 = vmul.f32 0.18958892, %v4561_v9  ;;  %v3830_v48 = vsel %vm1051_vm8, %v1888_v32, 0.0  ;;  %v1143_v22 = vpop.permute.xlu1 %1142 }
 0x1cd   : > { %v1151_v2 = vmul.f32 0.11394007, %v1149_v51  ;;  %v1155_v60 = vmul.f32 -0.123482585, %v1149_v51  ;;  %v1159_v0 = vmul.f32 0.040234163, %v1149_v51 }
 0x1ce   : > { %v1163_v28 = vmul.f32 -0.068481006, %v1149_v51  ;;  %v1174_v40 = vmul.f32 0.11787796, %v4561_v9  ;;  %v1178_v16 = vmul.f32 -0.017992483, %v4561_v9 }
 0x1cf   : > { %v1153_v52 = vadd.f32 %v1151_v2, %v1121_v49  ;;  %v1157_v37 = vadd.f32 %v1155_v60, %v1125_v31  ;;  %v1161_v36 = vadd.f32 %v1159_v0, %v1129_v62  ;;  %v1148_v46 = vsel %vm1010_vm5, 0.0, %v1143_v22  ;;  %v4579_v32 = vld [vmem:[#allocation25_spill] sm:$0xff] }
 0x1d0   : > { %v1165_v45 = vadd.f32 %v1163_v28, %v1133_v39  ;;  %v1150_v4 = vmul.f32 0.11394007, %v1148_v46  ;;  %v1154_v55 = vmul.f32 -0.123482585, %v1148_v46  ;;  %v1158_v33 = vmul.f32 0.040234163, %v1148_v46  ;;  %2159 = vrot.lane.b32.xlu0 %v4578_v29, %s2932_s28 }
 0x1d1   : > { %v1169_v6 = vadd.f32 %v3710_v43, %v1153_v52  ;;  %v1173_v15 = vadd.f32 %v3713_v18, %v1157_v37  ;;  %v1177_v41 = vadd.f32 %v3746_v30, %v1161_v36  ;;  %v1162_v58 = vmul.f32 -0.068481006, %v1148_v46 }
 0x1d2   : > { %v1181_v9 = vadd.f32 %v3749_v24, %v1165_v45  ;;  %v1152_v10 = vadd.f32 %v1150_v4, %v3730_v23  ;;  %v1156_v59 = vadd.f32 %v1154_v55, %v3733_v17  ;;  %v1160_v12 = vadd.f32 %v1158_v33, %v3736_v21  ;;  %v1183_v30 = vpop.permute.xlu0 %1182 }
 0x1d3   : > { %v3844_v49 = vadd.f32 %v1191_v5, %v1169_v6  ;;  %v3846_v27 = vadd.f32 %v1195_v8, %v1173_v15  ;;  %v3848_v43 = vadd.f32 %v1199_v53, %v1177_v41  ;;  %v1164_v18 = vadd.f32 %v1162_v58, %v3740_v11  ;;  %v1282_v15 = vpop.permute.xlu2 %1281  ;;  %v4580_v58 = vld [vmem:[#allocation23_spill] sm:$0xff] }
 0x1d4   : > { %v3851_v31 = vadd.f32 %v1203_v14, %v1181_v9  ;;  %v1168_v62 = vadd.f32 %v3760_v61, %v1152_v10  ;;  %v1172_v24 = vadd.f32 %v1170_v63, %v1156_v59  ;;  %v1176_v39 = vadd.f32 %v1174_v40, %v1160_v12  ;;  %1529 = vrot.lane.b32.xlu1 %v3419_v50, %s2932_s28  ;;  %v1777_v20 = vpop.permute.xlu1 %1776 }
 0x1d5   : > { %v1180_v23 = vadd.f32 %v1178_v16, %v1164_v18  ;;  %v1188_v17 = vsel %vm1051_vm8, %v1183_v30, 0.0  ;;  %v1223_v21 = vmul.f32 0.1867558, %v3763_v56  ;;  %v1227_v5 = vmul.f32 -0.09772779, %v3763_v56 }
 0x1d6   : > { %v1190_v8 = vmul.f32 0.001050002, %v1188_v17  ;;  %v1194_v53 = vmul.f32 0.17858705, %v1188_v17  ;;  %v1198_v11 = vmul.f32 0.012691209, %v1188_v17  ;;  %v2704_v51 = vunpack.i.h.bf16 %v4579_v32 }
 0x1d7   : > { %v1202_v14 = vmul.f32 0.040198937, %v1188_v17  ;;  %v1231_v61 = vmul.f32 0.09500884, %v3763_v56  ;;  %v1235_v63 = vmul.f32 -0.01513572, %v3763_v56 }
 0x1d8   : > { %v1192_v2 = vadd.f32 %v1190_v8, %v1168_v62  ;;  %v1196_v60 = vadd.f32 %v1194_v53, %v1172_v24  ;;  %v1200_v0 = vadd.f32 %v1198_v11, %v1176_v39  ;;  %v1781_v28 = vsel %vm1010_vm5, 0.0, %v1777_v20 }
 0x1d9   : > { %v1204_v22 = vadd.f32 %v1202_v14, %v1180_v23  ;;  %v1783_v40 = vmul.f32 0.11394007, %v1781_v28  ;;  %v1787_v16 = vmul.f32 -0.123482585, %v1781_v28  ;;  %v1791_v52 = vmul.f32 0.040234163, %v1781_v28 }
 0x1da   : > { %v3863_v37 = vadd.f32 %v1223_v21, %v1192_v2  ;;  %v3865_v36 = vadd.f32 %v1227_v5, %v1196_v60  ;;  %v3867_v46 = vadd.f32 %v1231_v61, %v1200_v0  ;;  %v1795_v45 = vmul.f32 -0.068481006, %v1781_v28  ;;  %v1817_v6 = vpop.permute.xlu0 %1816 }
 0x1db   : > { %v3869_v4 = vadd.f32 %v1235_v63, %v1204_v22  ;;  %v1785_v56 = vadd.f32 %v1783_v40, %v3777_v38  ;;  %v1789_v55 = vadd.f32 %v1787_v16, %v3780_v19  ;;  %v1793_v33 = vadd.f32 %v1791_v52, %v3783_v34  ;;  %v4581_v63 = vld [vmem:[#allocation17_spill] sm:$0xff] }
 0x1dc   : > { %v1797_v41 = vadd.f32 %v1795_v45, %v3787_v1  ;;  %v1799_v9 = vmul.f32 0.14882521, %v4580_v58  ;;  %v1803_v10 = vmul.f32 0.18958892, %v4580_v58  ;;  %v1807_v59 = vmul.f32 0.11787796, %v4580_v58  ;;  %v1815_v1 = vpop.permute.xlu1 %1814 }
 0x1dd   : > { %v1811_v12 = vmul.f32 -0.017992483, %v4580_v58  ;;  %v1821_v18 = vsel %vm1051_vm8, %v1817_v6, 0.0  ;;  %v1856_v38 = vmul.f32 0.1867558, %v3803_v47  ;;  %v3882_v19 = vsel %vm1010_vm5, 0.0, %v1282_v15 }
 0x1de   : > { %v1801_v34 = vadd.f32 %v1799_v9, %v1785_v56  ;;  %v1805_v30 = vadd.f32 %v1803_v10, %v1789_v55  ;;  %v1809_v62 = vadd.f32 %v1807_v59, %v1793_v33  ;;  %v1823_v24 = vmul.f32 0.001050002, %v1821_v18  ;;  %v1320_v10 = vpop.permute.xlu2 %1319 }
 0x1df   : > { %v1813_v39 = vadd.f32 %v1811_v12, %v1797_v41  ;;  %v1827_v23 = vmul.f32 0.17858705, %v1821_v18  ;;  %v1831_v17 = vmul.f32 0.012691209, %v1821_v18  ;;  %v1835_v21 = vmul.f32 0.040198937, %v1821_v18 }
 0x1e0   : > { %v1825_v5 = vadd.f32 %v1823_v24, %v1801_v34  ;;  %v1860_v8 = vmul.f32 -0.09772779, %v3803_v47  ;;  %v1864_v53 = vmul.f32 0.09500884, %v3803_v47  ;;  %v1868_v11 = vmul.f32 -0.01513572, %v3803_v47 }
 0x1e1   : > { %v1829_v20 = vadd.f32 %v1827_v23, %v1805_v30  ;;  %v1833_v14 = vadd.f32 %v1831_v17, %v1809_v62  ;;  %v1837_v61 = vadd.f32 %v1835_v21, %v1813_v39  ;;  %v1798_v2 = vmul.f32 0.14882521, %v4581_v63  ;;  %v4582_v18 = vld [vmem:[#allocation27_spill] sm:$0xff] }
 0x1e2   : > { %v3888_v60 = vadd.f32 %v1856_v38, %v1825_v5  ;;  %v1802_v0 = vmul.f32 0.18958892, %v4581_v63  ;;  %v1806_v28 = vmul.f32 0.11787796, %v4581_v63  ;;  %v1810_v22 = vmul.f32 -0.017992483, %v4581_v63  ;;  %v1848_v45 = vpop.permute.xlu0 %1847 }
 0x1e3   : > { %v3893_v40 = vadd.f32 %v1860_v8, %v1829_v20  ;;  %v3895_v16 = vadd.f32 %v1864_v53, %v1833_v14  ;;  %v3897_v52 = vadd.f32 %v1868_v11, %v1837_v61  ;;  %v1800_v47 = vadd.f32 %v1798_v2, %v3809_v13 }
 0x1e4   : > { %v1804_v56 = vadd.f32 %v1802_v0, %v3812_v7  ;;  %v1808_v55 = vadd.f32 %v1806_v28, %v3815_v26  ;;  %v1812_v33 = vadd.f32 %v1810_v22, %v3819_v54  ;;  %v1820_v6 = vsel %vm1051_vm8, %v1815_v1, 0.0  ;;  %v1218_v38 = vpop.permute.xlu1 %1217 }
 0x1e5   : > { %v2703_v15 = vunpack.i.l.bf16 %v4579_v32  ;;  %v1822_v41 = vmul.f32 0.001050002, %v1820_v6  ;;  %v1826_v58 = vmul.f32 0.17858705, %v1820_v6  ;;  %v1830_v9 = vmul.f32 0.012691209, %v1820_v6 }
 0x1e6   : > { %v1834_v59 = vmul.f32 0.040198937, %v1820_v6  ;;  %v1853_v12 = vsel %vm1010_vm5, 0.0, %v1848_v45  ;;  %v1871_v13 = vmul.f32 0.14940791, %v4582_v18  ;;  %v3908_v7 = vsel %vm1051_vm8, %v1320_v10, 0.0 }
 0x1e7   : > { %v1824_v26 = vadd.f32 %v1822_v41, %v1800_v47  ;;  %v1828_v34 = vadd.f32 %v1826_v58, %v1804_v56  ;;  %v1832_v54 = vadd.f32 %v1830_v9, %v1808_v55  ;;  %v1855_v30 = vmul.f32 0.1867558, %v1853_v12 }
 0x1e8   : > { %v1836_v62 = vadd.f32 %v1834_v59, %v1812_v33  ;;  %v1859_v24 = vmul.f32 -0.09772779, %v1853_v12  ;;  %v1863_v1 = vmul.f32 0.09500884, %v1853_v12  ;;  %v1867_v39 = vmul.f32 -0.01513572, %v1853_v12 }
 0x1e9   : > { %v1857_v23 = vadd.f32 %v1855_v30, %v1824_v26  ;;  %v1875_v17 = vmul.f32 -0.020515826, %v4582_v18  ;;  %v1879_v21 = vmul.f32 0.03130677, %v4582_v18  ;;  %v1883_v5 = vmul.f32 -0.085409574, %v4582_v18 }
 0x1ea   : > { %v1861_v8 = vadd.f32 %v1859_v24, %v1828_v34  ;;  %v1865_v53 = vadd.f32 %v1863_v1, %v1832_v54  ;;  %v1869_v11 = vadd.f32 %v1867_v39, %v1836_v62  ;;  %v1895_v20 = vmul.f32 0.15327792, %v3830_v48  ;;  %v1258_v0 = vpop.permute.xlu0 %1257 }
 0x1eb   : > { %v1873_v14 = vadd.f32 %v1871_v13, %v1857_v23  ;;  %v1899_v61 = vmul.f32 0.14693588, %v3830_v48  ;;  %v1903_v63 = vmul.f32 0.015494742, %v3830_v48  ;;  %v1907_v2 = vmul.f32 0.037816253, %v3830_v48 }
 0x1ec   : > { %v1877_v28 = vadd.f32 %v1875_v17, %v1861_v8  ;;  %v1881_v22 = vadd.f32 %v1879_v21, %v1865_v53  ;;  %v1885_v47 = vadd.f32 %v1883_v5, %v1869_v11  ;;  %v1222_v45 = vsel %vm1010_vm5, 0.0, %v1218_v38  ;;  %v1256_v59 = vpop.permute.xlu1 %1255  ;;  %v4583_v13 = vld [vmem:[#allocation29_spill] sm:$0xff]  ;;  %v4584_v17 = vld [vmem:[#allocation31_spill] sm:$0xff] }
 0x1ed   : > { %v3918_v56 = vadd.f32 %v1895_v20, %v1873_v14  ;;  %v1224_v55 = vmul.f32 0.1867558, %v1222_v45  ;;  %v1228_v33 = vmul.f32 -0.09772779, %v1222_v45  ;;  %v1232_v6 = vmul.f32 0.09500884, %v1222_v45 }
 0x1ee   : > { %v3920_v41 = vadd.f32 %v1899_v61, %v1877_v28  ;;  %v3922_v58 = vadd.f32 %v1903_v63, %v1881_v22  ;;  %v3924_v9 = vadd.f32 %v1907_v2, %v1885_v47  ;;  %v1236_v10 = vmul.f32 -0.01513572, %v1222_v45  ;;  %v4585_v14 = vld [vmem:[#allocation20_spill] sm:$0xff] }
 0x1ef   : > { %v1226_v48 = vadd.f32 %v1224_v55, %v3844_v49  ;;  %v1230_v12 = vadd.f32 %v1228_v33, %v3846_v27  ;;  %v1234_v18 = vadd.f32 %v1232_v6, %v3848_v43  ;;  %v1240_v38 = vmul.f32 0.14940791, %v4583_v13 }
 0x1f0   : > { %v1238_v26 = vadd.f32 %v1236_v10, %v3851_v31  ;;  %v1244_v34 = vmul.f32 -0.020515826, %v4583_v13  ;;  %v1248_v54 = vmul.f32 0.03130677, %v4583_v13  ;;  %v1252_v30 = vmul.f32 -0.085409574, %v4583_v13 }
 0x1f1   : > { %v1242_v62 = vadd.f32 %v1240_v38, %v1226_v48  ;;  %v1262_v24 = vsel %vm1051_vm8, %v1258_v0, 0.0  ;;  %v1288_v1 = vmul.f32 -0.1048553, %v3882_v19  ;;  %v1292_v49 = vmul.f32 -0.1420018, %v3882_v19 }
 0x1f2   : > { %v1246_v27 = vadd.f32 %v1244_v34, %v1230_v12  ;;  %v1250_v39 = vadd.f32 %v1248_v54, %v1234_v18  ;;  %v1254_v43 = vadd.f32 %v1252_v30, %v1238_v26  ;;  %v1264_v23 = vmul.f32 0.15327792, %v1262_v24  ;;  %v1280_v63 = vpop.permute.xlu0 %1279 }
 0x1f3   : > { %v2709_v21 = vunpack.i.h.bf16 %v4584_v17  ;;  %v1268_v31 = vmul.f32 0.14693588, %v1262_v24  ;;  %v1272_v5 = vmul.f32 0.015494742, %v1262_v24  ;;  %v1276_v8 = vmul.f32 0.037816253, %v1262_v24 }
 0x1f4   : > { %v1266_v53 = vadd.f32 %v1264_v23, %v1242_v62  ;;  %v1296_v11 = vmul.f32 -0.17062701, %v3882_v19  ;;  %v1300_v20 = vmul.f32 0.19507754, %v3882_v19  ;;  %v1239_v61 = vmul.f32 0.14940791, %v4585_v14  ;;  %v1890_v38 = vpop.permute.xlu1 %1889 }
 0x1f5   : > { %v1270_v2 = vadd.f32 %v1268_v31, %v1246_v27  ;;  %v1274_v0 = vadd.f32 %v1272_v5, %v1250_v39  ;;  %v1278_v28 = vadd.f32 %v1276_v8, %v1254_v43  ;;  %v1243_v22 = vmul.f32 -0.020515826, %v4585_v14  ;;  %v4586_v62 = vld [vmem:[#allocation40_spill] sm:$0xff] }
 0x1f6   : > { %v3942_v47 = vadd.f32 %v1288_v1, %v1266_v53  ;;  %v1241_v45 = vadd.f32 %v1239_v61, %v3863_v37  ;;  %v1247_v55 = vmul.f32 0.03130677, %v4585_v14  ;;  %v1251_v33 = vmul.f32 -0.085409574, %v4585_v14 }
 0x1f7   : > { %v3947_v6 = vadd.f32 %v1292_v49, %v1270_v2  ;;  %v3949_v10 = vadd.f32 %v1296_v11, %v1274_v0  ;;  %v3951_v19 = vadd.f32 %v1300_v20, %v1278_v28  ;;  %v1245_v48 = vadd.f32 %v1243_v22, %v3865_v36 }
 0x1f8   : > { %v1249_v12 = vadd.f32 %v1247_v55, %v3867_v46  ;;  %v1253_v18 = vadd.f32 %v1251_v33, %v3869_v4  ;;  %v1261_v13 = vsel %vm1051_vm8, %v1256_v59, 0.0  ;;  %v1285_v37 = vsel %vm1010_vm5, 0.0, %v1280_v63  ;;  %v4587_v59 = vld [vmem:[#allocation18_spill] sm:$0xff] }
 0x1f9   : > { %v2708_v26 = vunpack.i.l.bf16 %v4584_v17  ;;  %v1263_v34 = vmul.f32 0.15327792, %v1261_v13  ;;  %v1267_v54 = vmul.f32 0.14693588, %v1261_v13  ;;  %v1271_v30 = vmul.f32 0.015494742, %v1261_v13 }
 0x1fa   : > { %v2714_v24 = vunpack.i.h.bf16 %v4586_v62  ;;  %v1275_v1 = vmul.f32 0.037816253, %v1261_v13  ;;  %v1287_v49 = vmul.f32 -0.1048553, %v1285_v37  ;;  %v1291_v27 = vmul.f32 -0.1420018, %v1285_v37  ;;  %v1914_v0 = vpop.permute.xlu0 %1913 }
 0x1fb   : > { %v1265_v36 = vadd.f32 %v1263_v34, %v1241_v45  ;;  %v1269_v39 = vadd.f32 %v1267_v54, %v1245_v48  ;;  %v1273_v46 = vadd.f32 %v1271_v30, %v1249_v12  ;;  %v1295_v43 = vmul.f32 -0.17062701, %v1285_v37  ;;  %v4588_v12 = vld [vmem:[#allocation24_spill] sm:$0xff] }
 0x1fc   : > { %v1277_v4 = vadd.f32 %v1275_v1, %v1253_v18  ;;  %v1299_v23 = vmul.f32 0.19507754, %v1285_v37  ;;  %v1303_v31 = vmul.f32 -0.051080514, %v4587_v59  ;;  %v1307_v5 = vmul.f32 -0.11806322, %v4587_v59  ;;  %v1954_v1 = vpop.permute.xlu2 %1953 }
 0x1fd   : > { %v1289_v8 = vadd.f32 %v1287_v49, %v1265_v36  ;;  %v1293_v53 = vadd.f32 %v1291_v27, %v1269_v39  ;;  %v1297_v11 = vadd.f32 %v1295_v43, %v1273_v46  ;;  %v1311_v20 = vmul.f32 -0.0028182229, %v4587_v59  ;;  %v1912_v39 = vpop.permute.xlu1 %1911 }
 0x1fe   : > { %v1301_v14 = vadd.f32 %v1299_v23, %v1277_v4  ;;  %v1315_v61 = vmul.f32 0.042833187, %v4587_v59  ;;  %v1327_v63 = vmul.f32 0.017742613, %v3908_v7  ;;  %v1331_v2 = vmul.f32 -0.040178094, %v3908_v7 }
 0x1ff   : > { %v1305_v28 = vadd.f32 %v1303_v31, %v1289_v8  ;;  %v1309_v22 = vadd.f32 %v1307_v5, %v1293_v53  ;;  %v1313_v45 = vadd.f32 %v1311_v20, %v1297_v11  ;;  %v1335_v55 = vmul.f32 -0.16301984, %v3908_v7  ;;  %v4589_v23 = vld [vmem:[#allocation22_spill] sm:$0xff] }
 0x200   : > { %v1317_v33 = vadd.f32 %v1315_v61, %v1301_v14  ;;  %v1339_v48 = vmul.f32 0.046278227, %v3908_v7  ;;  %v1872_v18 = vmul.f32 0.14940791, %v4588_v12  ;;  %v1876_v13 = vmul.f32 -0.020515826, %v4588_v12 }
 0x201   : > { %v3970_v37 = vadd.f32 %v1327_v63, %v1305_v28  ;;  %v3972_v34 = vadd.f32 %v1331_v2, %v1309_v22  ;;  %v3974_v54 = vadd.f32 %v1335_v55, %v1313_v45  ;;  %v1880_v30 = vmul.f32 0.03130677, %v4588_v12 }
 0x202   : > { %v3977_v49 = vadd.f32 %v1339_v48, %v1317_v33  ;;  %v1874_v27 = vadd.f32 %v1872_v18, %v3888_v60  ;;  %v1878_v36 = vadd.f32 %v1876_v13, %v3893_v40  ;;  %v1884_v7 = vmul.f32 -0.085409574, %v4588_v12  ;;  %v1952_v33 = vpop.permute.xlu0 %1951  ;;  %v4590_v13 = vld [vmem:[#allocation21_spill] sm:$0xff] }
 0x203   : > { %v1882_v46 = vadd.f32 %v1880_v30, %v3895_v16  ;;  %v1894_v43 = vsel %vm1051_vm8, %v1890_v38, 0.0  ;;  %v1918_v4 = vsel %vm1010_vm5, 0.0, %v1914_v0  ;;  %v1936_v59 = vmul.f32 -0.051080514, %v4589_v23 }
 0x204   : > { %v1886_v31 = vadd.f32 %v1884_v7, %v3897_v52  ;;  %v1896_v5 = vmul.f32 0.15327792, %v1894_v43  ;;  %v1900_v8 = vmul.f32 0.14693588, %v1894_v43  ;;  %v1904_v53 = vmul.f32 0.015494742, %v1894_v43 }
 0x205   : > { %v2713_v60 = vunpack.i.l.bf16 %v4586_v62  ;;  %v1908_v11 = vmul.f32 0.037816253, %v1894_v43  ;;  %v1920_v40 = vmul.f32 -0.1048553, %v1918_v4  ;;  %v1924_v20 = vmul.f32 -0.1420018, %v1918_v4 }
 0x206   : > { %v1898_v14 = vadd.f32 %v1896_v5, %v1874_v27  ;;  %v1902_v61 = vadd.f32 %v1900_v8, %v1878_v36  ;;  %v1906_v63 = vadd.f32 %v1904_v53, %v1882_v46  ;;  %v1928_v16 = vmul.f32 -0.17062701, %v1918_v4  ;;  %v1983_v8 = vpop.permute.xlu2 %1982 }
 0x207   : > { %v1910_v2 = vadd.f32 %v1908_v11, %v1886_v31  ;;  %v1932_v38 = vmul.f32 0.19507754, %v1918_v4  ;;  %v1940_v0 = vmul.f32 -0.11806322, %v4589_v23  ;;  %v1944_v28 = vmul.f32 -0.0028182229, %v4589_v23 }
 0x208   : > { %v1922_v22 = vadd.f32 %v1920_v40, %v1898_v14  ;;  %v1926_v52 = vadd.f32 %v1924_v20, %v1902_v61  ;;  %v1930_v45 = vadd.f32 %v1928_v16, %v1906_v63  ;;  %v1948_v55 = vmul.f32 0.042833187, %v4589_v23  ;;  %v1322_v20 = vpop.permute.xlu1 %1321 }
 0x209   : > { %v1934_v48 = vadd.f32 %v1932_v38, %v1910_v2  ;;  %v1958_v12 = vsel %vm1051_vm8, %v1954_v1, 0.0  ;;  %v1917_v18 = vsel %vm1010_vm5, 0.0, %v1912_v39  ;;  %v1935_v30 = vmul.f32 -0.051080514, %v4590_v13 }
 0x20a   : > { %v1938_v27 = vadd.f32 %v1936_v59, %v1922_v22  ;;  %v1942_v36 = vadd.f32 %v1940_v0, %v1926_v52  ;;  %v1946_v7 = vadd.f32 %v1944_v28, %v1930_v45  ;;  %v1960_v46 = vmul.f32 0.017742613, %v1958_v12 }
 0x20b   : > { %v1950_v43 = vadd.f32 %v1948_v55, %v1934_v48  ;;  %v1964_v4 = vmul.f32 -0.040178094, %v1958_v12  ;;  %v1968_v31 = vmul.f32 -0.16301984, %v1958_v12  ;;  %v1972_v5 = vmul.f32 0.046278227, %v1958_v12 }
 0x20c   : > { %v3994_v53 = vadd.f32 %v1960_v46, %v1938_v27  ;;  %v1919_v23 = vmul.f32 -0.1048553, %v1917_v18  ;;  %v1923_v11 = vmul.f32 -0.1420018, %v1917_v18  ;;  %v1927_v40 = vmul.f32 -0.17062701, %v1917_v18  ;;  %v1353_v46 = vpop.permute.xlu0 %1352 }
 0x20d   : > { %v3996_v1 = vadd.f32 %v1964_v4, %v1942_v36  ;;  %v3998_v39 = vadd.f32 %v1968_v31, %v1946_v7  ;;  %v4000_v14 = vadd.f32 %v1972_v5, %v1950_v43  ;;  %v1931_v59 = vmul.f32 0.19507754, %v1917_v18  ;;  %v4591_v7 = vld [vmem:[#allocation26_spill] sm:$0xff] }
 0x20e   : > { %v1921_v61 = vadd.f32 %v1919_v23, %v3918_v56  ;;  %v1925_v63 = vadd.f32 %v1923_v11, %v3920_v41  ;;  %v1929_v16 = vadd.f32 %v1927_v40, %v3922_v58  ;;  %v1939_v2 = vmul.f32 -0.11806322, %v4590_v13 }
 0x20f   : > { %v1933_v38 = vadd.f32 %v1931_v59, %v3924_v9  ;;  %v1943_v0 = vmul.f32 -0.0028182229, %v4590_v13  ;;  %v1947_v28 = vmul.f32 0.042833187, %v4590_v13  ;;  %v1957_v22 = vsel %vm1051_vm8, %v1952_v33, 0.0 }
 0x210   : > { %v1937_v52 = vadd.f32 %v1935_v30, %v1921_v61  ;;  %v1941_v45 = vadd.f32 %v1939_v2, %v1925_v63  ;;  %v1959_v55 = vmul.f32 0.017742613, %v1957_v22  ;;  %v1963_v48 = vmul.f32 -0.040178094, %v1957_v22  ;;  %v1393_v61 = vpop.permute.xlu2 %1392 }
 0x211   : > { %v1945_v12 = vadd.f32 %v1943_v0, %v1929_v16  ;;  %v1949_v56 = vadd.f32 %v1947_v28, %v1933_v38  ;;  %v1967_v18 = vmul.f32 -0.16301984, %v1957_v22  ;;  %v1971_v41 = vmul.f32 0.046278227, %v1957_v22 }
 0x212   : > { %v1961_v27 = vadd.f32 %v1959_v55, %v1937_v52  ;;  %v1965_v58 = vadd.f32 %v1963_v48, %v1941_v45  ;;  %v1988_v36 = vsel %vm1010_vm5, 0.0, %v1983_v8  ;;  %v1304_v9 = vmul.f32 -0.051080514, %v4591_v7 }
 0x213   : > { %v1969_v43 = vadd.f32 %v1967_v18, %v1945_v12  ;;  %v1973_v4 = vadd.f32 %v1971_v41, %v1949_v56  ;;  %v1990_v13 = vmul.f32 -0.08707971, %v1988_v36  ;;  %v1994_v31 = vmul.f32 -0.057884965, %v1988_v36 }
 0x214   : > { %v1998_v33 = vmul.f32 -0.031155253, %v1988_v36  ;;  %v2002_v30 = vmul.f32 0.005616534, %v1988_v36  ;;  %v1306_v5 = vadd.f32 %v1304_v9, %v3942_v47  ;;  %v1308_v23 = vmul.f32 -0.11806322, %v4591_v7  ;;  %v1351_v47 = vpop.permute.xlu1 %1350 }
 0x215   : > { %v4014_v11 = vadd.f32 %v1990_v13, %v1961_v27  ;;  %v4016_v40 = vadd.f32 %v1994_v31, %v1965_v58  ;;  %v1312_v59 = vmul.f32 -0.0028182229, %v4591_v7  ;;  %v1316_v8 = vmul.f32 0.042833187, %v4591_v7  ;;  %v4592_v9 = vld [vmem:[#allocation36_spill] sm:$0xff] }
 0x216   : > { %v4020_v63 = vadd.f32 %v1998_v33, %v1969_v43  ;;  %v4022_v16 = vadd.f32 %v2002_v30, %v1973_v4  ;;  %v1310_v2 = vadd.f32 %v1308_v23, %v3947_v6  ;;  %v1326_v38 = vsel %vm1051_vm8, %v1322_v20, 0.0  ;;  %v1391_v30 = vpop.permute.xlu0 %1390 }
 0x217   : > { %v1314_v0 = vadd.f32 %v1312_v59, %v3949_v10  ;;  %v1318_v28 = vadd.f32 %v1316_v8, %v3951_v19  ;;  %v1328_v22 = vmul.f32 0.017742613, %v1326_v38  ;;  %v1332_v52 = vmul.f32 -0.040178094, %v1326_v38  ;;  %v4030_v6 = vpop.f32.mrf.mxu1 }
 0x218   : > { %v1336_v45 = vmul.f32 -0.16301984, %v1326_v38  ;;  %v1340_v55 = vmul.f32 0.046278227, %v1326_v38  ;;  %v1357_v48 = vsel %vm1010_vm5, 0.0, %v1353_v46  ;;  %v1397_v12 = vsel %vm1051_vm8, %v1393_v61, 0.0  ;;  %820 = vrot.lane.b32.xlu0 %v4030_v6, %s2926_s27 }
 0x219   : > { %v1330_v56 = vadd.f32 %v1328_v22, %v1306_v5  ;;  %v1334_v18 = vadd.f32 %v1332_v52, %v1310_v2  ;;  %v1359_v41 = vmul.f32 -0.08707971, %v1357_v48  ;;  %v1363_v27 = vmul.f32 -0.057884965, %v1357_v48 }
 0x21a   : > { %v1338_v20 = vadd.f32 %v1336_v45, %v1314_v0  ;;  %v1342_v58 = vadd.f32 %v1340_v55, %v1318_v28  ;;  %v1367_v36 = vmul.f32 -0.031155253, %v1357_v48  ;;  %v1371_v10 = vmul.f32 0.005616534, %v1357_v48  ;;  %v4593_v45 = vld [vmem:[#allocation38_spill] sm:$0xff]  ;;  %v1424_v48 = vpop.permute.xlu2 %1423 }
 0x21b   : > { %v1361_v19 = vadd.f32 %v1359_v41, %v1330_v56  ;;  %v1365_v7 = vadd.f32 %v1363_v27, %v1334_v18  ;;  %v1375_v43 = vmul.f32 -0.10707526, %v4592_v9  ;;  %v1379_v46 = vmul.f32 0.10544518, %v4592_v9 }
 0x21c   : > { %v1369_v4 = vadd.f32 %v1367_v36, %v1338_v20  ;;  %v1373_v13 = vadd.f32 %v1371_v10, %v1342_v58  ;;  %v1383_v31 = vmul.f32 -0.040317696, %v4592_v9  ;;  %v1387_v33 = vmul.f32 0.12224451, %v4592_v9  ;;  %v1985_v20 = vpop.permute.xlu1 %1984 }
 0x21d   : > { %v1377_v5 = vadd.f32 %v1375_v43, %v1361_v19  ;;  %v1381_v23 = vadd.f32 %v1379_v46, %v1365_v7  ;;  %v1399_v59 = vmul.f32 0.18831506, %v1397_v12  ;;  %v1403_v8 = vmul.f32 -0.1347759, %v1397_v12 }
 0x21e   : > { %v1385_v61 = vadd.f32 %v1383_v31, %v1369_v4  ;;  %v1389_v2 = vadd.f32 %v1387_v33, %v1373_v13  ;;  %v1407_v38 = vmul.f32 -0.12704849, %v1397_v12  ;;  %v1411_v0 = vmul.f32 0.09693967, %v1397_v12 }
 0x21f   : > { %v4038_v28 = vadd.f32 %v1399_v59, %v1377_v5  ;;  %v4040_v22 = vadd.f32 %v1403_v8, %v1381_v23  ;;  %v1356_v52 = vsel %vm1010_vm5, 0.0, %v1351_v47  ;;  %v1374_v55 = vmul.f32 -0.10707526, %v4593_v45  ;;  %v4049_v10 = vpop.f32.mrf.mxu1 }
 0x220   : > { %v4044_v56 = vadd.f32 %v1407_v38, %v1385_v61  ;;  %v4046_v18 = vadd.f32 %v1411_v0, %v1389_v2  ;;  %v1358_v41 = vmul.f32 -0.08707971, %v1356_v52  ;;  %v1362_v27 = vmul.f32 -0.057884965, %v1356_v52  ;;  %822 = vrot.lane.b32.xlu1 %v4049_v10, %s2926_s27 }
 0x221   : > { %v1366_v58 = vmul.f32 -0.031155253, %v1356_v52  ;;  %v1370_v36 = vmul.f32 0.005616534, %v1356_v52  ;;  %v1378_v12 = vmul.f32 0.10544518, %v4593_v45  ;;  %v4053_v19 = vmul.f32 %v4030_v6, %v4030_v6 }
 0x222   : > { %v1360_v47 = vadd.f32 %v1358_v41, %v3970_v37  ;;  %v1364_v7 = vadd.f32 %v1362_v27, %v3972_v34  ;;  %v1382_v9 = vmul.f32 -0.040317696, %v4593_v45  ;;  %v1386_v43 = vmul.f32 0.12224451, %v4593_v45 }
 0x223   : > { %v1368_v46 = vadd.f32 %v1366_v58, %v3974_v54  ;;  %v1372_v4 = vadd.f32 %v1370_v36, %v3977_v49  ;;  %v1396_v13 = vsel %vm1051_vm8, %v1391_v30, 0.0  ;;  %v1429_v31 = vsel %vm1010_vm5, 0.0, %v1424_v48  ;;  %860 = vrot.lane.b32.xlu0 %v4053_v19, %s2926_s27  ;;  %v2025_v49 = vpop.permute.xlu0 %2024  ;;  %v4594_v58 = vld [vmem:[#allocation37_spill] sm:$0xff] }
 0x224   : > { %v1376_v37 = vadd.f32 %v1374_v55, %v1360_v47  ;;  %v1380_v34 = vadd.f32 %v1378_v12, %v1364_v7  ;;  %v1398_v33 = vmul.f32 0.18831506, %v1396_v13  ;;  %v1402_v5 = vmul.f32 -0.1347759, %v1396_v13 }
 0x225   : > { %v1384_v23 = vadd.f32 %v1382_v9, %v1368_v46  ;;  %v1388_v59 = vadd.f32 %v1386_v43, %v1372_v4  ;;  %v1406_v8 = vmul.f32 -0.12704849, %v1396_v13  ;;  %v1410_v61 = vmul.f32 0.09693967, %v1396_v13  ;;  %v2058_v43 = vpop.permute.xlu2 %2057 }
 0x226   : > { %v1400_v2 = vadd.f32 %v1398_v33, %v1376_v37  ;;  %v1404_v38 = vadd.f32 %v1402_v5, %v1380_v34  ;;  %v1431_v54 = vmul.f32 -0.010321885, %v1429_v31  ;;  %v1435_v0 = vmul.f32 0.04105985, %v1429_v31  ;;  %v2023_v37 = vpop.permute.xlu1 %2022 }
 0x227   : > { %v1408_v52 = vadd.f32 %v1406_v8, %v1384_v23  ;;  %v1412_v30 = vadd.f32 %v1410_v61, %v1388_v59  ;;  %v1439_v45 = vmul.f32 0.014404357, %v1429_v31  ;;  %v1443_v48 = vmul.f32 0.14542735, %v1429_v31  ;;  %v636_v46 = vpop.f32.mrf.mxu1 }
 0x228   : > { %v4067_v41 = vadd.f32 %v1431_v54, %v1400_v2  ;;  %v4069_v27 = vadd.f32 %v1435_v0, %v1404_v38  ;;  %v1989_v55 = vsel %vm1010_vm5, 0.0, %v1985_v20  ;;  %v2007_v36 = vmul.f32 -0.10707526, %v4594_v58 }
 0x229   : > { %v4073_v12 = vadd.f32 %v1439_v45, %v1408_v52  ;;  %v4075_v47 = vadd.f32 %v1443_v48, %v1412_v30  ;;  %v1991_v7 = vmul.f32 -0.08707971, %v1989_v55  ;;  %v1995_v9 = vmul.f32 -0.057884965, %v1989_v55 }
 0x22a   : > { %v1999_v4 = vmul.f32 -0.031155253, %v1989_v55  ;;  %v2003_v13 = vmul.f32 0.005616534, %v1989_v55  ;;  %v2011_v31 = vmul.f32 0.10544518, %v4594_v58  ;;  %v746_v34 = vsel %vm403_vm0, %v636_v46, %v2704_v51 }
 0x22b   : > { %v1993_v20 = vadd.f32 %v1991_v7, %v3994_v53  ;;  %v1997_v33 = vadd.f32 %v1995_v9, %v3996_v1  ;;  %v2015_v5 = vmul.f32 -0.040317696, %v4594_v58  ;;  %v2019_v23 = vmul.f32 0.12224451, %v4594_v58  ;;  %v2056_v46 = vpop.permute.xlu0 %2055 }
 0x22c   : > { %v2001_v59 = vadd.f32 %v1999_v4, %v3998_v39  ;;  %v2005_v8 = vadd.f32 %v2003_v13, %v4000_v14  ;;  %v2029_v61 = vsel %vm1051_vm8, %v2025_v49, 0.0  ;;  %v2062_v2 = vsel %vm1010_vm5, 0.0, %v2058_v43 }
 0x22d   : > { %v2009_v38 = vadd.f32 %v2007_v36, %v1993_v20  ;;  %v2013_v54 = vadd.f32 %v2011_v31, %v1997_v33  ;;  %v2031_v0 = vmul.f32 0.18831506, %v2029_v61  ;;  %v2035_v51 = vmul.f32 -0.1347759, %v2029_v61  ;;  %v4595_v36 = vld [vmem:[#allocation33_spill] sm:$0xff] }
 0x22e   : > { %v2017_v52 = vadd.f32 %v2015_v5, %v2001_v59  ;;  %v2021_v53 = vadd.f32 %v2019_v23, %v2005_v8  ;;  %v2039_v30 = vmul.f32 -0.12704849, %v2029_v61  ;;  %v2043_v1 = vmul.f32 0.09693967, %v2029_v61 }
 0x22f   : > { %v2033_v45 = vadd.f32 %v2031_v0, %v2009_v38  ;;  %v2037_v48 = vadd.f32 %v2035_v51, %v2013_v54  ;;  %v2064_v55 = vmul.f32 -0.010321885, %v2062_v2  ;;  %v2068_v58 = vmul.f32 0.04105985, %v2062_v2  ;;  %v1426_v51 = vpop.permute.xlu1 %1425 }
 0x230   : > { %v2041_v7 = vadd.f32 %v2039_v30, %v2017_v52  ;;  %v2045_v39 = vadd.f32 %v2043_v1, %v2021_v53  ;;  %v2072_v9 = vmul.f32 0.014404357, %v2062_v2  ;;  %v2076_v14 = vmul.f32 0.14542735, %v2062_v2 }
 0x231   : > { %v4089_v49 = vadd.f32 %v2064_v55, %v2033_v45  ;;  %v4091_v43 = vadd.f32 %v2068_v58, %v2037_v48  ;;  %v2006_v4 = vmul.f32 -0.10707526, %v4595_v36  ;;  %v2010_v13 = vmul.f32 0.10544518, %v4595_v36 }
 0x232   : > { %v4095_v31 = vadd.f32 %v2072_v9, %v2041_v7  ;;  %v4097_v20 = vadd.f32 %v2076_v14, %v2045_v39  ;;  %v2014_v33 = vmul.f32 -0.040317696, %v4595_v36  ;;  %v2018_v5 = vmul.f32 0.12224451, %v4595_v36  ;;  %v2096_v14 = vpop.permute.xlu2 %2095 }
 0x233   : > { %v2008_v23 = vadd.f32 %v2006_v4, %v4014_v11  ;;  %v2012_v59 = vadd.f32 %v2010_v13, %v4016_v40  ;;  %v2028_v8 = vsel %vm1051_vm8, %v2023_v37, 0.0  ;;  %v2061_v61 = vsel %vm1010_vm5, 0.0, %v2056_v46 }
 0x234   : > { %v2016_v2 = vadd.f32 %v2014_v33, %v4020_v63  ;;  %v2020_v38 = vadd.f32 %v2018_v5, %v4022_v16  ;;  %v2030_v54 = vmul.f32 0.18831506, %v2028_v8  ;;  %v2034_v0 = vmul.f32 -0.1347759, %v2028_v8 }
 0x235   : > { %v2038_v52 = vmul.f32 -0.12704849, %v2028_v8  ;;  %v2042_v53 = vmul.f32 0.09693967, %v2028_v8  ;;  %v2063_v30 = vmul.f32 -0.010321885, %v2061_v61  ;;  %v748_v11 = vsel %vm516_vm3, %v746_v34, %v2709_v21 }
 0x236   : > { %v2032_v1 = vadd.f32 %v2030_v54, %v2008_v23  ;;  %v2036_v40 = vadd.f32 %v2034_v0, %v2012_v59  ;;  %v2067_v45 = vmul.f32 0.04105985, %v2061_v61  ;;  %v2071_v37 = vmul.f32 0.014404357, %v2061_v61 }
 0x237   : > { %v2040_v48 = vadd.f32 %v2038_v52, %v2016_v2  ;;  %v2044_v55 = vadd.f32 %v2042_v53, %v2020_v38  ;;  %v2075_v58 = vmul.f32 0.14542735, %v2061_v61  ;;  %v1430_v63 = vsel %vm1010_vm5, 0.0, %v1426_v51 }
 0x238   : > { %v2065_v16 = vadd.f32 %v2063_v30, %v2032_v1  ;;  %v2069_v7 = vadd.f32 %v2067_v45, %v2036_v40  ;;  %v1432_v39 = vmul.f32 -0.010321885, %v1430_v63  ;;  %v1436_v9 = vmul.f32 0.04105985, %v1430_v63  ;;  %v1466_v30 = vpop.permute.xlu0 %1465 }
 0x239   : > { %v2073_v46 = vadd.f32 %v2071_v37, %v2040_v48  ;;  %v2077_v36 = vadd.f32 %v2075_v58, %v2044_v55  ;;  %v1440_v4 = vmul.f32 0.014404357, %v1430_v63  ;;  %v1444_v13 = vmul.f32 0.14542735, %v1430_v63 }
 0x23a   : > { %v1434_v21 = vadd.f32 %v1432_v39, %v4038_v28  ;;  %v1438_v34 = vadd.f32 %v1436_v9, %v4040_v22  ;;  %v2079_v33 = vmul.f32 -0.25529897, %v3615_v35  ;;  %v2083_v5 = vmul.f32 0.06536186, %v3615_v35 }
 0x23b   : > { %v1442_v23 = vadd.f32 %v1440_v4, %v4044_v56  ;;  %v1446_v59 = vadd.f32 %v1444_v13, %v4046_v18  ;;  %v2087_v8 = vmul.f32 0.08644362, %v3615_v35  ;;  %v2091_v61 = vmul.f32 -0.0742165, %v3615_v35 }
 0x23c   : > { %v2081_v2 = vadd.f32 %v2079_v33, %v2065_v16  ;;  %v2085_v38 = vadd.f32 %v2083_v5, %v2069_v7  ;;  %v2101_v54 = vsel %vm1051_vm8, %v2096_v14, 0.0  ;;  %v4123_v28 = vsel %vm519_vm4, %v748_v11, %v2714_v24 }
 0x23d   : > { %v2089_v22 = vadd.f32 %v2087_v8, %v2073_v46  ;;  %v2093_v0 = vadd.f32 %v2091_v61, %v2077_v36  ;;  %v2103_v51 = vmul.f32 -0.08877858, %v2101_v54  ;;  %v2107_v52 = vmul.f32 -0.19807965, %v2101_v54  ;;  %v1490_v36 = vpop.permute.xlu2 %1489  ;;  %v1464_v8 = vpop.permute.xlu1 %1463 }
 0x23e   : > { %v2111_v56 = vmul.f32 -0.034791216, %v2101_v54  ;;  %v2115_v53 = vmul.f32 0.015634896, %v2101_v54  ;;  %v1552_v18 = vrot.slane %v3419_v50, 1  ;;  %v4128_v35 = vmul.f32 %v4049_v10, %v4049_v10  ;;  %v639_v61 = vpop.f32.mrf.mxu1 }
 0x23f   : > { %v4130_v1 = vadd.f32 %v2103_v51, %v2081_v2  ;;  %v4132_v40 = vadd.f32 %v2107_v52, %v2085_v38  ;;  %v1448_v24 = vmul.f32 -0.25529897, %v3627_v57  ;;  %v1452_v11 = vmul.f32 0.06536186, %v3627_v57 }
 0x240   : > { %v4136_v45 = vadd.f32 %v2111_v56, %v2089_v22  ;;  %v4138_v37 = vadd.f32 %v2115_v53, %v2093_v0  ;;  %v4143_v48 = vsel %vm1134_vm2, %v1552_v18, 0.0  ;;  %862 = vrot.lane.b32.xlu1 %v4128_v35, %s2926_s27  ;;  %v1456_v55 = vmul.f32 0.08644362, %v3627_v57 }
 0x241   : > { %1560 = vrot.lane.b32.xlu0 %v4143_v48, %s2931_s13  ;;  %v1460_v58 = vmul.f32 -0.0742165, %v3627_v57  ;;  %v1450_v63 = vadd.f32 %v1448_v24, %v1434_v21  ;;  %v1454_v16 = vadd.f32 %v1452_v11, %v1438_v34  ;;  %v1470_v7 = vsel %vm1051_vm8, %v1466_v30, 0.0 }
 0x242   : > { %v1458_v39 = vadd.f32 %v1456_v55, %v1442_v23  ;;  %v1472_v9 = vmul.f32 -0.08877858, %v1470_v7  ;;  %v1476_v14 = vmul.f32 -0.19807965, %v1470_v7  ;;  %v1480_v46 = vmul.f32 -0.034791216, %v1470_v7  ;;  %v684_v55 = vpop.f32.mrf.mxu3 }
 0x243   : > { %v1462_v4 = vadd.f32 %v1460_v58, %v1446_v59  ;;  %v1484_v13 = vmul.f32 0.015634896, %v1470_v7  ;;  %v1447_v33 = vmul.f32 -0.25529897, %v4558_v25  ;;  %v1451_v5 = vmul.f32 0.06536186, %v4558_v25 }
 0x244   : > { %v1474_v2 = vadd.f32 %v1472_v9, %v1450_v63  ;;  %v1478_v38 = vadd.f32 %v1476_v14, %v1454_v16  ;;  %v1482_v57 = vadd.f32 %v1480_v46, %v1458_v39  ;;  %v1455_v21 = vmul.f32 0.08644362, %v4558_v25 }
 0x245   : > { %v1486_v34 = vadd.f32 %v1484_v13, %v1462_v4  ;;  %v1449_v23 = vadd.f32 %v1447_v33, %v4067_v41  ;;  %v1453_v54 = vadd.f32 %v1451_v5, %v4069_v27  ;;  %v1459_v22 = vmul.f32 -0.0742165, %v4558_v25 }
 0x246   : > { %v1457_v59 = vadd.f32 %v1455_v21, %v4073_v12  ;;  %v1469_v0 = vsel %vm1051_vm8, %v1464_v8, 0.0  ;;  %v1494_v51 = vsel %vm1010_vm5, 0.0, %v1490_v36  ;;  %v747_v52 = vsel %vm403_vm0, %v639_v61, %v2703_v15  ;;  %v1488_v12 = vpop.permute.xlu0 %1487 }
 0x247   : > { %v1461_v56 = vadd.f32 %v1459_v22, %v4075_v47  ;;  %v1471_v53 = vmul.f32 -0.08877858, %v1469_v0  ;;  %v1475_v30 = vmul.f32 -0.19807965, %v1469_v0  ;;  %v1479_v24 = vmul.f32 -0.034791216, %v1469_v0 }
 0x248   : > { %v1483_v41 = vmul.f32 0.015634896, %v1469_v0  ;;  %v1496_v11 = vmul.f32 -0.05096522, %v1494_v51  ;;  %v1500_v27 = vmul.f32 -0.04380743, %v1494_v51  ;;  %v749_v25 = vsel %vm516_vm3, %v747_v52, %v2708_v26 }
 0x249   : > { %v1473_v58 = vadd.f32 %v1471_v53, %v1449_v23  ;;  %v1477_v63 = vadd.f32 %v1475_v30, %v1453_v54  ;;  %v1481_v16 = vadd.f32 %v1479_v24, %v1457_v59  ;;  %v1504_v32 = vmul.f32 -0.12527953, %v1494_v51  ;;  %v4596_v24 = vld [vmem:[#allocation28_spill] sm:$0xff] }
 0x24a   : > { %v1485_v7 = vadd.f32 %v1483_v41, %v1461_v56  ;;  %v4168_v15 = vadd.f32 %v1496_v11, %v1474_v2  ;;  %v4170_v47 = vadd.f32 %v1500_v27, %v1478_v38  ;;  %v1508_v39 = vmul.f32 0.077749036, %v1494_v51 }
 0x24b   : > { %v4172_v9 = vadd.f32 %v1504_v32, %v1482_v57  ;;  %v751_v17 = vsel %vm519_vm4, %v749_v25, %v2713_v60  ;;  %v1551_v26 = vrot.slane %v3417_v42, 1  ;;  %v1493_v14 = vsel %vm1010_vm5, 0.0, %v1488_v12  ;;  %v2098_v60 = vpop.permute.xlu1 %2097  ;;  %v687_v22 = vpop.f32.mrf.mxu3  ;;  %v4598_v25 = vld [vmem:[#allocation30_spill] sm:$0xff] }
 0x24c   : > { %v4179_v46 = vadd.f32 %v1508_v39, %v1486_v34  ;;  %v1495_v36 = vmul.f32 -0.05096522, %v1493_v14  ;;  %v1499_v4 = vmul.f32 -0.04380743, %v1493_v14  ;;  %v1503_v13 = vmul.f32 -0.12527953, %v1493_v14  ;;  %805 = vmatpush.msrb.mxu1 %v687_v22 }
 0x24d   : > { %v4184_v33 = vsel %vm1134_vm2, %v1551_v26, %v1552_v18  ;;  %v1507_v5 = vmul.f32 0.077749036, %v1493_v14  ;;  %v2080_v8 = vmul.f32 -0.25529897, %v4569_v44  ;;  %v2084_v62 = vmul.f32 0.06536186, %v4569_v44 }
 0x24e   : > { %1558 = vrot.lane.b32.xlu1 %v4184_v33, %s2931_s13  ;;  %v4190_v61 = vadd.f32 %v1495_v36, %v1473_v58  ;;  %v4192_v2 = vadd.f32 %v1499_v4, %v1477_v63  ;;  %v4194_v38 = vadd.f32 %v1503_v13, %v1481_v16  ;;  %1598 = vrot.lane.b32.xlu0 %v4184_v33, %s2932_s28  ;;  %v2088_v18 = vmul.f32 0.08644362, %v4569_v44  ;;  %v2122_v30 = vpop.permute.xlu0 %2121  ;;  %v4599_v63 = vld [vmem:[#allocation44_spill] sm:$0xff] }
 0x24f   : > { %v4199_v57 = vadd.f32 %v1507_v5, %v1485_v7  ;;  %v2092_v21 = vmul.f32 -0.0742165, %v4569_v44  ;;  %v2082_v34 = vadd.f32 %v2080_v8, %v4089_v49  ;;  %v2086_v23 = vadd.f32 %v2084_v62, %v4091_v43  ;;  %806 = vmatpush.msrb.mxu1 %v684_v55  ;;  %v4597_v43 = vld [vmem:[#allocation32_spill] sm:$0xff] }
 0x250   : > { %v2102_v54 = vsel %vm1051_vm8, %v2098_v60, 0.0  ;;  %v2090_v59 = vadd.f32 %v2088_v18, %v4095_v31  ;;  %v2718_v41 = vunpack.i.l.bf16 %v4596_v24  ;;  %v2723_v27 = vunpack.i.l.bf16 %v4597_v43  ;;  %v2751_v31 = vld [vmem:[#allocation6] sm:$0xff] }
 0x251   : > { %v2104_v0 = vmul.f32 -0.08877858, %v2102_v54  ;;  %v2108_v51 = vmul.f32 -0.19807965, %v2102_v54  ;;  %v2112_v52 = vmul.f32 -0.034791216, %v2102_v54  ;;  %v2094_v56 = vadd.f32 %v2092_v21, %v4097_v20  ;;  %2584 = vmatmul.msk.f32.vlgmr.msrb.gmra.mxu1 %vm403_vm0, %v2751_v31 }
 0x252   : > { %v2116_v53 = vmul.f32 0.015634896, %v2102_v54  ;;  %v2733_v12 = vunpack.i.l.bf16 %v4598_v25  ;;  %v2728_v16 = vunpack.i.l.bf16 %v4599_v63  ;;  %v753_v20 = vsel %vm522_vm6, %v751_v17, %v2718_v41 }
 0x253   : > { %v2106_v44 = vadd.f32 %v2104_v0, %v2082_v34  ;;  %v2110_v11 = vadd.f32 %v2108_v51, %v2086_v23  ;;  %v2114_v49 = vadd.f32 %v2112_v52, %v2090_v59  ;;  %v2719_v32 = vunpack.i.h.bf16 %v4596_v24  ;;  %v2120_v14 = vpop.permute.xlu1 %2119 }
 0x254   : > { %v2118_v58 = vadd.f32 %v2116_v53, %v2094_v56  ;;  %v755_v7 = vsel %vm525_vm7, %v753_v20, %v2723_v27  ;;  %v2724_v39 = vunpack.i.h.bf16 %v4597_v43  ;;  %v2734_v55 = vunpack.i.h.bf16 %v4598_v25 }
 0x255   : > { %v758_v26 = vsel %vm756_vm9, %v755_v7, %v2728_v16  ;;  %v2729_v36 = vunpack.i.h.bf16 %v4599_v63  ;;  %v752_v13 = vsel %vm522_vm6, %v4123_v28, %v2719_v32  ;;  %v2126_v17 = vsel %vm1010_vm5, 0.0, %v2122_v30  ;;  %v2752_v30 = vld [vmem:[#allocation6 + $0x8] sm:$0xff] }
 0x256   : > { %v761_v4 = vsel %vm759_vm10, %v758_v26, %v2733_v12  ;;  %v754_v5 = vsel %vm525_vm7, %v752_v13, %v2724_v39  ;;  %v2128_v8 = vmul.f32 -0.05096522, %v2126_v17  ;;  %v2132_v62 = vmul.f32 -0.04380743, %v2126_v17  ;;  %v2160_v53 = vpop.permute.xlu0 %2159 }
 0x257   : > { %782 = vmatpush.msrb.mxu3 %v761_v4  ;;  %v2136_v60 = vmul.f32 -0.12527953, %v2126_v17  ;;  %v757_v18 = vsel %vm756_vm9, %v754_v5, %v2729_v36  ;;  %v2140_v21 = vmul.f32 0.077749036, %v2126_v17  ;;  %v2125_v34 = vsel %vm1010_vm5, 0.0, %v2120_v14 }
 0x258   : > { %v2143_v23 = vmul.f32 0.0066517224, %v4578_v29  ;;  %v760_v54 = vsel %vm759_vm10, %v757_v18, %v2734_v55  ;;  %v4224_v22 = vadd.f32 %v2128_v8, %v2106_v44  ;;  %v4226_v59 = vadd.f32 %v2132_v62, %v2110_v11 }
 0x259   : > { %v4228_v28 = vadd.f32 %v2136_v60, %v2114_v49  ;;  %783 = vmatpush.msrb.mxu3 %v760_v54  ;;  %v4230_v0 = vadd.f32 %v2140_v21, %v2118_v58  ;;  %v2127_v51 = vmul.f32 -0.05096522, %v2125_v34  ;;  %v2131_v52 = vmul.f32 -0.04380743, %v2125_v34  ;;  %2585 = vmatmul.msk.f32.gmra.mxu1 %vm403_vm0, %v2752_v30 }
 0x25a   : > { %v2135_v56 = vmul.f32 -0.12527953, %v2125_v34  ;;  %2582 = vmatmul.msk.f32.vlgmr.msrb.gmra.mxu3 %vm403_vm0, %v2751_v31  ;;  %v2139_v24 = vmul.f32 0.077749036, %v2125_v34  ;;  %v2147_v41 = vmul.f32 0.03024719, %v4578_v29 }
 0x25b   : > { %v2151_v44 = vmul.f32 -0.06343221, %v4578_v29  ;;  %v2129_v11 = vadd.f32 %v2127_v51, %v4130_v1  ;;  %v2133_v49 = vadd.f32 %v2131_v52, %v4132_v40  ;;  %v2155_v27 = vmul.f32 -0.036274116, %v4578_v29  ;;  %v1530_v55 = vpop.permute.xlu1 %1529 }
 0x25c   : > { %v2137_v43 = vadd.f32 %v2135_v56, %v4136_v45  ;;  %v2141_v25 = vadd.f32 %v2139_v24, %v4138_v37  ;;  %v2165_v12 = vsel %vm1051_vm8, %v2160_v53, 0.0  ;;  %v1512_v58 = vmul.f32 0.0066517224, %v3419_v50 }
 0x25d   : > { %v1516_v31 = vmul.f32 0.03024719, %v3419_v50  ;;  %v2145_v63 = vadd.f32 %v2143_v23, %v2129_v11  ;;  %v2149_v16 = vadd.f32 %v2147_v41, %v2133_v49  ;;  %v2167_v32 = vmul.f32 -0.09072984, %v2165_v12 }
 0x25e   : > { %v2153_v20 = vadd.f32 %v2151_v44, %v2137_v43  ;;  %v2157_v7 = vadd.f32 %v2155_v27, %v2141_v25  ;;  %v2171_v1 = vmul.f32 0.0051945397, %v2165_v12  ;;  %v2175_v39 = vmul.f32 0.07290906, %v2165_v12  ;;  %v1528_v27 = vpop.permute.xlu2 %1527 }
 0x25f   : > { %v2179_v40 = vmul.f32 0.012898291, %v2165_v12  ;;  %v4244_v45 = vadd.f32 %v2167_v32, %v2145_v63  ;;  %v1520_v26 = vmul.f32 -0.06343221, %v3419_v50  ;;  %v1524_v4 = vmul.f32 -0.036274116, %v3419_v50 }
 0x260   : > { %v4247_v37 = vadd.f32 %v2171_v1, %v2149_v16  ;;  %v4249_v14 = vadd.f32 %v2175_v39, %v2153_v20  ;;  %v1514_v13 = vadd.f32 %v1512_v58, %v4168_v15  ;;  %v1518_v17 = vadd.f32 %v1516_v31, %v4170_v47 }
 0x261   : > { %v4251_v36 = vadd.f32 %v2179_v40, %v2157_v7  ;;  %v1534_v5 = vsel %vm1051_vm8, %v1530_v55, 0.0  ;;  %v2184_v8 = vrot.slane %v4573_v3, 1  ;;  %v1522_v62 = vadd.f32 %v1520_v26, %v4172_v9 }
 0x262   : > { %2583 = vmatmul.msk.f32.gmra.mxu3 %vm403_vm0, %v2752_v30  ;;  %v1536_v60 = vmul.f32 -0.09072984, %v1534_v5  ;;  %v1540_v18 = vmul.f32 0.0051945397, %v1534_v5  ;;  %v1544_v21 = vmul.f32 0.07290906, %v1534_v5  ;;  %v1526_v34 = vadd.f32 %v1524_v4, %v4179_v46 }
 0x263   : > { %v1548_v23 = vmul.f32 0.012898291, %v1534_v5  ;;  %v4262_v50 = vsel %vm1134_vm2, %v2184_v8, 0.0  ;;  %v2183_v53 = vrot.slane %v4578_v29, 1  ;;  %v1511_v63 = vmul.f32 0.0066517224, %v3417_v42 }
 0x264   : > { %v1538_v15 = vadd.f32 %v1536_v60, %v1514_v13  ;;  %v1542_v54 = vadd.f32 %v1540_v18, %v1518_v17  ;;  %v1546_v47 = vadd.f32 %v1544_v21, %v1522_v62  ;;  %2192 = vrot.lane.b32.xlu1 %v4262_v50, %s2931_s13  ;;  %v1515_v16 = vmul.f32 0.03024719, %v3417_v42 }
 0x265   : > { %v1550_v51 = vadd.f32 %v1548_v23, %v1526_v34  ;;  %v4280_v30 = vsel %vm1134_vm2, %v2183_v53, %v2184_v8  ;;  %v1533_v32 = vsel %vm1051_vm8, %v1528_v27, 0.0  ;;  %v1519_v7 = vmul.f32 -0.06343221, %v3417_v42 }
 0x266   : > { %v1523_v1 = vmul.f32 -0.036274116, %v3417_v42  ;;  %v1513_v39 = vadd.f32 %v1511_v63, %v4190_v61  ;;  %v1517_v40 = vadd.f32 %v1515_v16, %v4192_v2  ;;  %v1535_v55 = vmul.f32 -0.09072984, %v1533_v32 }
 0x267   : > { %v1539_v26 = vmul.f32 0.0051945397, %v1533_v32  ;;  %v1521_v4 = vadd.f32 %v1519_v7, %v4194_v38  ;;  %v1543_v13 = vmul.f32 0.07290906, %v1533_v32  ;;  %v1547_v5 = vmul.f32 0.012898291, %v1533_v32 }
 0x268   : > { %v1525_v17 = vadd.f32 %v1523_v1, %v4199_v57  ;;  %v1537_v8 = vadd.f32 %v1535_v55, %v1513_v39  ;;  %v1582_v18 = vmul.f32 0.020827498, %v4184_v33  ;;  %v1586_v21 = vmul.f32 0.0976639, %v4184_v33 }
 0x269   : > { %v1541_v62 = vadd.f32 %v1539_v26, %v1517_v40  ;;  %v1590_v2 = vmul.f32 0.03563664, %v4184_v33  ;;  %v1594_v34 = vmul.f32 0.07065732, %v4184_v33  ;;  %v1545_v23 = vadd.f32 %v1543_v13, %v1521_v4 }
 0x28a   : > { %v4266_v52 = vpop.permute.xlu0 %820 }
 0x28b   : > { %v826_v9 = vmul.f32 %v4266_v52, %v4030_v6 }
 0x28d   : > { %830 = vrot.lane.b32.xlu2 %v826_v9, %s2933_s30 }
 0x292   : > { %v4271_v56 = vpop.permute.xlu1 %822 }
 0x293   : > { %v827_v46 = vmul.f32 %v4271_v56, %v4049_v10 }
 0x295   : > { %2161 = vrot.lane.b32.xlu2 %v4573_v3, %s2932_s28  ;;  %832 = vrot.lane.b32.xlu0 %v827_v46, %s2933_s30  ;;  %v4284_v24 = vpop.permute.xlu0 %860 }
 0x29d   : > { %2190 = vrot.lane.b32.xlu2 %v4280_v30, %s2931_s13 }
 0x2b2   : > { %v4287_v12 = vpop.permute.xlu1 %862 }
 0x2b3   : > { %v1561_v41 = vpop.permute.xlu0 %1560 }
 0x2b4   : > { %v1565_v44 = vsel %vm1010_vm5, 0.0, %v1561_v41 }
 0x2b5   : > { %v1567_v11 = vmul.f32 -0.11651498, %v1565_v44  ;;  %v1571_v49 = vmul.f32 0.090082645, %v1565_v44  ;;  %v1575_v43 = vmul.f32 0.046566244, %v1565_v44 }
 0x2b6   : > { %v1579_v25 = vmul.f32 -0.15362437, %v1565_v44 }
 0x2b7   : > { %v4289_v58 = vadd.f32 %v1567_v11, %v1538_v15  ;;  %v4291_v29 = vadd.f32 %v1571_v49, %v1542_v54  ;;  %v4293_v31 = vadd.f32 %v1575_v43, %v1546_v47  ;;  %v1549_v47 = vadd.f32 %v1547_v5, %v1525_v17 }
 0x2b8   : > { %v4297_v20 = vadd.f32 %v1579_v25, %v1550_v51 }
 0x2c0   : > { %v1559_v60 = vpop.permute.xlu1 %1558  ;;  %v1599_v42 = vpop.permute.xlu0 %1598 }
 0x2c1   : > { %v1564_v61 = vsel %vm1010_vm5, 0.0, %v1559_v60  ;;  %v1604_v38 = vsel %vm1051_vm8, %v1599_v42, 0.0 }
 0x2c2   : > { %v1566_v15 = vmul.f32 -0.11651498, %v1564_v61  ;;  %v1570_v57 = vmul.f32 0.090082645, %v1564_v61  ;;  %v1574_v54 = vmul.f32 0.046566244, %v1564_v61 }
 0x2c3   : > { %v1578_v51 = vmul.f32 -0.15362437, %v1564_v61  ;;  %v1606_v9 = vmul.f32 -0.11731234, %v1604_v38  ;;  %v1610_v46 = vmul.f32 0.19436212, %v1604_v38 }
 0x2c4   : > { %v1568_v53 = vadd.f32 %v1566_v15, %v1537_v8  ;;  %v1572_v41 = vadd.f32 %v1570_v57, %v1541_v62  ;;  %v1576_v44 = vadd.f32 %v1574_v54, %v1545_v23  ;;  %v1614_v11 = vmul.f32 -0.0413619, %v1604_v38 }
 0x2c5   : > { %v1580_v49 = vadd.f32 %v1578_v51, %v1549_v47  ;;  %v1618_v43 = vmul.f32 -0.07474548, %v1604_v38 }
 0x2c6   : > { %v1584_v27 = vadd.f32 %v1582_v18, %v1568_v53  ;;  %v1588_v25 = vadd.f32 %v1586_v21, %v1572_v41  ;;  %v1592_v63 = vadd.f32 %v1590_v2, %v1576_v44 }
 0x2c7   : > { %v1596_v33 = vadd.f32 %v1594_v34, %v1580_v49 }
 0x2c8   : > { %v1608_v16 = vadd.f32 %v1606_v9, %v1584_v27  ;;  %v1612_v32 = vadd.f32 %v1610_v46, %v1588_v25  ;;  %v1616_v7 = vadd.f32 %v1614_v11, %v1592_v63  ;;  %v2144_v63 = vmul.f32 0.0066517224, %v4573_v3 }
 0x2c9   : > { %v1620_v1 = vadd.f32 %v1618_v43, %v1596_v33  ;;  %v2148_v33 = vmul.f32 0.03024719, %v4573_v3 }
 0x2ca   : > { %v1622_v39 = vmax.f32 %v1608_v16, 0.0  ;;  %v1624_v40 = vmax.f32 %v1612_v32, 0.0  ;;  %v1626_v55 = vmax.f32 %v1616_v7, 0.0  ;;  %v2152_v32 = vmul.f32 -0.06343221, %v4573_v3 }
 0x2cb   : > { %v1628_v26 = vmax.f32 %v1620_v1, 0.0  ;;  %v2156_v7 = vmul.f32 -0.036274116, %v4573_v3 }
 0x2cc   : > { %v2262_v4 = vmul.f32 %v1622_v39, %v1622_v39  ;;  %v2266_v13 = vmul.f32 %v1624_v40, %v1624_v40  ;;  %v2274_v5 = vmul.f32 %v1626_v55, %v1626_v55 }
 0x2cd   : > { %v2282_v62 = vmul.f32 %v1628_v26, %v1628_v26 }
 0x2ce   : > { %v2268_v17 = vadd.f32 %v2266_v13, %v2262_v4  ;;  %v808_v54 = vpop.f32.mrf.mxu1 }
 0x2d0   : > { %v2276_v8 = vadd.f32 %v2274_v5, %v2268_v17  ;;  %v2158_v5 = vadd.f32 %v2156_v7, %v4230_v0 }
 0x2d2   : > { %v2284_v60 = vadd.f32 %v2282_v62, %v2276_v8 }
 0x2d4   : > { %v2290_v42 = vadd.f32 1e-10, %v2284_v60 }
 0x2d6   : > { %2735 = vrsqrt.f32 %v2290_v42  ;;  %vm2298_vm12 = vweird.f32 %v2290_v42 }
 0x2dc   : > { %v2736_v18 = vpop.eup %2735 }
 0x2dd   : > { %v2293_v21 = vmul.f32 %v2736_v18, %v2290_v42  ;;  %v785_v2 = vpop.f32.mrf.mxu3  ;;  %vm2299_vm11 = vweird.f32 %v2736_v18 }
 0x2de   : > { %v816_v38 = vsub.f32 %v785_v2, %v4053_v19  ;;  %vm2300_vm13 = vmor %vm2298_vm12, %vm2299_vm11 }
 0x2df   : > { %v2294_v61 = vmul.f32 %v2736_v18, %v2293_v21 }
 0x2e0   : > { %872 = vrot.lane.b32.xlu2 %v816_v38, %s2926_s27 }
 0x2e1   : > { %v2295_v34 = vmul.f32 0.5, %v2294_v61 }
 0x2e3   : > { %v2296_v23 = vsub.f32 1.5, %v2295_v34 }
 0x2e5   : > { %v2297_v15 = vmul.f32 %v2736_v18, %v2296_v23  ;;  %v788_v53 = vpop.f32.mrf.mxu3 }
 0x2e6   : > { %v817_v41 = vsub.f32 %v788_v53, %v4128_v35 }
 0x2e7   : > { %v2301_v57 = vsel %vm2300_vm13, %v2736_v18, %v2297_v15  ;;  %v831_v44 = vpop.permute.xlu2 %830 }
 0x2e8   : > { %v4314_v47 = vmul.f32 %v2301_v57, %v1622_v39  ;;  %v4316_v51 = vmul.f32 %v2301_v57, %v1624_v40  ;;  %v4318_v9 = vmul.f32 %v2301_v57, %v1626_v55  ;;  %v4320_v46 = vmul.f32 %v2301_v57, %v1628_v26  ;;  %874 = vrot.lane.b32.xlu0 %v817_v41, %s2926_s27 }
 0x2e9   : > { %v836_v11 = vsub.f32 %v785_v2, %v831_v44  ;;  %v922_v49 = vsub.f32 %v808_v54, %v831_v44  ;;  %v2146_v39 = vadd.f32 %v2144_v63, %v4224_v22  ;;  %v2150_v40 = vadd.f32 %v2148_v33, %v4226_v59  ;;  %v811_v59 = vpop.f32.mrf.mxu1 }
 0x2ea   : > { %v2154_v26 = vadd.f32 %v2152_v32, %v4228_v28  ;;  %v866_v57 = vadd.f32 %v4284_v24, %v4053_v19  ;;  %v839_v24 = vmul.f32 2.0, %v4049_v10 }
 0x2eb   : > { %v844_v43 = vmul.f32 2.0, %v836_v11  ;;  %v924_v27 = vmul.f32 2.0, %v922_v49  ;;  %v4349_v11 = vpop.permute.xlu1 %2192  ;;  %v838_v49 = vmul.f32 2.0, %v4030_v6 }
 0x2ec   : > { %v868_v44 = vadd.f32 0.0001, %v866_v57 }
 0x2ed   : > { %v846_v25 = vadd.f32 0.0009, %v844_v43  ;;  %v926_v16 = vadd.f32 0.0009, %v924_v27  ;;  %v867_v43 = vadd.f32 %v4287_v12, %v4128_v35  ;;  %v840_v27 = vmul.f32 %v838_v49, %v4266_v52 }
 0x2ef   : > { %850 = vrot.lane.b32.xlu1 %v846_v25, %s2927_s9  ;;  %v2162_v1 = vpop.permute.xlu2 %2161  ;;  %v869_v33 = vadd.f32 0.0001, %v867_v43 }
 0x2f0   : > { %v2166_v55 = vsel %vm1051_vm8, %v2162_v1, 0.0  ;;  %930 = vrot.lane.b32.xlu0 %v926_v16, %s2927_s9  ;;  %v842_v16 = vadd.f32 0.0001, %v840_v27 }
 0x2f1   : > { %v2168_v4 = vmul.f32 -0.09072984, %v2166_v55  ;;  %v2172_v13 = vmul.f32 0.0051945397, %v2166_v55  ;;  %v2176_v17 = vmul.f32 0.07290906, %v2166_v55 }
 0x2f2   : > { %v2180_v8 = vmul.f32 0.012898291, %v2166_v55 }
 0x2f3   : > { %v4335_v62 = vadd.f32 %v2168_v4, %v2146_v39  ;;  %v4337_v3 = vadd.f32 %v2172_v13, %v2150_v40  ;;  %v4339_v60 = vadd.f32 %v2176_v17, %v2154_v26  ;;  %v841_v39 = vmul.f32 %v839_v24, %v4271_v56 }
 0x2f4   : > { %v4341_v22 = vadd.f32 %v2180_v8, %v2158_v5 }
 0x2f5   : > { %v843_v12 = vadd.f32 0.0001, %v841_v39 }
 0x2f7   : > { %v4345_v0 = vpop.permute.xlu2 %2190 }
 0x307   : > { %v833_v42 = vpop.permute.xlu0 %832 }
 0x308   : > { %v837_v18 = vsub.f32 %v788_v53, %v833_v42  ;;  %v923_v21 = vsub.f32 %v811_v59, %v833_v42  ;;  %v1583_v42 = vmul.f32 0.020827498, %v4143_v48 }
 0x30a   : > { %v845_v61 = vmul.f32 2.0, %v837_v18  ;;  %v925_v28 = vmul.f32 2.0, %v923_v21  ;;  %v1587_v18 = vmul.f32 0.0976639, %v4143_v48  ;;  %v1591_v21 = vmul.f32 0.03563664, %v4143_v48 }
 0x30c   : > { %v847_v2 = vadd.f32 0.0009, %v845_v61  ;;  %v927_v34 = vadd.f32 0.0009, %v925_v28  ;;  %v1595_v61 = vmul.f32 0.07065732, %v4143_v48 }
 0x30e   : > { %852 = vrot.lane.b32.xlu2 %v847_v2, %s2927_s9  ;;  %932 = vrot.lane.b32.xlu0 %v927_v34, %s2927_s9  ;;  %v1585_v2 = vadd.f32 %v1583_v42, %v4289_v58  ;;  %v1589_v34 = vadd.f32 %v1587_v18, %v4291_v29 }
 0x33a   : > { %v873_v23 = vpop.permute.xlu2 %872 }
 0x33b   : > { %v878_v15 = vadd.f32 %v873_v23, %v816_v38 }
 0x33d   : > { %v880_v54 = vadd.f32 0.0009, %v878_v15  ;;  %v1593_v15 = vadd.f32 %v1591_v21, %v4293_v31 }
 0x33f   : > { %v882_v53 = vmul.f32 %v880_v54, %v868_v44 }
 0x341   : > { %2737 = vrcp.f32 %v882_v53  ;;  %v1597_v53 = vadd.f32 %v1595_v61, %v4297_v20 }
 0x347   : > { %v2738_v1 = vpop.eup %2737 }
 0x35a   : > { %v875_v25 = vpop.permute.xlu0 %874 }
 0x35b   : > { %v879_v63 = vadd.f32 %v875_v25, %v817_v41 }
 0x35d   : > { %v881_v38 = vadd.f32 0.0009, %v879_v63 }
 0x35f   : > { %v883_v32 = vmul.f32 %v881_v38, %v869_v33 }
 0x361   : > { %v851_v19 = vpop.permute.xlu1 %850  ;;  %2739 = vrcp.f32 %v883_v32 }
 0x362   : > { %v856_v7 = vmul.f32 %v851_v19, %v842_v16  ;;  %v931_v40 = vpop.permute.xlu0 %930 }
 0x363   : > { %v936_v35 = vmul.f32 %v931_v40, %v842_v16 }
 0x364   : > { %v886_v6 = vmul.f32 %v2738_v1, %v856_v7 }
 0x365   : > { %v938_v52 = vmul.f32 %v2738_v1, %v936_v35 }
 0x366   : > { %903 = vrot.lane.b32.xlu2 %v886_v6, %s2930_s11  ;;  %v888_v10 = vsel %vm403_vm0, %v886_v6, 0.0 }
 0x367   : > { %942 = vrot.lane.b32.xlu0 %v938_v52, %s2933_s30  ;;  %v2740_v26 = vpop.eup %2739 }
 0x368   : > { %v853_v41 = vpop.permute.xlu2 %852 }
 0x369   : > { %v857_v55 = vmul.f32 %v853_v41, %v843_v12 }
 0x36b   : > { %v887_v4 = vmul.f32 %v2740_v26, %v857_v55 }
 0x36d   : > { %v889_v56 = vsel %vm403_vm0, %v887_v4, 0.0 }
 0x36e   : > { %1600 = vrot.lane.b32.xlu2 %v4143_v48, %s2932_s28  ;;  %v890_v13 = vadd.f32 %v889_v56, %v888_v10 }
 0x36f   : > { %905 = vrot.lane.b32.xlu0 %v887_v4, %s2930_s11 }
 0x370   : > { %891 = vadd.xlane.f32.xlu1 %v890_v13 }
 0x380   : > { %v933_v17 = vpop.permute.xlu0 %932 }
 0x381   : > { %v937_v5 = vmul.f32 %v933_v17, %v843_v12 }
 0x383   : > { %v939_v8 = vmul.f32 %v2740_v26, %v937_v5 }
 0x385   : > { %944 = vrot.lane.b32.xlu0 %v939_v8, %s2933_s30 }
 0x38d   : > { %2232 = vrot.lane.b32.xlu0 %v4262_v50, %s2932_s28 }
 0x3c0   : > { %v904_v59 = vpop.permute.xlu2 %903 }
 0x3c1   : > { %v909_v52 = vsel %vm403_vm0, %v904_v59, 0.0 }
 0x3c8   : > { %v1601_v28 = vpop.permute.xlu2 %1600 }
 0x3c9   : > { %v1605_v23 = vsel %vm1051_vm8, %v1601_v28, 0.0 }
 0x3ca   : > { %v1607_v57 = vmul.f32 -0.11731234, %v1605_v23  ;;  %v1611_v54 = vmul.f32 0.19436212, %v1605_v23  ;;  %v1615_v44 = vmul.f32 -0.0413619, %v1605_v23 }
 0x3cb   : > { %v1619_v49 = vmul.f32 -0.07474548, %v1605_v23 }
 0x3cc   : > { %v1609_v43 = vadd.f32 %v1607_v57, %v1585_v2  ;;  %v1613_v27 = vadd.f32 %v1611_v54, %v1589_v34  ;;  %v1617_v25 = vadd.f32 %v1615_v44, %v1593_v15  ;;  %v2197_v2 = vsel %vm1010_vm5, 0.0, %v4349_v11 }
 0x3cd   : > { %v1621_v63 = vadd.f32 %v1619_v49, %v1597_v53  ;;  %v2199_v23 = vmul.f32 -0.11651498, %v2197_v2  ;;  %v2203_v15 = vmul.f32 0.090082645, %v2197_v2  ;;  %v2207_v44 = vmul.f32 0.046566244, %v2197_v2 }
 0x3ce   : > { %v1623_v48 = vmax.f32 %v1609_v43, 0.0  ;;  %v1625_v33 = vmax.f32 %v1613_v27, 0.0  ;;  %v1627_v38 = vmax.f32 %v1617_v25, 0.0  ;;  %v2211_v49 = vmul.f32 -0.15362437, %v2197_v2 }
 0x3cf   : > { %v1629_v58 = vmax.f32 %v1621_v63, 0.0  ;;  %v2201_v43 = vadd.f32 %v2199_v23, %v4335_v62  ;;  %v2205_v27 = vadd.f32 %v2203_v15, %v4337_v3  ;;  %v2215_v25 = vmul.f32 0.020827498, %v4262_v50 }
 0x3d0   : > { %v2263_v16 = vmul.f32 %v1623_v48, %v1623_v48  ;;  %v2267_v29 = vmul.f32 %v1625_v33, %v1625_v33  ;;  %v2275_v19 = vmul.f32 %v1627_v38, %v1627_v38  ;;  %v2219_v63 = vmul.f32 0.0976639, %v4262_v50 }
 0x3d1   : > { %v2283_v31 = vmul.f32 %v1629_v58, %v1629_v58  ;;  %v2209_v11 = vadd.f32 %v2207_v44, %v4339_v60 }
 0x3d2   : > { %v2269_v32 = vadd.f32 %v2267_v29, %v2263_v16  ;;  %v2217_v16 = vadd.f32 %v2215_v25, %v2201_v43  ;;  %v2221_v29 = vadd.f32 %v2219_v63, %v2205_v27 }
 0x3d4   : > { %v2277_v24 = vadd.f32 %v2275_v19, %v2269_v32 }
 0x3d6   : > { %v2285_v7 = vadd.f32 %v2283_v31, %v2277_v24 }
 0x3d8   : > { %v2291_v1 = vadd.f32 1e-10, %v2285_v7 }
 0x3d9   : > { %v943_v39 = vpop.permute.xlu0 %942 }
 0x3da   : > { %2741 = vrsqrt.f32 %v2291_v1  ;;  %vm2308_vm15 = vweird.f32 %v2291_v1  ;;  %v948_v57 = vsel %vm403_vm0, %v943_v39, 0.0 }
 0x3e0   : > { %v2742_v20 = vpop.eup %2741 }
 0x3e1   : > { %v2303_v6 = vmul.f32 %v2742_v20, %v2291_v1  ;;  %v906_v35 = vpop.permute.xlu0 %905  ;;  %vm2309_vm14 = vweird.f32 %v2742_v20 }
 0x3e2   : > { %v910_v12 = vsel %vm403_vm0, %v906_v35, 0.0  ;;  %vm2310_vm1 = vmor %vm2308_vm15, %vm2309_vm14 }
 0x3e3   : > { %v2304_v40 = vmul.f32 %v2742_v20, %v2303_v6  ;;  %v892_v41 = vpop.xlane.xlu1 %891  ;;  %v911_v4 = vadd.f32 %v910_v12, %v909_v52 }
 0x3e4   : > { %v893_v26 = vrot.slane %v892_v41, 4 }
 0x3e5   : > { %v2305_v55 = vmul.f32 0.5, %v2304_v40  ;;  %912 = vadd.xlane.f32.xlu2 %v911_v4 }
 0x3e6   : > { %v894_v56 = vadd.f32 %v893_v26, %v892_v41 }
 0x3e7   : > { %v2306_v10 = vsub.f32 1.5, %v2305_v55 }
 0x3e8   : > { %v895_v17 = vrot.slane %v894_v56, 2 }
 0x3e9   : > { %v2307_v13 = vmul.f32 %v2742_v20, %v2306_v10 }
 0x3ea   : > { %v896_v8 = vadd.f32 %v895_v17, %v894_v56 }
 0x3eb   : > { %v2311_v5 = vsel %vm2310_vm1, %v2742_v20, %v2307_v13 }
 0x3ec   : > { %v4378_v42 = vmul.f32 %v2311_v5, %v1623_v48  ;;  %v4380_v18 = vmul.f32 %v2311_v5, %v1625_v33  ;;  %v4382_v59 = vmul.f32 %v2311_v5, %v1627_v38  ;;  %v4384_v21 = vmul.f32 %v2311_v5, %v1629_v58 }
 0x3ed   : > { %v897_v61 = vrot.slane %v896_v8, 1  ;;  %v2223_v48 = vmul.f32 0.03563664, %v4262_v50  ;;  %v2213_v33 = vadd.f32 %v2211_v49, %v4341_v22  ;;  %v2227_v38 = vmul.f32 0.07065732, %v4262_v50 }
 0x3ef   : > { %v898_v28 = vadd.f32 %v897_v61, %v896_v8  ;;  %v2225_v62 = vadd.f32 %v2223_v48, %v2209_v11  ;;  %v2229_v31 = vadd.f32 %v2227_v38, %v2213_v33 }
 0x3f1   : > { %2610 = vpush %v898_v28 }
 0x3f7   : > { %v945_v34 = vpop.permute.xlu0 %944 }
 0x3f8   : > { %v949_v54 = vsel %vm403_vm0, %v945_v34, 0.0 }
 0x3f9   : > { %v950_v53 = vadd.f32 %v949_v54, %v948_v57 }
 0x3fb   : > { %951 = vadd.xlane.f32.xlu1 %v950_v53 }
 0x3ff   : > { %v2233_v58 = vpop.permute.xlu0 %2232 }
 0x400   : > { %v2237_v32 = vsel %vm1051_vm8, %v2233_v58, 0.0 }
 0x401   : > { %v2239_v19 = vmul.f32 -0.11731234, %v2237_v32  ;;  %v2243_v3 = vmul.f32 0.19436212, %v2237_v32  ;;  %v2247_v24 = vmul.f32 -0.0413619, %v2237_v32 }
 0x402   : > { %v2251_v7 = vmul.f32 -0.07474548, %v2237_v32 }
 0x403   : > { %v2241_v1 = vadd.f32 %v2239_v19, %v2217_v16  ;;  %v2245_v39 = vadd.f32 %v2243_v3, %v2221_v29  ;;  %v2249_v60 = vadd.f32 %v2247_v24, %v2225_v62 }
 0x404   : > { %v2253_v20 = vadd.f32 %v2251_v7, %v2229_v31 }
 0x405   : > { %v2255_v6 = vmax.f32 %v2241_v1, 0.0  ;;  %v2257_v40 = vmax.f32 %v2245_v39, 0.0  ;;  %v2259_v22 = vmax.f32 %v2249_v60, 0.0 }
 0x406   : > { %v2261_v35 = vmax.f32 %v2253_v20, 0.0 }
 0x407   : > { %v2265_v50 = vmul.f32 %v2255_v6, %v2255_v6  ;;  %v2271_v52 = vmul.f32 %v2257_v40, %v2257_v40  ;;  %v2279_v41 = vmul.f32 %v2259_v22, %v2259_v22 }
 0x408   : > { %v2287_v26 = vmul.f32 %v2261_v35, %v2261_v35 }
 0x409   : > { %v2273_v12 = vadd.f32 %v2271_v52, %v2265_v50  ;;  %v2196_v52 = vsel %vm1010_vm5, 0.0, %v4345_v0  ;;  %v2226_v0 = vmul.f32 0.07065732, %v4280_v30 }
 0x40b   : > { %v2281_v55 = vadd.f32 %v2279_v41, %v2273_v12  ;;  %v2198_v12 = vmul.f32 -0.11651498, %v2196_v52  ;;  %v2202_v41 = vmul.f32 0.090082645, %v2196_v52 }
 0x40d   : > { %v2289_v4 = vadd.f32 %v2287_v26, %v2281_v55  ;;  %v2206_v55 = vmul.f32 0.046566244, %v2196_v52  ;;  %v2210_v26 = vmul.f32 -0.15362437, %v2196_v52 }
 0x40f   : > { %v2313_v10 = vadd.f32 1e-10, %v2289_v4  ;;  %v2200_v4 = vadd.f32 %v2198_v12, %v4244_v45 }
 0x411   : > { %2743 = vrsqrt.f32 %v2313_v10  ;;  %vm2330_vm3 = vweird.f32 %v2313_v10 }
 0x414   : > { %2230 = vrot.lane.b32.xlu1 %v4280_v30, %s2932_s28 }
 0x417   : > { %v2744_v56 = vpop.eup %2743 }
 0x418   : > { %v2325_v13 = vmul.f32 %v2744_v56, %v2313_v10  ;;  %vm2331_vm2 = vweird.f32 %v2744_v56  ;;  %v2204_v10 = vadd.f32 %v2202_v41, %v4247_v37 }
 0x419   : > { %vm2332_vm4 = vmor %vm2330_vm3, %vm2331_vm2 }
 0x41a   : > { %v2326_v17 = vmul.f32 %v2744_v56, %v2325_v13  ;;  %v2218_v13 = vmul.f32 0.0976639, %v4280_v30 }
 0x41c   : > { %v2327_v5 = vmul.f32 0.5, %v2326_v17  ;;  %v2208_v17 = vadd.f32 %v2206_v55, %v4249_v14 }
 0x41e   : > { %v2328_v8 = vsub.f32 1.5, %v2327_v5  ;;  %v2222_v5 = vmul.f32 0.03563664, %v4280_v30 }
 0x420   : > { %v2329_v61 = vmul.f32 %v2744_v56, %v2328_v8  ;;  %v2212_v8 = vadd.f32 %v2210_v26, %v4251_v36  ;;  %v2224_v45 = vadd.f32 %v2222_v5, %v2208_v17 }
 0x422   : > { %v2333_v28 = vsel %vm2332_vm4, %v2744_v56, %v2329_v61  ;;  %v2214_v56 = vmul.f32 0.020827498, %v4280_v30  ;;  %s2611_s6 = spop %2610 }
 0x423   : > { %v2337_v2 = vmul.f32 %v2333_v28, %v2255_v6  ;;  %v2349_v34 = vmul.f32 %v2333_v28, %v2257_v40  ;;  %v2361_v23 = vmul.f32 %v2333_v28, %v2259_v22  ;;  %v2373_v15 = vmul.f32 %v2333_v28, %v2261_v35 }
 0x424   : > { %v2216_v28 = vadd.f32 %v2214_v56, %v2200_v4 }
 0x425   : > { %v2339_v57 = vsub.f32 %v4378_v42, %v2337_v2  ;;  %v2351_v54 = vsub.f32 %v4380_v18, %v2349_v34  ;;  %v2363_v44 = vsub.f32 %v4382_v59, %v2361_v23  ;;  %v2375_v53 = vsub.f32 %v4384_v21, %v2373_v15 }
 0x426   : > { %v2934_v59 = vmov 768.0   ;;  %v2220_v2 = vadd.f32 %v2218_v13, %v2204_v10  ;;  %v2935_v10 = vmov 256.0  }
 0x427   : > { %v2341_v49 = vmul.f32 %v2339_v57, %v2339_v57  ;;  %v2353_v43 = vmul.f32 %v2351_v54, %v2351_v54  ;;  %v2365_v27 = vmul.f32 %v2363_v44, %v2363_v44  ;;  %v2377_v11 = vmul.f32 %v2375_v53, %v2375_v53 }
 0x428   : > { %2745 = vrcp.f32 %v2934_v59  ;;  %v2228_v57 = vadd.f32 %v2226_v0, %v2212_v8 }
 0x429   : > { %v2343_v25 = vmul.f32 0.1922942, %v2341_v49  ;;  %v2355_v63 = vmul.f32 0.14805149, %v2353_v43  ;;  %v2367_v33 = vmul.f32 0.1867559, %v2365_v27 }
 0x42a   : > { %v2379_v58 = vmul.f32 0.09060447, %v2377_v11 }
 0x42b   : > { %v2357_v48 = vadd.f32 %v2355_v63, %v2343_v25 }
 0x42d   : > { %v2369_v38 = vadd.f32 %v2367_v33, %v2357_v48 }
 0x42e   : > { %v2746_v3 = vpop.eup %2745 }
 0x42f   : > { %v4405_v29 = vadd.f32 %v2379_v58, %v2369_v38  ;;  %v962_v24 = vmul.f32 768.0, %v2746_v3  ;;  %vm966_vm6 = vweird.f32 %v2746_v3 }
 0x431   : > { %v963_v31 = vsub.f32 1.0, %v962_v24  ;;  %v2383_v26 = vsel %vm403_vm0, %v4405_v29, 0.0 }
 0x433   : > { %v964_v60 = vmul.f32 %v2746_v3, %v963_v31 }
 0x435   : > { %v965_v40 = vadd.f32 %v2746_v3, %v964_v60 }
 0x437   : > { %v967_v50 = vsel %vm966_vm6, %v2746_v3, %v965_v40 }
 0x458   : > { %v913_v16 = vpop.xlane.xlu2 %912 }
 0x459   : > { %v914_v42 = vrot.slane %v913_v16, 4 }
 0x45b   : > { %v915_v32 = vadd.f32 %v914_v42, %v913_v16 }
 0x45d   : > { %v916_v18 = vrot.slane %v915_v32, 2 }
 0x45f   : > { %v917_v62 = vadd.f32 %v916_v18, %v915_v32 }
 0x461   : > { %v918_v21 = vrot.slane %v917_v62, 1 }
 0x463   : > { %v919_v19 = vadd.f32 %v918_v21, %v917_v62 }
 0x465   : > { %2612 = vpush %v919_v19 }
 0x46e   : > { %v952_v7 = vpop.xlane.xlu1 %951 }
 0x46f   : > { %v953_v1 = vrot.slane %v952_v7, 4 }
 0x471   : > { %v954_v39 = vadd.f32 %v953_v1, %v952_v7 }
 0x473   : > { %v955_v20 = vrot.slane %v954_v39, 2 }
 0x475   : > { %v956_v6 = vadd.f32 %v955_v20, %v954_v39 }
 0x477   : > { %v957_v22 = vrot.slane %v956_v6, 1 }
 0x479   : > { %v958_v35 = vadd.f32 %v957_v22, %v956_v6 }
 0x47b   : > { %2614 = vpush %v958_v35 }
 0x47c   : > { %2616 = vpush %v967_v50 }
 0x486   : > { %v2231_v61 = vpop.permute.xlu1 %2230 }
 0x487   : > { %v2236_v34 = vsel %vm1051_vm8, %v2231_v61, 0.0 }
 0x488   : > { %v2238_v23 = vmul.f32 -0.11731234, %v2236_v34  ;;  %v2242_v37 = vmul.f32 0.19436212, %v2236_v34  ;;  %v2246_v15 = vmul.f32 -0.0413619, %v2236_v34 }
 0x489   : > { %v2250_v54 = vmul.f32 -0.07474548, %v2236_v34 }
 0x48a   : > { %v2240_v44 = vadd.f32 %v2238_v23, %v2216_v28  ;;  %v2244_v53 = vadd.f32 %v2242_v37, %v2220_v2  ;;  %v2248_v14 = vadd.f32 %v2246_v15, %v2224_v45 }
 0x48b   : > { %v2252_v49 = vadd.f32 %v2250_v54, %v2228_v57 }
 0x48c   : > { %v2254_v43 = vmax.f32 %v2240_v44, 0.0  ;;  %v2256_v27 = vmax.f32 %v2244_v53, 0.0  ;;  %v2258_v36 = vmax.f32 %v2248_v14, 0.0 }
 0x48d   : > { %v2260_v30 = vmax.f32 %v2252_v49, 0.0 }
 0x48e   : > { %v2264_v25 = vmul.f32 %v2254_v43, %v2254_v43  ;;  %v2270_v63 = vmul.f32 %v2256_v27, %v2256_v27  ;;  %v2278_v48 = vmul.f32 %v2258_v36, %v2258_v36 }
 0x48f   : > { %v2286_v38 = vmul.f32 %v2260_v30, %v2260_v30 }
 0x490   : > { %v2272_v11 = vadd.f32 %v2270_v63, %v2264_v25 }
 0x492   : > { %v2280_v33 = vadd.f32 %v2278_v48, %v2272_v11 }
 0x494   : > { %v2288_v58 = vadd.f32 %v2286_v38, %v2280_v33 }
 0x496   : > { %v2312_v16 = vadd.f32 1e-10, %v2288_v58  ;;  %s2613_s7 = spop %2612 }
 0x497   : > { %s921_s10 = sadd.f32 %s2613_s7, %s2611_s6 }
 0x498   : > { %2747 = vrsqrt.f32 %v2312_v16  ;;  %vm2320_vm7 = vweird.f32 %v2312_v16 }
 0x499   : > { %2749 = vrcp.f32 %v2935_v10 }
 0x49e   : > { %v2748_v42 = vpop.eup %2747 }
 0x49f   : > { %v2315_v32 = vmul.f32 %v2748_v42, %v2312_v16  ;;  %vm2321_vm5 = vweird.f32 %v2748_v42  ;;  %v2750_v56 = vpop.eup %2749 }
 0x4a0   : > { %vm2322_vm8 = vmor %vm2320_vm7, %vm2321_vm5  ;;  %v2395_v13 = vmul.f32 256.0, %v2750_v56  ;;  %vm2399_vm9 = vweird.f32 %v2750_v56 }
 0x4a1   : > { %v2316_v18 = vmul.f32 %v2748_v42, %v2315_v32 }
 0x4a2   : > { %v2396_v17 = vsub.f32 1.0, %v2395_v13 }
 0x4a3   : > { %v2317_v62 = vmul.f32 0.5, %v2316_v18 }
 0x4a4   : > { %v2397_v61 = vmul.f32 %v2750_v56, %v2396_v17 }
 0x4a5   : > { %v2318_v59 = vsub.f32 1.5, %v2317_v62 }
 0x4a6   : > { %v2398_v34 = vadd.f32 %v2750_v56, %v2397_v61 }
 0x4a7   : > { %v2319_v21 = vmul.f32 %v2748_v42, %v2318_v59 }
 0x4a8   : > { %v2400_v37 = vsel %vm2399_vm9, %v2750_v56, %v2398_v34 }
 0x4a9   : > { %v2323_v19 = vsel %vm2322_vm8, %v2748_v42, %v2319_v21 }
 0x4aa   : > { %v2336_v3 = vmul.f32 %v2323_v19, %v2254_v43  ;;  %v2348_v24 = vmul.f32 %v2323_v19, %v2256_v27  ;;  %v2360_v31 = vmul.f32 %v2323_v19, %v2258_v36  ;;  %v2372_v7 = vmul.f32 %v2323_v19, %v2260_v30 }
 0x4ac   : > { %v2338_v1 = vsub.f32 %v4314_v47, %v2336_v3  ;;  %v2350_v39 = vsub.f32 %v4316_v51, %v2348_v24  ;;  %s2615_s24 = spop %2614  ;;  %v2362_v60 = vsub.f32 %v4318_v9, %v2360_v31  ;;  %v2374_v20 = vsub.f32 %v4320_v46, %v2372_v7 }
 0x4ad   : > { %s960_s21 = sadd.f32 %s2615_s24, %s921_s10  ;;  %s2617_s17 = spop %2616 }
 0x4ae   : > { %v2340_v6 = vmul.f32 %v2338_v1, %v2338_v1  ;;  %v2352_v40 = vmul.f32 %v2350_v39, %v2350_v39  ;;  %v2364_v22 = vmul.f32 %v2362_v60, %v2362_v60  ;;  %v2376_v51 = vmul.f32 %v2374_v20, %v2374_v20 }
 0x4af   : > { %s969_s25 = smul.f32 %s2617_s17, %s960_s21 }
 0x4b0   : > { %v2342_v47 = vmul.f32 0.1922942, %v2340_v6  ;;  %v2354_v35 = vmul.f32 0.14805149, %v2352_v40  ;;  %v2366_v9 = vmul.f32 0.1867559, %v2364_v22 }
 0x4b1   : > { %v2403_v50 = vstv %s969_s25  ;;  %v2378_v46 = vmul.f32 0.09060447, %v2376_v51 }
 0x4b2   : > { %2404 = vst [vmem:[%s326_s0] sm:$0xff] %v2403_v50  ;;  %v2356_v52 = vadd.f32 %v2354_v35, %v2342_v47 }
 0x4b4   : > { %v2368_v12 = vadd.f32 %v2366_v9, %v2356_v52 }
 0x4b6   : > { %v2380_v41 = vadd.f32 %v2378_v46, %v2368_v12 }
 0x4b8   : > { %v2382_v55 = vsel %vm403_vm0, %v2380_v41, 0.0 }
 0x4b9   : > { %v2384_v4 = vadd.f32 %v2383_v26, %v2382_v55 }
 0x4bb   : > { %2385 = vadd.xlane.f32.xlu2 %v2384_v4 }
 0x52e   : > { %v2386_v5 = vpop.xlane.xlu2 %2385 }
 0x52f   : > { %v2387_v8 = vrot.slane %v2386_v5, 4 }
 0x531   : > { %v2388_v0 = vadd.f32 %v2387_v8, %v2386_v5 }
 0x533   : > { %v2389_v28 = vrot.slane %v2388_v0, 2 }
 0x535   : > { %v2390_v2 = vadd.f32 %v2389_v28, %v2388_v0 }
 0x537   : > { %v2391_v45 = vrot.slane %v2390_v2, 1 }
 0x539   : > { %v2392_v23 = vadd.f32 %v2391_v45, %v2390_v2 }
 0x53b   : > { %2618 = vpush %v2392_v23 }
 0x53c   : > { %2620 = vpush %v2400_v37 }
 0x56c   : > { %s2619_s8 = spop %2618 }
 0x56d   : > { %s2621_s23 = spop %2620 }
 0x56e   : > { %s2402_s18 = smul.f32 %s2621_s23, %s2619_s8 }
 0x570   : > { %v2405_v29 = vstv %s2402_s18 }
 0x571   : > { %2406 = vst [vmem:[%s330_s26] sm:$0xff] %v2405_v29 }
 0x572 PF: > { %p20_p4 = scmp.ge.s32.totalorder %s3018_s12, 4   ;;  %s4600_s18 = smov %s2911_s19 }
 0x573   : > { %s4601_s19 = smov %s2915_s20  ;;  %s4602_s20 = smov %s3029_s16 }
 0x574   : > { %s4603_s21 = smov %s3018_s12  ;;  %22 = sbr.rel (!%p20_p4) target bundleno = 8 (0x8), region = 109 }
 0x579   :  { %2440 = vsyncpa [#allocation3], 1 }
 0x57a   :  { %2442 = vsyncpa [#allocation3 + $0x1], 1 }
 0x57b   :  { %2443 = vsyncpa [#allocation5], 1 }
 0x57c   :  { %2445 = vsyncpa [#allocation5 + $0x1], 1 }
 0x57d   :  { %2446 = vsyncpa [#allocation8], 1 }

</bundles_post_ra>
